<compile_context>
chip_gen: v7x
topology: tpu7x:2x2x1
jax: 0.10.0
libtpu: 0.0.40
codegen_flags: <defaults>
</compile_context>

<pallas_src>
import jax
import jax.numpy as jnp
from jax.experimental import pallas as pl
from jax.experimental.pallas import tpu as pltpu

DIMS = [3, 450, 400, 280, 280, 280, 280, 2]   # layer widths (input ... output)
N_LAYERS = 7


def _round_up(n, m):
    return ((n + m - 1) // m) * m


# Padded feature widths.  The 3-wide input is padded to 128 so layer 1 runs on
# the MXU (a K=128 bf16 pass is ~7% of the layer-2 matmul FLOPs and removes
# the old VALU-heavy broadcast-FMA layer 1).  280 pads to 384, not 512.
PDIMS = [128] + [_round_up(d, 128) for d in DIMS[1:]]

# Batch tile.  The kernel is MXU weight-push bound at small M, so a larger M
# amortizes the per-layer weight push and the ~0.35 us per-grid-step overhead.
# 512 fits all generations' VMEM (incl. v7x 64 MiB) with big margin; sweep
# 512-1024 if desired.
MAX_TILE_B = 512


def _default_act_dtype():
    # v6e / v7x have bf16-native VPU/EUP -> do bias+CELU/swish in bf16 there.
    # v5e (and older) have no bf16 elementwise path -> keep f32.
    try:
        kind = jax.devices()[0].device_kind.lower()
    except Exception:
        return jnp.float32
    return jnp.bfloat16 if ("v6" in kind or "v7" in kind) else jnp.float32


ACT_DTYPE = _default_act_dtype()


def _celu(x):
    # nn.CELU(alpha=1.0): x if x > 0 else exp(x) - 1.
    # No clamp: exp on the discarded positive branch may overflow to inf, but
    # the select drops it safely (forward-only kernel).
    return jnp.where(x > 0, x, jnp.exp(x) - 1.0)


def _swish(x):
    # x * sigmoid(x); sigmoid via tanh -> a single EUP op.
    return x * (0.5 * (1.0 + jnp.tanh(0.5 * x)))


_ACTS = (_celu, _swish, _celu, _swish, _celu, _celu, None)


def _make_kernel(act_dtype):
    def kernel(x_ref, *refs):
        """refs = (w1, b1, w2, b2, ..., w7, b7, out_ref).

        Weights are bf16 (Kp, Np); biases are f32 (1, Np).  All parameters use
        a constant index_map so they stay VMEM-resident across the batch grid;
        only the x / out tiles are streamed per grid step.
        """
        out_ref = refs[-1]
        params = refs[:-1]

        h = x_ref[...].astype(jnp.bfloat16)          # (tile_b, 128)
        for li in range(N_LAYERS):
            w = params[2 * li][...]                  # bf16 (Kp, Np)
            b = params[2 * li + 1][...]              # f32  (1,  Np)
            z = jnp.dot(h, w, preferred_element_type=jnp.float32)
            z = (z + b).astype(act_dtype)            # f32 acc + bias, then act dtype
            act = _ACTS[li]
            if act is not None:
                z = act(z)
            h = z.astype(jnp.bfloat16)               # next MXU operand / store
        out_ref[...] = h.astype(out_ref.dtype)

    return kernel


def pad_params(weights, biases):
    """Pad / cast parameters ONCE (call outside the sampling loop).

    Returns a flat tuple (w1, b1, w2, b2, ..., w7, b7):
      weights: bf16 (PDIMS[i], PDIMS[i+1]), zero-padded
      biases : f32  (1, PDIMS[i+1]),        zero-padded
    Padded rows/cols/lanes are exactly zero and CELU(0) = swish(0) = 0, so
    padded lanes stay zero through every layer.
    weights[i] has shape (DIMS[i], DIMS[i+1]) (i.e. y = x @ W + b convention).
    """
    out = []
    for li in range(N_LAYERS):
        di, do = DIMS[li], DIMS[li + 1]
        dpi, dpo = PDIMS[li], PDIMS[li + 1]
        wp = jnp.zeros((dpi, dpo), jnp.bfloat16).at[:di, :do].set(
            jnp.asarray(weights[li]).astype(jnp.bfloat16))
        bp = jnp.zeros((1, dpo), jnp.float32).at[0, :do].set(
            jnp.asarray(biases[li], jnp.float32))
        out += [wp, bp]
    return tuple(out)


def _choose_tile_b(B):
    if B <= 256:
        return _round_up(B, 16)                      # bf16 sublane packing
    # >= 2 grid steps so both v7x TensorCores get work; 256-multiples keep the
    # 2x256 MXU (v6e/v7x) and the 4x128 MXU (v5e) full.
    return int(min(MAX_TILE_B, _round_up((B + 1) // 2, 256)))


def _vmem_limit_bytes(param_bytes, tile_b):
    # Computed from actual buffers instead of requesting v7x's entire 64 MiB:
    # 2x params (double-buffer worst case) + generous headroom for the f32
    # intermediates and the streamed x / out tiles.
    act_tile = tile_b * max(PDIMS) * 4
    return int(min(48 << 20, 2 * param_bytes + 16 * act_tile + (8 << 20)))


@jax.jit
def diffusion_forward(x, padded_params):
    """x: (B, 3) f32; padded_params: output of pad_params()."""
    B = x.shape[0]
    tile_b = _choose_tile_b(B)
    bp = _round_up(B, tile_b)

    # Single zero-padded (bp, 128) input operand: only 3 real columns, but the
    # extra DMA is tiny next to the ~2 MiB of resident weights, and K=128
    # keeps layer 1 on the MXU with a perfectly standard tile shape.
    xp = jnp.zeros((bp, PDIMS[0]), jnp.float32).at[:B, :DIMS[0]].set(
        x.astype(jnp.float32))

    grid = (bp // tile_b,)
    in_specs = (
        [pl.BlockSpec((tile_b, PDIMS[0]), lambda i: (i, 0))]
        + [pl.BlockSpec(p.shape, lambda i: (0, 0)) for p in padded_params]
    )
    out_specs = pl.BlockSpec((tile_b, PDIMS[-1]), lambda i: (i, 0))

    param_bytes = int(sum(p.size * p.dtype.itemsize for p in padded_params))
    flops = 2 * bp * sum(PDIMS[li] * PDIMS[li + 1] for li in range(N_LAYERS))
    transcendentals = bp * sum(PDIMS[li + 1] for li in range(N_LAYERS - 1))
    bytes_accessed = param_bytes + bp * (PDIMS[0] * 4 + PDIMS[-1] * 2)

    out = pl.pallas_call(
        _make_kernel(ACT_DTYPE),
        out_shape=jax.ShapeDtypeStruct((bp, PDIMS[-1]), jnp.bfloat16),
        grid=grid,
        in_specs=in_specs,
        out_specs=out_specs,
        compiler_params=pltpu.CompilerParams(
            dimension_semantics=("parallel",),           # megacore on v7x
            vmem_limit_bytes=_vmem_limit_bytes(param_bytes, tile_b),
        ),
        cost_estimate=pl.CostEstimate(
            flops=flops,
            transcendentals=transcendentals,
            bytes_accessed=bytes_accessed,
        ),
    )(xp, *padded_params)

    return out[:B, :DIMS[-1]].astype(jnp.float32)


def init_params(key):
    """Deterministic init matching nn.Linear's U(-1/sqrt(fan_in), 1/sqrt(fan_in)).
    weights[i]: (DIMS[i], DIMS[i+1]) so y = x @ W + b."""
    weights, biases = [], []
    for li in range(N_LAYERS):
        fan_in, fan_out = DIMS[li], DIMS[li + 1]
        key, kw, kb = jax.random.split(key, 3)
        bound = 1.0 / jnp.sqrt(jnp.float32(fan_in))
        w = jax.random.uniform(kw, (fan_in, fan_out), jnp.float32, -bound, bound)
        b = jax.random.uniform(kb, (fan_out,), jnp.float32, -bound, bound)
        weights.append(w)
        biases.append(b)
    return weights, biases


def reference_forward(x, weights, biases):
    """Pure-JAX f32 reference with the exact PyTorch activation semantics."""
    h = x
    for li in range(N_LAYERS):
        h = h @ weights[li] + biases[li]
        if li in (0, 2, 4, 5):                       # CELU(alpha=1)
            h = jnp.where(h > 0, h, jnp.expm1(h))
        elif li in (1, 3):                           # swish
            h = jax.nn.sigmoid(h) * h
    return h


# TODO(synk): Diffusion.sample (host-side per-sample reverse-diffusion loop) is
# driver code, not a kernel; amortize it by batching chains/timesteps or by
# wrapping diffusion_forward in a lax.scan (weights stay device-resident), plus
# cross-call weight prefetch if per-timestep launches still dominate.

if __name__ == "__main__":
    key = jax.random.PRNGKey(0)
    key, kx = jax.random.split(key)

    batch = 16
    x = jax.random.normal(kx, (batch, DIMS[0]), jnp.float32)  # (B, 3): 2 data cols + time

    weights, biases = init_params(key)
    padded = pad_params(weights, biases)          # one-time padding / bf16 cast

    out = diffusion_forward(x, padded)
    out = jax.block_until_ready(out)

    ref = reference_forward(x, weights, biases)
    assert out.shape == (batch, DIMS[-1])
    # Loose tolerance: weights/activations ride the bf16 MXU / VPU path.
    max_err = float(jnp.max(jnp.abs(out - ref)))
    assert jnp.allclose(out, ref, atol=5e-2, rtol=5e-2), (
        f"mismatch vs f32 reference, max abs err = {max_err}")

    print("KERNEL_OK")
</pallas_src>

<mosaic_0001>
module attributes {stable_mosaic.version = 11 : i64} {
  func.func @kernel(%arg0: i32, %arg1: memref<16x128xf32, #tpu.memory_space<vmem>>, %arg2: memref<128x512xbf16, #tpu.memory_space<vmem>>, %arg3: memref<1x512xf32, #tpu.memory_space<vmem>>, %arg4: memref<512x512xbf16, #tpu.memory_space<vmem>>, %arg5: memref<1x512xf32, #tpu.memory_space<vmem>>, %arg6: memref<512x384xbf16, #tpu.memory_space<vmem>>, %arg7: memref<1x384xf32, #tpu.memory_space<vmem>>, %arg8: memref<384x384xbf16, #tpu.memory_space<vmem>>, %arg9: memref<1x384xf32, #tpu.memory_space<vmem>>, %arg10: memref<384x384xbf16, #tpu.memory_space<vmem>>, %arg11: memref<1x384xf32, #tpu.memory_space<vmem>>, %arg12: memref<384x384xbf16, #tpu.memory_space<vmem>>, %arg13: memref<1x384xf32, #tpu.memory_space<vmem>>, %arg14: memref<384x128xbf16, #tpu.memory_space<vmem>>, %arg15: memref<1x128xf32, #tpu.memory_space<vmem>>, %arg16: memref<16x128xbf16, #tpu.memory_space<vmem>>) attributes {dimension_semantics = [#tpu.dimension_semantics<parallel>], iteration_bounds = array<i64: 1>, scalar_prefetch = 0 : i64, scratch_operands = 0 : i64, tpu.core_type = #tpu.core_type<tc>, window_params = [{transform_indices = @transform_0, window_bounds = array<i64: 16, 128>}, {pipeline_mode = #tpu.pipeline_mode<synchronous>, transform_indices = @transform_1, window_bounds = array<i64: 128, 512>}, {pipeline_mode = #tpu.pipeline_mode<synchronous>, transform_indices = @transform_2, window_bounds = array<i64: 1, 512>}, {pipeline_mode = #tpu.pipeline_mode<synchronous>, transform_indices = @transform_3, window_bounds = array<i64: 512, 512>}, {pipeline_mode = #tpu.pipeline_mode<synchronous>, transform_indices = @transform_4, window_bounds = array<i64: 1, 512>}, {pipeline_mode = #tpu.pipeline_mode<synchronous>, transform_indices = @transform_5, window_bounds = array<i64: 512, 384>}, {pipeline_mode = #tpu.pipeline_mode<synchronous>, transform_indices = @transform_6, window_bounds = array<i64: 1, 384>}, {pipeline_mode = #tpu.pipeline_mode<synchronous>, transform_indices = @transform_7, window_bounds = array<i64: 384, 384>}, {pipeline_mode = #tpu.pipeline_mode<synchronous>, transform_indices = @transform_8, window_bounds = array<i64: 1, 384>}, {pipeline_mode = #tpu.pipeline_mode<synchronous>, transform_indices = @transform_9, window_bounds = array<i64: 384, 384>}, {pipeline_mode = #tpu.pipeline_mode<synchronous>, transform_indices = @transform_10, window_bounds = array<i64: 1, 384>}, {pipeline_mode = #tpu.pipeline_mode<synchronous>, transform_indices = @transform_11, window_bounds = array<i64: 384, 384>}, {pipeline_mode = #tpu.pipeline_mode<synchronous>, transform_indices = @transform_12, window_bounds = array<i64: 1, 384>}, {pipeline_mode = #tpu.pipeline_mode<synchronous>, transform_indices = @transform_13, window_bounds = array<i64: 384, 128>}, {pipeline_mode = #tpu.pipeline_mode<synchronous>, transform_indices = @transform_14, window_bounds = array<i64: 1, 128>}, {transform_indices = @transform_15, window_bounds = array<i64: 16, 128>}]} {
    %c0 = arith.constant 0 : index
    %c0_0 = arith.constant 0 : index
    %0 = vector.load %arg1[%c0, %c0_0] : memref<16x128xf32, #tpu.memory_space<vmem>>, vector<16x128xf32>
    %1 = arith.truncf %0 : vector<16x128xf32> to vector<16x128xbf16>
    %c0_1 = arith.constant 0 : index
    %c0_2 = arith.constant 0 : index
    %2 = vector.load %arg2[%c0_1, %c0_2] : memref<128x512xbf16, #tpu.memory_space<vmem>>, vector<128x512xbf16>
    %c0_3 = arith.constant 0 : index
    %c0_4 = arith.constant 0 : index
    %3 = vector.load %arg3[%c0_3, %c0_4] : memref<1x512xf32, #tpu.memory_space<vmem>>, vector<1x512xf32>
    %cst = arith.constant dense<0.000000e+00> : vector<16x512xf32>
    %4 = tpu.matmul %1, %2, %cst {dimension_numbers = #tpu.dot_dimension_numbers<[1], [0], [0], [1], [0, 0, 1, 1], [], []>} : vector<16x128xbf16>, vector<128x512xbf16>, vector<16x512xf32> -> vector<16x512xf32>
    %5 = vector.broadcast %3 : vector<1x512xf32> to vector<16x512xf32>
    %6 = arith.addf %4, %5 : vector<16x512xf32>
    %cst_5 = arith.constant 0.000000e+00 : f32
    %7 = vector.broadcast %cst_5 : f32 to vector<16x512xf32>
    %8 = arith.cmpf ogt, %6, %7 : vector<16x512xf32>
    %9 = math.exp %6 : vector<16x512xf32>
    %cst_6 = arith.constant 1.000000e+00 : f32
    %10 = vector.broadcast %cst_6 : f32 to vector<16x512xf32>
    %11 = arith.subf %9, %10 : vector<16x512xf32>
    %12 = arith.select %8, %6, %11 : vector<16x512xi1>, vector<16x512xf32>
    %13 = arith.truncf %12 : vector<16x512xf32> to vector<16x512xbf16>
    %c0_7 = arith.constant 0 : index
    %c0_8 = arith.constant 0 : index
    %14 = vector.load %arg4[%c0_7, %c0_8] : memref<512x512xbf16, #tpu.memory_space<vmem>>, vector<512x512xbf16>
    %c0_9 = arith.constant 0 : index
    %c0_10 = arith.constant 0 : index
    %15 = vector.load %arg5[%c0_9, %c0_10] : memref<1x512xf32, #tpu.memory_space<vmem>>, vector<1x512xf32>
    %cst_11 = arith.constant dense<0.000000e+00> : vector<16x512xf32>
    %16 = tpu.matmul %13, %14, %cst_11 {dimension_numbers = #tpu.dot_dimension_numbers<[1], [0], [0], [1], [0, 0, 1, 1], [], []>} : vector<16x512xbf16>, vector<512x512xbf16>, vector<16x512xf32> -> vector<16x512xf32>
    %17 = vector.broadcast %15 : vector<1x512xf32> to vector<16x512xf32>
    %18 = arith.addf %16, %17 : vector<16x512xf32>
    %cst_12 = arith.constant 5.000000e-01 : f32
    %19 = vector.broadcast %cst_12 : f32 to vector<16x512xf32>
    %20 = arith.mulf %19, %18 : vector<16x512xf32>
    %21 = math.tanh %20 : vector<16x512xf32>
    %cst_13 = arith.constant 1.000000e+00 : f32
    %22 = vector.broadcast %cst_13 : f32 to vector<16x512xf32>
    %23 = arith.addf %22, %21 : vector<16x512xf32>
    %cst_14 = arith.constant 5.000000e-01 : f32
    %24 = vector.broadcast %cst_14 : f32 to vector<16x512xf32>
    %25 = arith.mulf %24, %23 : vector<16x512xf32>
    %26 = arith.mulf %18, %25 : vector<16x512xf32>
    %27 = arith.truncf %26 : vector<16x512xf32> to vector<16x512xbf16>
    %c0_15 = arith.constant 0 : index
    %c0_16 = arith.constant 0 : index
    %28 = vector.load %arg6[%c0_15, %c0_16] : memref<512x384xbf16, #tpu.memory_space<vmem>>, vector<512x384xbf16>
    %c0_17 = arith.constant 0 : index
    %c0_18 = arith.constant 0 : index
    %29 = vector.load %arg7[%c0_17, %c0_18] : memref<1x384xf32, #tpu.memory_space<vmem>>, vector<1x384xf32>
    %cst_19 = arith.constant dense<0.000000e+00> : vector<16x384xf32>
    %30 = tpu.matmul %27, %28, %cst_19 {dimension_numbers = #tpu.dot_dimension_numbers<[1], [0], [0], [1], [0, 0, 1, 1], [], []>} : vector<16x512xbf16>, vector<512x384xbf16>, vector<16x384xf32> -> vector<16x384xf32>
    %31 = vector.broadcast %29 : vector<1x384xf32> to vector<16x384xf32>
    %32 = arith.addf %30, %31 : vector<16x384xf32>
    %cst_20 = arith.constant 0.000000e+00 : f32
    %33 = vector.broadcast %cst_20 : f32 to vector<16x384xf32>
    %34 = arith.cmpf ogt, %32, %33 : vector<16x384xf32>
    %35 = math.exp %32 : vector<16x384xf32>
    %cst_21 = arith.constant 1.000000e+00 : f32
    %36 = vector.broadcast %cst_21 : f32 to vector<16x384xf32>
    %37 = arith.subf %35, %36 : vector<16x384xf32>
    %38 = arith.select %34, %32, %37 : vector<16x384xi1>, vector<16x384xf32>
    %39 = arith.truncf %38 : vector<16x384xf32> to vector<16x384xbf16>
    %c0_22 = arith.constant 0 : index
    %c0_23 = arith.constant 0 : index
    %40 = vector.load %arg8[%c0_22, %c0_23] : memref<384x384xbf16, #tpu.memory_space<vmem>>, vector<384x384xbf16>
    %c0_24 = arith.constant 0 : index
    %c0_25 = arith.constant 0 : index
    %41 = vector.load %arg9[%c0_24, %c0_25] : memref<1x384xf32, #tpu.memory_space<vmem>>, vector<1x384xf32>
    %cst_26 = arith.constant dense<0.000000e+00> : vector<16x384xf32>
    %42 = tpu.matmul %39, %40, %cst_26 {dimension_numbers = #tpu.dot_dimension_numbers<[1], [0], [0], [1], [0, 0, 1, 1], [], []>} : vector<16x384xbf16>, vector<384x384xbf16>, vector<16x384xf32> -> vector<16x384xf32>
    %43 = vector.broadcast %41 : vector<1x384xf32> to vector<16x384xf32>
    %44 = arith.addf %42, %43 : vector<16x384xf32>
    %cst_27 = arith.constant 5.000000e-01 : f32
    %45 = vector.broadcast %cst_27 : f32 to vector<16x384xf32>
    %46 = arith.mulf %45, %44 : vector<16x384xf32>
    %47 = math.tanh %46 : vector<16x384xf32>
    %cst_28 = arith.constant 1.000000e+00 : f32
    %48 = vector.broadcast %cst_28 : f32 to vector<16x384xf32>
    %49 = arith.addf %48, %47 : vector<16x384xf32>
    %cst_29 = arith.constant 5.000000e-01 : f32
    %50 = vector.broadcast %cst_29 : f32 to vector<16x384xf32>
    %51 = arith.mulf %50, %49 : vector<16x384xf32>
    %52 = arith.mulf %44, %51 : vector<16x384xf32>
    %53 = arith.truncf %52 : vector<16x384xf32> to vector<16x384xbf16>
    %c0_30 = arith.constant 0 : index
    %c0_31 = arith.constant 0 : index
    %54 = vector.load %arg10[%c0_30, %c0_31] : memref<384x384xbf16, #tpu.memory_space<vmem>>, vector<384x384xbf16>
    %c0_32 = arith.constant 0 : index
    %c0_33 = arith.constant 0 : index
    %55 = vector.load %arg11[%c0_32, %c0_33] : memref<1x384xf32, #tpu.memory_space<vmem>>, vector<1x384xf32>
    %cst_34 = arith.constant dense<0.000000e+00> : vector<16x384xf32>
    %56 = tpu.matmul %53, %54, %cst_34 {dimension_numbers = #tpu.dot_dimension_numbers<[1], [0], [0], [1], [0, 0, 1, 1], [], []>} : vector<16x384xbf16>, vector<384x384xbf16>, vector<16x384xf32> -> vector<16x384xf32>
    %57 = vector.broadcast %55 : vector<1x384xf32> to vector<16x384xf32>
    %58 = arith.addf %56, %57 : vector<16x384xf32>
    %cst_35 = arith.constant 0.000000e+00 : f32
    %59 = vector.broadcast %cst_35 : f32 to vector<16x384xf32>
    %60 = arith.cmpf ogt, %58, %59 : vector<16x384xf32>
    %61 = math.exp %58 : vector<16x384xf32>
    %cst_36 = arith.constant 1.000000e+00 : f32
    %62 = vector.broadcast %cst_36 : f32 to vector<16x384xf32>
    %63 = arith.subf %61, %62 : vector<16x384xf32>
    %64 = arith.select %60, %58, %63 : vector<16x384xi1>, vector<16x384xf32>
    %65 = arith.truncf %64 : vector<16x384xf32> to vector<16x384xbf16>
    %c0_37 = arith.constant 0 : index
    %c0_38 = arith.constant 0 : index
    %66 = vector.load %arg12[%c0_37, %c0_38] : memref<384x384xbf16, #tpu.memory_space<vmem>>, vector<384x384xbf16>
    %c0_39 = arith.constant 0 : index
    %c0_40 = arith.constant 0 : index
    %67 = vector.load %arg13[%c0_39, %c0_40] : memref<1x384xf32, #tpu.memory_space<vmem>>, vector<1x384xf32>
    %cst_41 = arith.constant dense<0.000000e+00> : vector<16x384xf32>
    %68 = tpu.matmul %65, %66, %cst_41 {dimension_numbers = #tpu.dot_dimension_numbers<[1], [0], [0], [1], [0, 0, 1, 1], [], []>} : vector<16x384xbf16>, vector<384x384xbf16>, vector<16x384xf32> -> vector<16x384xf32>
    %69 = vector.broadcast %67 : vector<1x384xf32> to vector<16x384xf32>
    %70 = arith.addf %68, %69 : vector<16x384xf32>
    %cst_42 = arith.constant 0.000000e+00 : f32
    %71 = vector.broadcast %cst_42 : f32 to vector<16x384xf32>
    %72 = arith.cmpf ogt, %70, %71 : vector<16x384xf32>
    %73 = math.exp %70 : vector<16x384xf32>
    %cst_43 = arith.constant 1.000000e+00 : f32
    %74 = vector.broadcast %cst_43 : f32 to vector<16x384xf32>
    %75 = arith.subf %73, %74 : vector<16x384xf32>
    %76 = arith.select %72, %70, %75 : vector<16x384xi1>, vector<16x384xf32>
    %77 = arith.truncf %76 : vector<16x384xf32> to vector<16x384xbf16>
    %c0_44 = arith.constant 0 : index
    %c0_45 = arith.constant 0 : index
    %78 = vector.load %arg14[%c0_44, %c0_45] : memref<384x128xbf16, #tpu.memory_space<vmem>>, vector<384x128xbf16>
    %c0_46 = arith.constant 0 : index
    %c0_47 = arith.constant 0 : index
    %79 = vector.load %arg15[%c0_46, %c0_47] : memref<1x128xf32, #tpu.memory_space<vmem>>, vector<1x128xf32>
    %cst_48 = arith.constant dense<0.000000e+00> : vector<16x128xf32>
    %80 = tpu.matmul %77, %78, %cst_48 {dimension_numbers = #tpu.dot_dimension_numbers<[1], [0], [0], [1], [0, 0, 1, 1], [], []>} : vector<16x384xbf16>, vector<384x128xbf16>, vector<16x128xf32> -> vector<16x128xf32>
    %81 = vector.broadcast %79 : vector<1x128xf32> to vector<16x128xf32>
    %82 = arith.addf %80, %81 : vector<16x128xf32>
    %83 = arith.truncf %82 : vector<16x128xf32> to vector<16x128xbf16>
    %c0_49 = arith.constant 0 : index
    %c0_50 = arith.constant 0 : index
    %84 = vector.load %arg16[%c0_49, %c0_50] : memref<16x128xbf16, #tpu.memory_space<vmem>>, vector<16x128xbf16>
    tpu.vector_store %arg16[%c0_49, %c0_50], %83 {strides = array<i32>} : memref<16x128xbf16, #tpu.memory_space<vmem>>, vector<16x128xbf16>,
    return
  }
  func.func @transform_0(%arg0: i32) -> (i32, i32) {
    %c0_i32 = arith.constant 0 : i32
    %c0_i32_0 = arith.constant 0 : i32
    return %arg0, %c0_i32 : i32, i32
  }
  func.func @transform_1(%arg0: i32) -> (i32, i32) {
    %c0_i32 = arith.constant 0 : i32
    %c0_i32_0 = arith.constant 0 : i32
    %c0_i32_1 = arith.constant 0 : i32
    return %c0_i32, %c0_i32_0 : i32, i32
  }
  func.func @transform_2(%arg0: i32) -> (i32, i32) {
    %c0_i32 = arith.constant 0 : i32
    %c0_i32_0 = arith.constant 0 : i32
    %c0_i32_1 = arith.constant 0 : i32
    return %c0_i32, %c0_i32_0 : i32, i32
  }
  func.func @transform_3(%arg0: i32) -> (i32, i32) {
    %c0_i32 = arith.constant 0 : i32
    %c0_i32_0 = arith.constant 0 : i32
    %c0_i32_1 = arith.constant 0 : i32
    return %c0_i32, %c0_i32_0 : i32, i32
  }
  func.func @transform_4(%arg0: i32) -> (i32, i32) {
    %c0_i32 = arith.constant 0 : i32
    %c0_i32_0 = arith.constant 0 : i32
    %c0_i32_1 = arith.constant 0 : i32
    return %c0_i32, %c0_i32_0 : i32, i32
  }
  func.func @transform_5(%arg0: i32) -> (i32, i32) {
    %c0_i32 = arith.constant 0 : i32
    %c0_i32_0 = arith.constant 0 : i32
    %c0_i32_1 = arith.constant 0 : i32
    return %c0_i32, %c0_i32_0 : i32, i32
  }
  func.func @transform_6(%arg0: i32) -> (i32, i32) {
    %c0_i32 = arith.constant 0 : i32
    %c0_i32_0 = arith.constant 0 : i32
    %c0_i32_1 = arith.constant 0 : i32
    return %c0_i32, %c0_i32_0 : i32, i32
  }
  func.func @transform_7(%arg0: i32) -> (i32, i32) {
    %c0_i32 = arith.constant 0 : i32
    %c0_i32_0 = arith.constant 0 : i32
    %c0_i32_1 = arith.constant 0 : i32
    return %c0_i32, %c0_i32_0 : i32, i32
  }
  func.func @transform_8(%arg0: i32) -> (i32, i32) {
    %c0_i32 = arith.constant 0 : i32
    %c0_i32_0 = arith.constant 0 : i32
    %c0_i32_1 = arith.constant 0 : i32
    return %c0_i32, %c0_i32_0 : i32, i32
  }
  func.func @transform_9(%arg0: i32) -> (i32, i32) {
    %c0_i32 = arith.constant 0 : i32
    %c0_i32_0 = arith.constant 0 : i32
    %c0_i32_1 = arith.constant 0 : i32
    return %c0_i32, %c0_i32_0 : i32, i32
  }
  func.func @transform_10(%arg0: i32) -> (i32, i32) {
    %c0_i32 = arith.constant 0 : i32
    %c0_i32_0 = arith.constant 0 : i32
    %c0_i32_1 = arith.constant 0 : i32
    return %c0_i32, %c0_i32_0 : i32, i32
  }
  func.func @transform_11(%arg0: i32) -> (i32, i32) {
    %c0_i32 = arith.constant 0 : i32
    %c0_i32_0 = arith.constant 0 : i32
    %c0_i32_1 = arith.constant 0 : i32
    return %c0_i32, %c0_i32_0 : i32, i32
  }
  func.func @transform_12(%arg0: i32) -> (i32, i32) {
    %c0_i32 = arith.constant 0 : i32
    %c0_i32_0 = arith.constant 0 : i32
    %c0_i32_1 = arith.constant 0 : i32
    return %c0_i32, %c0_i32_0 : i32, i32
  }
  func.func @transform_13(%arg0: i32) -> (i32, i32) {
    %c0_i32 = arith.constant 0 : i32
    %c0_i32_0 = arith.constant 0 : i32
    %c0_i32_1 = arith.constant 0 : i32
    return %c0_i32, %c0_i32_0 : i32, i32
  }
  func.func @transform_14(%arg0: i32) -> (i32, i32) {
    %c0_i32 = arith.constant 0 : i32
    %c0_i32_0 = arith.constant 0 : i32
    %c0_i32_1 = arith.constant 0 : i32
    return %c0_i32, %c0_i32_0 : i32, i32
  }
  func.func @transform_15(%arg0: i32) -> (i32, i32) {
    %c0_i32 = arith.constant 0 : i32
    %c0_i32_0 = arith.constant 0 : i32
    return %arg0, %c0_i32 : i32, i32
  }
}

</mosaic_0001>

<bundles_post_ra>
// kernel: diffusion_forward.1
= control target key start
LH: loop header
LB: loop body
LE: loop exit
PB: predicated region body
PF: predicated region fallthrough
CT: control target
= control target key end

     0   :  { %s6869_s0 = inlined_call_operand.vmem [shape: f32[16,128], index: 0, kind: input, shape index: {}]   ;;  %s6870_s1 = inlined_call_operand.hbm [shape: bf16[128,512], index: 1, kind: input, shape index: {}]   ;;  %s6871_s2 = inlined_call_operand.vmem [shape: f32[1,512], index: 2, kind: input, shape index: {}]   ;;  %s6872_s3 = inlined_call_operand.hbm [shape: bf16[512,512], index: 3, kind: input, shape index: {}]   ;;  %s6873_s4 = inlined_call_operand.vmem [shape: f32[1,512], index: 4, kind: input, shape index: {}]   ;;  %s6874_s5 = inlined_call_operand.hbm [shape: bf16[512,384], index: 5, kind: input, shape index: {}]   ;;  %s6875_s6 = inlined_call_operand.vmem [shape: f32[1,384], index: 6, kind: input, shape index: {}]   ;;  %s6876_s7 = inlined_call_operand.hbm [shape: bf16[384,384], index: 7, kind: input, shape index: {}]   ;;  %s6877_s8 = inlined_call_operand.vmem [shape: f32[1,384], index: 8, kind: input, shape index: {}]   ;;  %s6878_s9 = inlined_call_operand.hbm [shape: bf16[384,384], index: 9, kind: input, shape index: {}]   ;;  %s6879_s10 = inlined_call_operand.vmem [shape: f32[1,384], index: 10, kind: input, shape index: {}]   ;;  %s6880_s11 = inlined_call_operand.hbm [shape: bf16[384,384], index: 11, kind: input, shape index: {}]   ;;  %s6881_s12 = inlined_call_operand.vmem [shape: f32[1,384], index: 12, kind: input, shape index: {}]   ;;  %s6882_s13 = inlined_call_operand.hbm [shape: bf16[384,128], index: 13, kind: input, shape index: {}]   ;;  %s6883_s14 = inlined_call_operand.vmem [shape: f32[1,128], index: 14, kind: input, shape index: {}]   ;;  %s6884_s15 = inlined_call_operand.vmem [shape: bf16[16,128], index: 15, kind: output, shape index: {}]  }
   0x1   :  { %6885 = sst [smem:[#allocation17_spill]] %s6884_s15 }
   0x2   :  { %20 = vsyncpa [#allocation3], 0 }
   0x3   :  { %21 = vsyncpa [#allocation5], 0 }
   0x4   :  { %22 = vsyncpa [#allocation8], 0 }
   0x5   :  { %23 = vsyncpa [#allocation11], 0  ;;  %s6516_s18 = smov [#allocation4]   ;;  %s6354_s22 = scalar_lea.hbm %s6872_s3, 16384 }
   0x6   :  { %s45_s19 = sshll.u32 %s6516_s18, 4  ;;  %p6355_p0 = scmp.ne.s32.totalorder %s6872_s3, %s6354_s22  ;;  %s46_s19 = int_to_ptr.vmem [resolvable:$true] %s45_s19 }
   0x7   :  { %p6358_p1 = scmp.lt.u32.totalorder %s6354_s22, %s6872_s3 }
   0x9   :  { %p6360_p2 = pnand %p6358_p1, %p6355_p0 }
   0xb   :  { %6363 = shalt.err (!%p6360_p2)
}
   0xc   :  { %s6364_s27 = scalar_lea.vmem %s46_s19, 16384  ;;  %p6369_p4 = scmp.lt.s32.totalorder %s46_s19, %s46_s19 }
   0xd   :  { %p6365_p3 = scmp.ne.s32.totalorder %s46_s19, %s6364_s27  ;;  %p6370_p5 = scmp.lt.s32.totalorder %s6364_s27, %s6364_s27 }
   0xf   :  { %p6371_p6 = por %p6370_p5, %p6369_p4 }
  0x11   :  { %p6372_p7 = pnand %p6371_p6, %p6365_p3 }
  0x13   :  { %6375 = shalt.err (!%p6372_p7)
}
  0x14   :  { %s6517_s28 = smov 256   ;;  %s6518_s29 = smov 16  }
  0x15   :  { %51 = dma.hbm_to_vmem [thread:$0]  %s6872_s3, 16384, %s46_s19, [#allocation5], %s6517_s28, %s6517_s28, %s6518_s29  }
  0x16   :  { %s6519_s17 = smov [#allocation7]   ;;  %s6520_s20 = smov [#allocation10]  }
  0x17   :  { %s73_s18 = sshll.u32 %s6519_s17, 4  ;;  %s101_s21 = sshll.u32 %s6520_s20, 4  ;;  %s74_s18 = int_to_ptr.vmem [resolvable:$true] %s73_s18  ;;  %s102_s21 = int_to_ptr.vmem [resolvable:$true] %s101_s21 }
  0x18   :  { %s6376_s24 = scalar_lea.hbm %s6876_s7, 9216 }
  0x19   :  { %p6377_p8 = scmp.ne.s32.totalorder %s6876_s7, %s6376_s24  ;;  %p6380_p9 = scmp.lt.u32.totalorder %s6376_s24, %s6876_s7 }
  0x1b   :  { %p6382_p10 = pnand %p6380_p9, %p6377_p8 }
  0x1d   :  { %6385 = shalt.err (!%p6382_p10)
}
  0x1e   :  { %s6386_s3 = scalar_lea.vmem %s74_s18, 9216  ;;  %p6391_p12 = scmp.lt.s32.totalorder %s74_s18, %s74_s18 }
  0x1f   :  { %p6387_p11 = scmp.ne.s32.totalorder %s74_s18, %s6386_s3  ;;  %p6392_p13 = scmp.lt.s32.totalorder %s6386_s3, %s6386_s3 }
  0x21   :  { %p6393_p0 = por %p6392_p13, %p6391_p12 }
  0x23   :  { %p6394_p1 = pnand %p6393_p0, %p6387_p11 }
  0x25   :  { %6397 = shalt.err (!%p6394_p1)
}
  0x26   :  { %s6521_s19 = smov 192   ;;  %s6522_s30 = smov 12  }
  0x27   :  { %79 = dma.hbm_to_vmem [thread:$0]  %s6876_s7, 9216, %s74_s18, [#allocation8], %s6521_s19, %s6521_s19, %s6522_s30  }
  0x28   :  { %s6398_s22 = scalar_lea.hbm %s6880_s11, 9216 }
  0x29   :  { %p6399_p2 = scmp.ne.s32.totalorder %s6880_s11, %s6398_s22  ;;  %p6402_p3 = scmp.lt.u32.totalorder %s6398_s22, %s6880_s11 }
  0x2b   :  { %p6404_p4 = pnand %p6402_p3, %p6399_p2 }
  0x2d   :  { %6407 = shalt.err (!%p6404_p4)
}
  0x2e   :  { %s6408_s27 = scalar_lea.vmem %s102_s21, 9216  ;;  %p6413_p6 = scmp.lt.s32.totalorder %s102_s21, %s102_s21 }
  0x2f   :  { %p6409_p5 = scmp.ne.s32.totalorder %s102_s21, %s6408_s27  ;;  %p6414_p7 = scmp.lt.s32.totalorder %s6408_s27, %s6408_s27 }
  0x31   :  { %p6415_p8 = por %p6414_p7, %p6413_p6 }
  0x33   :  { %p6416_p9 = pnand %p6415_p8, %p6409_p5 }
  0x35   :  { %6419 = shalt.err (!%p6416_p9)
}
  0x36   :  { %107 = dma.hbm_to_vmem [thread:$0]  %s6880_s11, 9216, %s102_s21, [#allocation11], %s6521_s19, %s6521_s19, %s6522_s30  }
  0x37   :  { %s6523_s3 = smov [#allocation2]   ;;  %s6524_s17 = smov [#allocation6]  }
  0x38   :  { %s31_s16 = sshll.u32 %s6523_s3, 4  ;;  %s59_s15 = sshll.u32 %s6524_s17, 4  ;;  %s32_s16 = int_to_ptr.vmem [resolvable:$true] %s31_s16  ;;  %s60_s15 = int_to_ptr.vmem [resolvable:$true] %s59_s15 }
  0x39   :  { %s6420_s23 = scalar_lea.hbm %s6870_s1, 4096 }
  0x3a   :  { %p6421_p10 = scmp.ne.s32.totalorder %s6870_s1, %s6420_s23  ;;  %p6424_p11 = scmp.lt.u32.totalorder %s6420_s23, %s6870_s1 }
  0x3c   :  { %p6426_p12 = pnand %p6424_p11, %p6421_p10 }
  0x3e   :  { %6429 = shalt.err (!%p6426_p12)
}
  0x3f   :  { %s6430_s11 = scalar_lea.vmem %s32_s16, 4096  ;;  %p6435_p0 = scmp.lt.s32.totalorder %s32_s16, %s32_s16 }
  0x40   :  { %p6431_p13 = scmp.ne.s32.totalorder %s32_s16, %s6430_s11  ;;  %p6436_p1 = scmp.lt.s32.totalorder %s6430_s11, %s6430_s11 }
  0x42   :  { %p6437_p2 = por %p6436_p1, %p6435_p0 }
  0x44   :  { %p6438_p3 = pnand %p6437_p2, %p6431_p13 }
  0x46   :  { %6441 = shalt.err (!%p6438_p3)
}
  0x47   :  { %37 = dma.hbm_to_vmem [thread:$0]  %s6870_s1, 4096, %s32_s16, [#allocation3], %s6517_s28, %s6517_s28, %s6518_s29  }
  0x48   :  { %s6442_s17 = scalar_lea.hbm %s6874_s5, 12288 }
  0x49   :  { %p6443_p4 = scmp.ne.s32.totalorder %s6874_s5, %s6442_s17  ;;  %p6446_p5 = scmp.lt.u32.totalorder %s6442_s17, %s6874_s5 }
  0x4b   :  { %p6448_p6 = pnand %p6446_p5, %p6443_p4 }
  0x4d   :  { %6451 = shalt.err (!%p6448_p6)
}
  0x4e   :  { %s6452_s25 = scalar_lea.vmem %s60_s15, 12288  ;;  %p6457_p8 = scmp.lt.s32.totalorder %s60_s15, %s60_s15 }
  0x4f   :  { %p6453_p7 = scmp.ne.s32.totalorder %s60_s15, %s6452_s25  ;;  %p6458_p9 = scmp.lt.s32.totalorder %s6452_s25, %s6452_s25 }
  0x51   :  { %p6459_p10 = por %p6458_p9, %p6457_p8 }
  0x53   :  { %p6460_p11 = pnand %p6459_p10, %p6453_p7 }
  0x55   :  { %6463 = shalt.err (!%p6460_p11)
}
  0x56   :  { %65 = dma.hbm_to_vmem [thread:$0]  %s6874_s5, 12288, %s60_s15, [#allocation5], %s6521_s19, %s6521_s19, %s6522_s30  }
  0x57   :  { %s6525_s29 = smov [#allocation9]   ;;  %s6526_s26 = smov [#allocation12]  }
  0x58   :  { %s87_s16 = sshll.u32 %s6525_s29, 4  ;;  %s115_s27 = sshll.u32 %s6526_s26, 4  ;;  %s88_s16 = int_to_ptr.vmem [resolvable:$true] %s87_s16  ;;  %s116_s27 = int_to_ptr.vmem [resolvable:$true] %s115_s27 }
  0x59   :  { %s6464_s7 = scalar_lea.hbm %s6878_s9, 9216 }
  0x5a   :  { %p6465_p12 = scmp.ne.s32.totalorder %s6878_s9, %s6464_s7  ;;  %p6468_p13 = scmp.lt.u32.totalorder %s6464_s7, %s6878_s9 }
  0x5c   :  { %p6470_p0 = pnand %p6468_p13, %p6465_p12 }
  0x5e   :  { %6473 = shalt.err (!%p6470_p0)
}
  0x5f   :  { %s6474_s5 = scalar_lea.vmem %s88_s16, 9216  ;;  %p6479_p2 = scmp.lt.s32.totalorder %s88_s16, %s88_s16 }
  0x60   :  { %p6475_p1 = scmp.ne.s32.totalorder %s88_s16, %s6474_s5  ;;  %p6480_p3 = scmp.lt.s32.totalorder %s6474_s5, %s6474_s5 }
  0x62   :  { %p6481_p4 = por %p6480_p3, %p6479_p2 }
  0x64   :  { %p6482_p5 = pnand %p6481_p4, %p6475_p1 }
  0x66   :  { %6485 = shalt.err (!%p6482_p5)
}
  0x67   :  { %93 = dma.hbm_to_vmem [thread:$0]  %s6878_s9, 9216, %s88_s16, [#allocation8], %s6521_s19, %s6521_s19, %s6522_s30  }
  0x68   :  { %s6486_s25 = scalar_lea.hbm %s6882_s13, 3072 }
  0x69   :  { %p6487_p6 = scmp.ne.s32.totalorder %s6882_s13, %s6486_s25  ;;  %p6490_p7 = scmp.lt.u32.totalorder %s6486_s25, %s6882_s13 }
  0x6b   :  { %p6492_p8 = pnand %p6490_p7, %p6487_p6 }
  0x6d   :  { %6495 = shalt.err (!%p6492_p8)
}
  0x6e   :  { %s6496_s11 = scalar_lea.vmem %s116_s27, 3072  ;;  %p6501_p10 = scmp.lt.s32.totalorder %s116_s27, %s116_s27 }
  0x6f   :  { %p6497_p9 = scmp.ne.s32.totalorder %s116_s27, %s6496_s11  ;;  %p6502_p11 = scmp.lt.s32.totalorder %s6496_s11, %s6496_s11 }
  0x71   :  { %p6503_p12 = por %p6502_p11, %p6501_p10 }
  0x73   :  { %p6504_p13 = pnand %p6503_p12, %p6497_p9 }
  0x75   :  { %6507 = shalt.err (!%p6504_p13)
}
  0x76   :  { %s6527_s9 = smov 64   ;;  %s6528_s19 = smov 4  }
  0x77   :  { %121 = dma.hbm_to_vmem [thread:$0]  %s6882_s13, 3072, %s116_s27, [#allocation11], %s6527_s9, %s6527_s9, %s6528_s19  }
  0x78   :  { %6508 = dma.done.wait [#allocation3], 4096  }
  0x79   :  { %6509 = vsyncadd [#allocation3], 4294963200 }
  0x7a   :  { %6510 = dma.done.wait [#allocation5], 28672  }
  0x7b   :  { %6511 = vsyncadd [#allocation5], 4294938624 }
  0x7c   :  { %6512 = dma.done.wait [#allocation8], 18432  }
  0x7d   :  { %6513 = vsyncadd [#allocation8], 4294948864 }
  0x7e   :  { %6514 = dma.done.wait [#allocation11], 12288  }
  0x7f   :  { %6515 = vsyncadd [#allocation11], 4294955008  ;;  %v6529_v0 = vmov 0   ;;  %v5594_v1 = vld [vmem:[#allocation2 + $0x4] ss:$16 sps:$4 sm:$0xff]   ;;  %v147_v27 = vld [vmem:[%s6869_s0 + $0x8] sm:$0xff] }
  0x80   :  { %395 = vmatprep.mubr.bf16.mxu0 %v6529_v0  ;;  %438 = vmatprep.mubr.bf16.mxu1 %v6529_v0  ;;  %v5596_v2 = vld [vmem:[#allocation2] ss:$16 sps:$4 sm:$0xff]   ;;  %v5597_v3 = vld [vmem:[#allocation2 + $0x24] ss:$16 sps:$4 sm:$0xff]   ;;  %v5618_v10 = vld [vmem:[#allocation2 + $0xc] ss:$16 sps:$4 sm:$0xff]  }
  0x81   :  { %363 = vmatprep.subr.bf16.mxu0 %v5594_v1  ;;  %v5599_v4 = vld [vmem:[#allocation2 + $0x20] ss:$16 sps:$4 sm:$0xff]   ;;  %v5600_v5 = vld [vmem:[#allocation2 + $0x44] ss:$16 sps:$4 sm:$0xff]   ;;  %v5620_v11 = vld [vmem:[#allocation2 + $0x8] ss:$16 sps:$4 sm:$0xff]   ;;  %406 = vmatprep.subr.bf16.mxu1 %v5618_v10 }
  0x82   :  { %364 = vmatpush1.bf16.msra.mxu0 %v5596_v2  ;;  %v5602_v6 = vld [vmem:[#allocation2 + $0x40] ss:$16 sps:$4 sm:$0xff]   ;;  %v5603_v7 = vld [vmem:[#allocation2 + $0x64] ss:$16 sps:$4 sm:$0xff]   ;;  %v5621_v12 = vld [vmem:[#allocation2 + $0x2c] ss:$16 sps:$4 sm:$0xff]   ;;  %407 = vmatpush1.bf16.msra.mxu1 %v5620_v11 }
  0x83   :  { %365 = vmatprep.subr.bf16.mxu0 %v5597_v3  ;;  %v5605_v8 = vld [vmem:[#allocation2 + $0x60] ss:$16 sps:$4 sm:$0xff]   ;;  %v5606_v9 = vld [vmem:[#allocation2 + $0x84] ss:$16 sps:$4 sm:$0xff]   ;;  %v5623_v14 = vld [vmem:[#allocation2 + $0x28] ss:$16 sps:$4 sm:$0xff]   ;;  %408 = vmatprep.subr.bf16.mxu1 %v5621_v12 }
  0x84   :  { %v5608_v13 = vld [vmem:[#allocation2 + $0x80] ss:$16 sps:$4 sm:$0xff]   ;;  %v5609_v15 = vld [vmem:[#allocation2 + $0xa4] ss:$16 sps:$4 sm:$0xff]   ;;  %v5624_v16 = vld [vmem:[#allocation2 + $0x4c] ss:$16 sps:$4 sm:$0xff]  }
  0x85   :  { %v5611_v17 = vld [vmem:[#allocation2 + $0xa0] ss:$16 sps:$4 sm:$0xff]   ;;  %v5626_v18 = vld [vmem:[#allocation2 + $0x48] ss:$16 sps:$4 sm:$0xff]   ;;  %v5612_v19 = vld [vmem:[#allocation2 + $0xc4] ss:$16 sps:$4 sm:$0xff]  }
  0x86   :  { %366 = vmatpush1.bf16.msra.mxu0 %v5599_v4  ;;  %409 = vmatpush1.bf16.msra.mxu1 %v5623_v14  ;;  %v5627_v20 = vld [vmem:[#allocation2 + $0x6c] ss:$16 sps:$4 sm:$0xff]   ;;  %v5614_v21 = vld [vmem:[#allocation2 + $0xc0] ss:$16 sps:$4 sm:$0xff]   ;;  %v5629_v22 = vld [vmem:[#allocation2 + $0x68] ss:$16 sps:$4 sm:$0xff]  }
  0x87   :  { %367 = vmatprep.subr.bf16.mxu0 %v5600_v5  ;;  %410 = vmatprep.subr.bf16.mxu1 %v5624_v16  ;;  %v5615_v23 = vld [vmem:[#allocation2 + $0xe4] ss:$16 sps:$4 sm:$0xff]   ;;  %v5630_v24 = vld [vmem:[#allocation2 + $0x8c] ss:$16 sps:$4 sm:$0xff]   ;;  %v5617_v25 = vld [vmem:[#allocation2 + $0xe0] ss:$16 sps:$4 sm:$0xff]  }
  0x88   :  { %v146_v26 = vld [vmem:[%s6869_s0] sm:$0xff]  ;;  %v5632_v28 = vld [vmem:[#allocation2 + $0x88] ss:$16 sps:$4 sm:$0xff]   ;;  %v5633_v29 = vld [vmem:[#allocation2 + $0xac] ss:$16 sps:$4 sm:$0xff]   ;;  %vm6531_vm14 = vmmov 0  }
  0x89   :  { %v5644_v30 = vld [vmem:[#allocation4 + $0x4] ss:$16 sps:$4 sm:$0xff]   ;;  %v148_v31 = vpack.c.bf16 %v147_v27, %v146_v26  ;;  %v5635_v32 = vld [vmem:[#allocation2 + $0xa8] ss:$16 sps:$4 sm:$0xff]   ;;  %v5642_v33 = vld [vmem:[#allocation4] ss:$16 sps:$4 sm:$0xff]  }
  0x8a   :  { %368 = vmatpush1.bf16.msra.mxu0 %v5602_v6  ;;  %411 = vmatpush1.bf16.msra.mxu1 %v5626_v18  ;;  %v5636_v34 = vld [vmem:[#allocation2 + $0xcc] ss:$16 sps:$4 sm:$0xff]   ;;  %v5650_v35 = vld [vmem:[#allocation4 + $0x24] ss:$16 sps:$4 sm:$0xff]   ;;  %v5638_v36 = vld [vmem:[#allocation2 + $0xc8] ss:$16 sps:$4 sm:$0xff]  }
  0x8b   :  { %369 = vmatprep.subr.bf16.mxu0 %v5603_v7  ;;  %412 = vmatprep.subr.bf16.mxu1 %v5627_v20  ;;  %v5648_v37 = vld [vmem:[#allocation4 + $0x20] ss:$16 sps:$4 sm:$0xff]   ;;  %v5639_v38 = vld [vmem:[#allocation2 + $0xec] ss:$16 sps:$4 sm:$0xff]   ;;  %v5656_v39 = vld [vmem:[#allocation4 + $0x44] ss:$16 sps:$4 sm:$0xff]  }
  0x8c   :  { %v5641_v40 = vld [vmem:[#allocation2 + $0xe8] ss:$16 sps:$4 sm:$0xff]   ;;  %v5654_v41 = vld [vmem:[#allocation4 + $0x40] ss:$16 sps:$4 sm:$0xff]   ;;  %v5647_v42 = vld [vmem:[#allocation4 + $0xc] ss:$16 sps:$4 sm:$0xff]  }
  0x8d   :  { %v5662_v43 = vld [vmem:[#allocation4 + $0x64] ss:$16 sps:$4 sm:$0xff]   ;;  %v5645_v44 = vld [vmem:[#allocation4 + $0x8] ss:$16 sps:$4 sm:$0xff]   ;;  %v5660_v45 = vld [vmem:[#allocation4 + $0x60] ss:$16 sps:$4 sm:$0xff]  }
  0x8e   :  { %370 = vmatpush1.bf16.msra.mxu0 %v5605_v8  ;;  %413 = vmatpush1.bf16.msra.mxu1 %v5629_v22  ;;  %v5653_v46 = vld [vmem:[#allocation4 + $0x2c] ss:$16 sps:$4 sm:$0xff]   ;;  %v5668_v47 = vld [vmem:[#allocation4 + $0x84] ss:$16 sps:$4 sm:$0xff]   ;;  %v5651_v48 = vld [vmem:[#allocation4 + $0x28] ss:$16 sps:$4 sm:$0xff]  }
  0x8f   :  { %371 = vmatprep.subr.bf16.mxu0 %v5606_v9  ;;  %414 = vmatprep.subr.bf16.mxu1 %v5630_v24  ;;  %v5666_v49 = vld [vmem:[#allocation4 + $0x80] ss:$16 sps:$4 sm:$0xff]   ;;  %v5659_v50 = vld [vmem:[#allocation4 + $0x4c] ss:$16 sps:$4 sm:$0xff]   ;;  %v5674_v51 = vld [vmem:[#allocation4 + $0xa4] ss:$16 sps:$4 sm:$0xff]  }
  0x90   :  { %v5657_v52 = vld [vmem:[#allocation4 + $0x48] ss:$16 sps:$4 sm:$0xff]   ;;  %v5672_v53 = vld [vmem:[#allocation4 + $0xa0] ss:$16 sps:$4 sm:$0xff]   ;;  %v5665_v54 = vld [vmem:[#allocation4 + $0x6c] ss:$16 sps:$4 sm:$0xff]  }
  0x91   :  { %v5680_v55 = vld [vmem:[#allocation4 + $0xc4] ss:$16 sps:$4 sm:$0xff]   ;;  %v5663_v56 = vld [vmem:[#allocation4 + $0x68] ss:$16 sps:$4 sm:$0xff]   ;;  %v5678_v57 = vld [vmem:[#allocation4 + $0xc0] ss:$16 sps:$4 sm:$0xff]  }
  0x92   :  { %372 = vmatpush1.bf16.msra.mxu0 %v5608_v13  ;;  %415 = vmatpush1.bf16.msra.mxu1 %v5632_v28  ;;  %v5671_v58 = vld [vmem:[#allocation4 + $0x8c] ss:$16 sps:$4 sm:$0xff]   ;;  %v5686_v59 = vld [vmem:[#allocation4 + $0xe4] ss:$16 sps:$4 sm:$0xff]   ;;  %v5669_v60 = vld [vmem:[#allocation4 + $0x88] ss:$16 sps:$4 sm:$0xff]  }
  0x93   :  { %373 = vmatprep.subr.bf16.mxu0 %v5609_v15  ;;  %416 = vmatprep.subr.bf16.mxu1 %v5633_v29  ;;  %v5684_v61 = vld [vmem:[#allocation4 + $0xe0] ss:$16 sps:$4 sm:$0xff]   ;;  %v5677_v62 = vld [vmem:[#allocation4 + $0xac] ss:$16 sps:$4 sm:$0xff]   ;;  %v5692_v63 = vld [vmem:[#allocation4 + $0x104] ss:$16 sps:$4 sm:$0xff]  }
  0x94   :  { %v5675_v1 = vld [vmem:[#allocation4 + $0xa8] ss:$16 sps:$4 sm:$0xff]   ;;  %v5690_v2 = vld [vmem:[#allocation4 + $0x100] ss:$16 sps:$4 sm:$0xff]   ;;  %v5683_v3 = vld [vmem:[#allocation4 + $0xcc] ss:$16 sps:$4 sm:$0xff]  }
  0x95   :  { %v5698_v4 = vld [vmem:[#allocation4 + $0x124] ss:$16 sps:$4 sm:$0xff]   ;;  %v5681_v5 = vld [vmem:[#allocation4 + $0xc8] ss:$16 sps:$4 sm:$0xff]   ;;  %v5696_v6 = vld [vmem:[#allocation4 + $0x120] ss:$16 sps:$4 sm:$0xff]  }
  0x96   :  { %374 = vmatpush1.bf16.msra.mxu0 %v5611_v17  ;;  %417 = vmatpush1.bf16.msra.mxu1 %v5635_v32  ;;  %v5689_v7 = vld [vmem:[#allocation4 + $0xec] ss:$16 sps:$4 sm:$0xff]   ;;  %v5687_v8 = vld [vmem:[#allocation4 + $0xe8] ss:$16 sps:$4 sm:$0xff]   ;;  %v5704_v13 = vld [vmem:[#allocation4 + $0x144] ss:$16 sps:$4 sm:$0xff]  }
  0x97   :  { %375 = vmatprep.subr.bf16.mxu0 %v5612_v19  ;;  %418 = vmatprep.subr.bf16.mxu1 %v5636_v34  ;;  %v5695_v9 = vld [vmem:[#allocation4 + $0x10c] ss:$16 sps:$4 sm:$0xff]   ;;  %v5693_v10 = vld [vmem:[#allocation4 + $0x108] ss:$16 sps:$4 sm:$0xff]   ;;  %v5702_v15 = vld [vmem:[#allocation4 + $0x140] ss:$16 sps:$4 sm:$0xff]  }
  0x98   :  { %v5701_v11 = vld [vmem:[#allocation4 + $0x12c] ss:$16 sps:$4 sm:$0xff]   ;;  %v5699_v12 = vld [vmem:[#allocation4 + $0x128] ss:$16 sps:$4 sm:$0xff]   ;;  %v5710_v17 = vld [vmem:[#allocation4 + $0x164] ss:$16 sps:$4 sm:$0xff]  }
  0x99   :  { %v5707_v14 = vld [vmem:[#allocation4 + $0x14c] ss:$16 sps:$4 sm:$0xff]   ;;  %v5705_v16 = vld [vmem:[#allocation4 + $0x148] ss:$16 sps:$4 sm:$0xff]   ;;  %v5708_v19 = vld [vmem:[#allocation4 + $0x160] ss:$16 sps:$4 sm:$0xff]  }
  0x9a   :  { %376 = vmatpush1.bf16.msra.mxu0 %v5614_v21  ;;  %419 = vmatpush1.bf16.msra.mxu1 %v5638_v36  ;;  %v5713_v18 = vld [vmem:[#allocation4 + $0x16c] ss:$16 sps:$4 sm:$0xff]   ;;  %v5711_v20 = vld [vmem:[#allocation4 + $0x168] ss:$16 sps:$4 sm:$0xff]   ;;  %v5716_v21 = vld [vmem:[#allocation4 + $0x184] ss:$16 sps:$4 sm:$0xff]  }
  0x9b   :  { %377 = vmatprep.subr.bf16.mxu0 %v5615_v23  ;;  %420 = vmatprep.subr.bf16.mxu1 %v5639_v38  ;;  %v5719_v22 = vld [vmem:[#allocation4 + $0x18c] ss:$16 sps:$4 sm:$0xff]   ;;  %v5714_v23 = vld [vmem:[#allocation4 + $0x180] ss:$16 sps:$4 sm:$0xff]   ;;  %v5717_v24 = vld [vmem:[#allocation4 + $0x188] ss:$16 sps:$4 sm:$0xff]  }
  0x9c   :  { %v5725_v26 = vld [vmem:[#allocation4 + $0x1ac] ss:$16 sps:$4 sm:$0xff]   ;;  %v5720_v27 = vld [vmem:[#allocation4 + $0x1a0] ss:$16 sps:$4 sm:$0xff]   ;;  %v5723_v28 = vld [vmem:[#allocation4 + $0x1a8] ss:$16 sps:$4 sm:$0xff]  }
  0x9d   :  { %v5728_v29 = vld [vmem:[#allocation4 + $0x1c4] ss:$16 sps:$4 sm:$0xff]   ;;  %v5729_v32 = vld [vmem:[#allocation4 + $0x1c8] ss:$16 sps:$4 sm:$0xff]   ;;  %v5737_v34 = vld [vmem:[#allocation4 + $0x1ec] ss:$16 sps:$4 sm:$0xff]  }
  0x9e   :  { %378 = vmatpush1.bf16.msra.mxu0 %v5617_v25  ;;  %421 = vmatpush1.bf16.msra.mxu1 %v5641_v40  ;;  %v5722_v25 = vld [vmem:[#allocation4 + $0x1a4] ss:$16 sps:$4 sm:$0xff]   ;;  %v5735_v36 = vld [vmem:[#allocation4 + $0x1e8] ss:$16 sps:$4 sm:$0xff]   ;;  %v5743_v38 = vld [vmem:[#allocation4 + $0x20c] ss:$16 sps:$4 sm:$0xff]  }
  0x9f   :  { %1283 = vmatprep.subr.bf16.mxu0 %v5644_v30  ;;  %1369 = vmatprep.subr.bf16.mxu1 %v5647_v42  ;;  %v5731_v30 = vld [vmem:[#allocation4 + $0x1cc] ss:$16 sps:$4 sm:$0xff]   ;;  %v181_v42 = vld [vmem:[%s6871_s2] sm:$0xf]  ;;  %s6886_s25 = sld [smem:[#allocation17_spill]] }
  0xa1   :  { %396 = vmatmul.mubr.bf16.vlgmr.msra.gmra.mrb[0].mxu0 %v148_v31  ;;  %439 = vmatmul.mubr.bf16.vlgmr.msra.gmra.mrb[0].mxu1 %v148_v31  ;;  %v5726_v31 = vld [vmem:[#allocation4 + $0x1c0] ss:$16 sps:$4 sm:$0xff]  }
  0xa2   :  { %1284 = vmatpush1.bf16.msra.mxu0 %v5642_v33  ;;  %1370 = vmatpush1.bf16.msra.mxu1 %v5645_v44  ;;  %v5734_v33 = vld [vmem:[#allocation4 + $0x1e4] ss:$16 sps:$4 sm:$0xff]  }
  0xa3   :  { %1285 = vmatprep.subr.bf16.mxu0 %v5650_v35  ;;  %1371 = vmatprep.subr.bf16.mxu1 %v5653_v46  ;;  %v5732_v35 = vld [vmem:[#allocation4 + $0x1e0] ss:$16 sps:$4 sm:$0xff]  }
  0xa6   :  { %1286 = vmatpush1.bf16.msra.mxu0 %v5648_v37  ;;  %1372 = vmatpush1.bf16.msra.mxu1 %v5651_v48  ;;  %v5740_v37 = vld [vmem:[#allocation4 + $0x204] ss:$16 sps:$4 sm:$0xff]  }
  0xa7   :  { %1287 = vmatprep.subr.bf16.mxu0 %v5656_v39  ;;  %1373 = vmatprep.subr.bf16.mxu1 %v5659_v50  ;;  %v183_v39 = vlaneseq }
  0xa9   :  { %v6722_v40 = vshrl.u32 %v183_v39, 7  ;;  %v5758_v39 = vld [vmem:[#allocation4 + $0x264] ss:$16 sps:$4 sm:$0xff]  }
  0xaa   :  { %1288 = vmatpush1.bf16.msra.mxu0 %v5654_v41  ;;  %1374 = vmatpush1.bf16.msra.mxu1 %v5657_v52 }
  0xab   :  { %1289 = vmatprep.subr.bf16.mxu0 %v5662_v43  ;;  %1375 = vmatprep.subr.bf16.mxu1 %v5665_v54  ;;  %v6725_v41 = vsub.s32 0, %v6722_v40  ;;  %v6731_v43 = vsub.s32 1, %v6722_v40 }
  0xad   :  { %v186_v44 = vrot.slane %v181_v42, %v6725_v41 }
  0xae   :  { %1290 = vmatpush1.bf16.msra.mxu0 %v5660_v45  ;;  %1376 = vmatpush1.bf16.msra.mxu1 %v5663_v56  ;;  %v190_v45 = vrot.slane %v181_v42, %v6731_v43 }
  0xaf   :  { %1291 = vmatprep.subr.bf16.mxu0 %v5668_v47  ;;  %1377 = vmatprep.subr.bf16.mxu1 %v5671_v58 }
  0xb2   :  { %1292 = vmatpush1.bf16.msra.mxu0 %v5666_v49  ;;  %1378 = vmatpush1.bf16.msra.mxu1 %v5669_v60 }
  0xb3   :  { %1293 = vmatprep.subr.bf16.mxu0 %v5674_v51  ;;  %1379 = vmatprep.subr.bf16.mxu1 %v5677_v62 }
  0xb6   :  { %1294 = vmatpush1.bf16.msra.mxu0 %v5672_v53  ;;  %1380 = vmatpush1.bf16.msra.mxu1 %v5675_v1 }
  0xb7   :  { %1295 = vmatprep.subr.bf16.mxu0 %v5680_v55  ;;  %1381 = vmatprep.subr.bf16.mxu1 %v5683_v3 }
  0xba   :  { %1296 = vmatpush1.bf16.msra.mxu0 %v5678_v57  ;;  %1382 = vmatpush1.bf16.msra.mxu1 %v5681_v5  ;;  %v6736_v57 = vsub.s32 2, %v6722_v40 }
  0xbb   :  { %1297 = vmatprep.subr.bf16.mxu0 %v5686_v59  ;;  %1383 = vmatprep.subr.bf16.mxu1 %v5689_v7  ;;  %v197_v59 = vsub.s32 3, %v6722_v40 }
  0xbc   :  { %v194_v60 = vrot.slane %v181_v42, %v6736_v57 }
  0xbe   :  { %1298 = vmatpush1.bf16.msra.mxu0 %v5684_v61  ;;  %1384 = vmatpush1.bf16.msra.mxu1 %v5687_v8  ;;  %v198_v61 = vrot.slane %v181_v42, %v197_v59  ;;  %v5761_v42 = vld [vmem:[#allocation4 + $0x26c] ss:$16 sps:$4 sm:$0xff]  }
  0xbf   :  { %1299 = vmatprep.subr.bf16.mxu0 %v5692_v63  ;;  %1385 = vmatprep.subr.bf16.mxu1 %v5695_v9 }
  0xc2   :  { %1300 = vmatpush1.bf16.msra.mxu0 %v5690_v2  ;;  %1386 = vmatpush1.bf16.msra.mxu1 %v5693_v10 }
  0xc3   :  { %1301 = vmatprep.subr.bf16.mxu0 %v5698_v4  ;;  %1387 = vmatprep.subr.bf16.mxu1 %v5701_v11 }
  0xc6   :  { %1302 = vmatpush1.bf16.msra.mxu0 %v5696_v6  ;;  %1388 = vmatpush1.bf16.msra.mxu1 %v5699_v12 }
  0xc7   :  { %1303 = vmatprep.subr.bf16.mxu0 %v5704_v13  ;;  %1389 = vmatprep.subr.bf16.mxu1 %v5707_v14 }
  0xca   :  { %1304 = vmatpush1.bf16.msra.mxu0 %v5702_v15  ;;  %1390 = vmatpush1.bf16.msra.mxu1 %v5705_v16 }
  0xcb   :  { %1305 = vmatprep.subr.bf16.mxu0 %v5710_v17  ;;  %1391 = vmatprep.subr.bf16.mxu1 %v5713_v18 }
  0xce   :  { %1306 = vmatpush1.bf16.msra.mxu0 %v5708_v19  ;;  %1392 = vmatpush1.bf16.msra.mxu1 %v5711_v20 }
  0xcf   :  { %1307 = vmatprep.subr.bf16.mxu0 %v5716_v21  ;;  %1393 = vmatprep.subr.bf16.mxu1 %v5719_v22  ;;  %v5738_v21 = vld [vmem:[#allocation4 + $0x200] ss:$16 sps:$4 sm:$0xff]   ;;  %v5741_v22 = vld [vmem:[#allocation4 + $0x208] ss:$16 sps:$4 sm:$0xff]  }
  0xd2   :  { %1308 = vmatpush1.bf16.msra.mxu0 %v5714_v23  ;;  %1394 = vmatpush1.bf16.msra.mxu1 %v5717_v24 }
  0xd3   :  { %1309 = vmatprep.subr.bf16.mxu0 %v5722_v25  ;;  %1395 = vmatprep.subr.bf16.mxu1 %v5725_v26  ;;  %v5746_v26 = vld [vmem:[#allocation4 + $0x224] ss:$16 sps:$4 sm:$0xff]  }
  0xd6   :  { %1310 = vmatpush1.bf16.msra.mxu0 %v5720_v27  ;;  %1396 = vmatpush1.bf16.msra.mxu1 %v5723_v28  ;;  %v5749_v27 = vld [vmem:[#allocation4 + $0x22c] ss:$16 sps:$4 sm:$0xff]  }
  0xd7   :  { %1311 = vmatprep.subr.bf16.mxu0 %v5728_v29  ;;  %1397 = vmatprep.subr.bf16.mxu1 %v5731_v30  ;;  %v5744_v29 = vld [vmem:[#allocation4 + $0x220] ss:$16 sps:$4 sm:$0xff]   ;;  %v5747_v30 = vld [vmem:[#allocation4 + $0x228] ss:$16 sps:$4 sm:$0xff]  }
  0xda   :  { %1312 = vmatpush1.bf16.msra.mxu0 %v5726_v31  ;;  %1398 = vmatpush1.bf16.msra.mxu1 %v5729_v32  ;;  %v5752_v31 = vld [vmem:[#allocation4 + $0x244] ss:$16 sps:$4 sm:$0xff]   ;;  %v5755_v32 = vld [vmem:[#allocation4 + $0x24c] ss:$16 sps:$4 sm:$0xff]  }
  0xdb   :  { %1313 = vmatprep.subr.bf16.mxu0 %v5734_v33  ;;  %1399 = vmatprep.subr.bf16.mxu1 %v5737_v34 }
  0xde   :  { %1314 = vmatpush1.bf16.msra.mxu0 %v5732_v35  ;;  %1400 = vmatpush1.bf16.msra.mxu1 %v5735_v36  ;;  %v5750_v35 = vld [vmem:[#allocation4 + $0x240] ss:$16 sps:$4 sm:$0xff]   ;;  %v5753_v36 = vld [vmem:[#allocation4 + $0x248] ss:$16 sps:$4 sm:$0xff]  }
  0xdf   :  { %1326 = vmatprep.subr.bf16.mxu0 %v5740_v37  ;;  %1412 = vmatprep.subr.bf16.mxu1 %v5743_v38 }
 0x174   :  { %v397_v46 = vpop.f32.mrb[0].mxu0  ;;  %v440_v62 = vpop.f32.mrb[0].mxu1 }
 0x175   :  { %v398_v47 = vadd.f32 %v397_v46, %v186_v44  ;;  %v399_v48 = vpop.f32.mrb[1].mxu0  ;;  %v6742_v63 = vadd.f32 %v440_v62, %v194_v60  ;;  %v442_v1 = vpop.f32.mrb[1].mxu1  ;;  %v5770_v62 = vld [vmem:[#allocation4 + $0x2a4] ss:$16 sps:$4 sm:$0xff]  }
 0x176   :  { %v400_v49 = vadd.f32 %v399_v48, %v190_v45  ;;  %v401_v50 = vpop.f32.mrb[2].mxu0  ;;  %v6744_v2 = vadd.f32 %v442_v1, %v198_v61  ;;  %v444_v3 = vpop.f32.mrb[2].mxu1  ;;  %v5768_v1 = vld [vmem:[#allocation4 + $0x2a0] ss:$16 sps:$4 sm:$0xff]  }
 0x177   :  { %v457_v51 = vmul.f32 1.442695, %v398_v47  ;;  %v402_v52 = vadd.f32 %v401_v50, %v186_v44  ;;  %v403_v53 = vpop.f32.mrb[3].mxu0  ;;  %vm449_vm0 = vcmp.gt.f32.partialorder %v398_v47, 0.0  ;;  %v461_v5 = vmul.f32 1.442695, %v6742_v63 }
 0x178   :  { %v459_v54 = vmul.f32 1.442695, %v400_v49  ;;  %v404_v55 = vadd.f32 %v403_v53, %v190_v45  ;;  %v6747_v6 = vadd.f32 %v444_v3, %v194_v60  ;;  %v446_v7 = vpop.f32.mrb[3].mxu1  ;;  %vm450_vm1 = vcmp.gt.f32.partialorder %v400_v49, 0.0  ;;  %v5759_v53 = vld [vmem:[#allocation4 + $0x268] ss:$16 sps:$4 sm:$0xff]  }
 0x179   :  { %6274 = vpow2.f32 %v457_v51  ;;  %v465_v56 = vmul.f32 1.442695, %v402_v52  ;;  %v463_v10 = vmul.f32 1.442695, %v6744_v2  ;;  %v6750_v11 = vadd.f32 %v446_v7, %v198_v61  ;;  %v5762_v60 = vld [vmem:[#allocation4 + $0x280] ss:$16 sps:$4 sm:$0xff]  }
 0x17a   :  { %6276 = vpow2.f32 %v459_v54  ;;  %v467_v58 = vmul.f32 1.442695, %v404_v55  ;;  %vm453_vm2 = vcmp.gt.f32.partialorder %v402_v52, 0.0  ;;  %v469_v14 = vmul.f32 1.442695, %v6747_v6 }
 0x17b   :  { %6278 = vpow2.f32 %v465_v56  ;;  %vm454_vm3 = vcmp.gt.f32.partialorder %v404_v55, 0.0  ;;  %vm451_vm4 = vcmp.gt.f32.partialorder %v6742_v63, 0.0  ;;  %v471_v18 = vmul.f32 1.442695, %v6750_v11  ;;  %v5767_v56 = vld [vmem:[#allocation4 + $0x28c] ss:$16 sps:$4 sm:$0xff]  }
 0x17c   :  { %6280 = vpow2.f32 %v467_v58  ;;  %vm452_vm5 = vcmp.gt.f32.partialorder %v6744_v2, 0.0  ;;  %vm455_vm6 = vcmp.gt.f32.partialorder %v6747_v6, 0.0  ;;  %vm456_vm7 = vcmp.gt.f32.partialorder %v6750_v11, 0.0  ;;  %v5765_v61 = vld [vmem:[#allocation4 + $0x288] ss:$16 sps:$4 sm:$0xff]  }
 0x17d   :  { %6282 = vpow2.f32 %v461_v5  ;;  %v5776_v3 = vld [vmem:[#allocation4 + $0x2c4] ss:$16 sps:$4 sm:$0xff]   ;;  %v5774_v5 = vld [vmem:[#allocation4 + $0x2c0] ss:$16 sps:$4 sm:$0xff]  }
 0x17e   :  { %6284 = vpow2.f32 %v463_v10  ;;  %v5782_v7 = vld [vmem:[#allocation4 + $0x2e4] ss:$16 sps:$4 sm:$0xff]   ;;  %v5783_v10 = vld [vmem:[#allocation4 + $0x2e8] ss:$16 sps:$4 sm:$0xff]  }
 0x17f   :  { %6286 = vpow2.f32 %v469_v14  ;;  %v5789_v14 = vld [vmem:[#allocation4 + $0x308] ss:$16 sps:$4 sm:$0xff]  }
 0x180   :  { %6288 = vpow2.f32 %v471_v18  ;;  %v5795_v18 = vld [vmem:[#allocation4 + $0x328] ss:$16 sps:$4 sm:$0xff]  }
 0x183   :  { %v6275_v4 = vpop.eup %6274 }
 0x184   :  { %v6277_v8 = vpop.eup %6276  ;;  %v4782_v9 = vadd.f32 -1.0, %v6275_v4  ;;  %v5779_v4 = vld [vmem:[#allocation4 + $0x2cc] ss:$16 sps:$4 sm:$0xff]  }
 0x185   :  { %v6279_v12 = vpop.eup %6278  ;;  %v4783_v13 = vadd.f32 -1.0, %v6277_v8  ;;  %v5785_v8 = vld [vmem:[#allocation4 + $0x2ec] ss:$16 sps:$4 sm:$0xff]  }
 0x186   :  { %v6281_v15 = vpop.eup %6280  ;;  %v4786_v16 = vadd.f32 -1.0, %v6279_v12  ;;  %v481_v19 = vsel %vm449_vm0, %v398_v47, %v4782_v9  ;;  %v5780_v9 = vld [vmem:[#allocation4 + $0x2e0] ss:$16 sps:$4 sm:$0xff]   ;;  %v5791_v12 = vld [vmem:[#allocation4 + $0x30c] ss:$16 sps:$4 sm:$0xff]  }
 0x187   :  { %v4787_v17 = vadd.f32 -1.0, %v6281_v15  ;;  %v482_v24 = vsel %vm450_vm1, %v400_v49, %v4783_v13  ;;  %v6283_v33 = vpop.eup %6282  ;;  %v5786_v13 = vld [vmem:[#allocation4 + $0x300] ss:$16 sps:$4 sm:$0xff]   ;;  %v5794_v15 = vld [vmem:[#allocation4 + $0x324] ss:$16 sps:$4 sm:$0xff]  }
 0x188   :  { %v485_v20 = vsel %vm453_vm2, %v402_v52, %v4786_v16  ;;  %v6285_v34 = vpop.eup %6284  ;;  %v4784_v37 = vadd.f32 -1.0, %v6283_v33  ;;  %v5756_v52 = vld [vmem:[#allocation4 + $0x260] ss:$16 sps:$4 sm:$0xff]   ;;  %v5797_v16 = vld [vmem:[#allocation4 + $0x32c] ss:$16 sps:$4 sm:$0xff]  }
 0x189   :  { %v489_v23 = vpack.c.bf16 %v485_v20, %v481_v19  ;;  %v486_v25 = vsel %vm454_vm3, %v404_v55, %v4787_v17  ;;  %v6287_v38 = vpop.eup %6286  ;;  %v4785_v44 = vadd.f32 -1.0, %v6285_v34  ;;  %v5764_v55 = vld [vmem:[#allocation4 + $0x284] ss:$16 sps:$4 sm:$0xff]   ;;  %v5792_v17 = vld [vmem:[#allocation4 + $0x320] ss:$16 sps:$4 sm:$0xff]  }
 0x18a   :  { %v490_v28 = vpack.c.bf16 %v486_v25, %v482_v24  ;;  %v483_v45 = vsel %vm451_vm4, %v6742_v63, %v4784_v37  ;;  %v4788_v46 = vadd.f32 -1.0, %v6287_v38  ;;  %v6289_v47 = vpop.eup %6288  ;;  %v5773_v63 = vld [vmem:[#allocation4 + $0x2ac] ss:$16 sps:$4 sm:$0xff]   ;;  %v5800_v19 = vld [vmem:[#allocation4 + $0x344] ss:$16 sps:$4 sm:$0xff]  }
 0x18b   :  { %v4789_v49 = vadd.f32 -1.0, %v6289_v47  ;;  %v484_v50 = vsel %vm452_vm5, %v6744_v2, %v4785_v44  ;;  %v5771_v2 = vld [vmem:[#allocation4 + $0x2a8] ss:$16 sps:$4 sm:$0xff]   ;;  %v5803_v20 = vld [vmem:[#allocation4 + $0x34c] ss:$16 sps:$4 sm:$0xff]  }
 0x18c   :  { %1315 = vmatprep.mubr.bf16.mxu0 %v490_v28  ;;  %1401 = vmatprep.mubr.bf16.mxu1 %v490_v28  ;;  %v487_v48 = vsel %vm455_vm6, %v6747_v6, %v4788_v46  ;;  %v5777_v6 = vld [vmem:[#allocation4 + $0x2c8] ss:$16 sps:$4 sm:$0xff]   ;;  %v5809_v24 = vld [vmem:[#allocation4 + $0x36c] ss:$16 sps:$4 sm:$0xff]   ;;  %v5804_v25 = vld [vmem:[#allocation4 + $0x360] ss:$16 sps:$4 sm:$0xff]  }
 0x18d   :  { %1316 = vmatmul.mubr.bf16.vlgmr.msra.gmra.mrb[4].mxu0 %v489_v23  ;;  %1402 = vmatmul.mubr.bf16.vlgmr.msra.gmra.mrb[4].mxu1 %v489_v23  ;;  %v6767_v51 = vpack.c.bf16 %v487_v48, %v483_v45  ;;  %v488_v54 = vsel %vm456_vm7, %v6750_v11, %v4789_v49  ;;  %v5788_v11 = vld [vmem:[#allocation4 + $0x304] ss:$16 sps:$4 sm:$0xff]   ;;  %v5815_v28 = vld [vmem:[#allocation4 + $0x38c] ss:$16 sps:$4 sm:$0xff]   ;;  %v5816_v33 = vld [vmem:[#allocation4 + $0x3a0] ss:$16 sps:$4 sm:$0xff]  }
 0x18e   :  { %1327 = vmatpush1.bf16.msra.mxu0 %v5738_v21  ;;  %1413 = vmatpush1.bf16.msra.mxu1 %v5741_v22  ;;  %v492_v58 = vpack.c.bf16 %v488_v54, %v484_v50  ;;  %v5798_v21 = vld [vmem:[#allocation4 + $0x340] ss:$16 sps:$4 sm:$0xff]   ;;  %v5801_v22 = vld [vmem:[#allocation4 + $0x348] ss:$16 sps:$4 sm:$0xff]   ;;  %v5806_v23 = vld [vmem:[#allocation4 + $0x364] ss:$16 sps:$4 sm:$0xff]  }
 0x18f   :  { %1328 = vmatprep.subr.bf16.mxu0 %v5746_v26  ;;  %1414 = vmatprep.subr.bf16.mxu1 %v5749_v27  ;;  %v5807_v26 = vld [vmem:[#allocation4 + $0x368] ss:$16 sps:$4 sm:$0xff]   ;;  %v5812_v27 = vld [vmem:[#allocation4 + $0x384] ss:$16 sps:$4 sm:$0xff]   ;;  %v5822_v37 = vld [vmem:[#allocation4 + $0x3c0] ss:$16 sps:$4 sm:$0xff]  }
 0x190   :  { %1358 = vmatprep.mubr.bf16.mxu0 %v492_v58  ;;  %1444 = vmatprep.mubr.bf16.mxu1 %v492_v58  ;;  %v5819_v34 = vld [vmem:[#allocation4 + $0x3a8] ss:$16 sps:$4 sm:$0xff]   ;;  %v5828_v44 = vld [vmem:[#allocation4 + $0x3e0] ss:$16 sps:$4 sm:$0xff]  }
 0x191   :  { %v5825_v38 = vld [vmem:[#allocation4 + $0x3c8] ss:$16 sps:$4 sm:$0xff]   ;;  %v5836_v46 = vld [vmem:[#allocation6 + $0x4] ss:$12 sps:$4 sm:$0xff]   ;;  %v5834_v48 = vld [vmem:[#allocation6] ss:$12 sps:$4 sm:$0xff]  }
 0x192   :  { %1329 = vmatpush1.bf16.msra.mxu0 %v5744_v29  ;;  %1415 = vmatpush1.bf16.msra.mxu1 %v5747_v30  ;;  %v5810_v29 = vld [vmem:[#allocation4 + $0x380] ss:$16 sps:$4 sm:$0xff]   ;;  %v5813_v30 = vld [vmem:[#allocation4 + $0x388] ss:$16 sps:$4 sm:$0xff]  }
 0x193   :  { %1330 = vmatprep.subr.bf16.mxu0 %v5752_v31  ;;  %1416 = vmatprep.subr.bf16.mxu1 %v5755_v32  ;;  %v5818_v31 = vld [vmem:[#allocation4 + $0x3a4] ss:$16 sps:$4 sm:$0xff]   ;;  %v5821_v32 = vld [vmem:[#allocation4 + $0x3ac] ss:$16 sps:$4 sm:$0xff]   ;;  %v5831_v45 = vld [vmem:[#allocation4 + $0x3e8] ss:$16 sps:$4 sm:$0xff]  }
 0x194   :  { %v5861_v47 = vld [vmem:[#allocation6 + $0xc8] ss:$12 sps:$4 sm:$0xff]  }
 0x195   :  { %v5862_v49 = vld [vmem:[#allocation6 + $0x8] ss:$12 sps:$4 sm:$0xff]  }
 0x196   :  { %1331 = vmatpush1.bf16.msra.mxu0 %v5750_v35  ;;  %1417 = vmatpush1.bf16.msra.mxu1 %v5753_v36  ;;  %v5824_v35 = vld [vmem:[#allocation4 + $0x3c4] ss:$16 sps:$4 sm:$0xff]   ;;  %v5827_v36 = vld [vmem:[#allocation4 + $0x3cc] ss:$16 sps:$4 sm:$0xff]  }
 0x197   :  { %1332 = vmatprep.subr.bf16.mxu0 %v5758_v39  ;;  %1418 = vmatprep.subr.bf16.mxu1 %v5761_v42  ;;  %v5830_v39 = vld [vmem:[#allocation4 + $0x3e4] ss:$16 sps:$4 sm:$0xff]   ;;  %v5833_v42 = vld [vmem:[#allocation4 + $0x3ec] ss:$16 sps:$4 sm:$0xff]  }
 0x198   :  { %v5839_v50 = vld [vmem:[#allocation6 + $0x1c] ss:$12 sps:$4 sm:$0xff]   ;;  %v5842_v54 = vld [vmem:[#allocation6 + $0x34] ss:$12 sps:$4 sm:$0xff]  }
 0x199   :  { %v5843_v58 = vld [vmem:[#allocation6 + $0x48] ss:$12 sps:$4 sm:$0xff]  }
 0x19a   :  { %1333 = vmatpush1.bf16.msra.mxu0 %v5756_v52  ;;  %1419 = vmatpush1.bf16.msra.mxu1 %v5759_v53  ;;  %v5866_v52 = vld [vmem:[#allocation6 + $0xe0] ss:$12 sps:$4 sm:$0xff]   ;;  %v5837_v53 = vld [vmem:[#allocation6 + $0x18] ss:$12 sps:$4 sm:$0xff]  }
 0x19b   :  { %1334 = vmatprep.subr.bf16.mxu0 %v5764_v55  ;;  %1420 = vmatprep.subr.bf16.mxu1 %v5767_v56  ;;  %v5840_v55 = vld [vmem:[#allocation6 + $0x30] ss:$12 sps:$4 sm:$0xff]   ;;  %v5845_v56 = vld [vmem:[#allocation6 + $0x4c] ss:$12 sps:$4 sm:$0xff]  }
 0x19e   :  { %1335 = vmatpush1.bf16.msra.mxu0 %v5762_v60  ;;  %1421 = vmatpush1.bf16.msra.mxu1 %v5765_v61  ;;  %v5848_v60 = vld [vmem:[#allocation6 + $0x64] ss:$12 sps:$4 sm:$0xff]   ;;  %v5846_v61 = vld [vmem:[#allocation6 + $0x60] ss:$12 sps:$4 sm:$0xff]  }
 0x19f   :  { %1336 = vmatprep.subr.bf16.mxu0 %v5770_v62  ;;  %1422 = vmatprep.subr.bf16.mxu1 %v5773_v63  ;;  %v5851_v62 = vld [vmem:[#allocation6 + $0x7c] ss:$12 sps:$4 sm:$0xff]   ;;  %v5854_v63 = vld [vmem:[#allocation6 + $0x94] ss:$12 sps:$4 sm:$0xff]  }
 0x1a2   :  { %1337 = vmatpush1.bf16.msra.mxu0 %v5768_v1  ;;  %1423 = vmatpush1.bf16.msra.mxu1 %v5771_v2  ;;  %v5852_v1 = vld [vmem:[#allocation6 + $0x90] ss:$12 sps:$4 sm:$0xff]   ;;  %v5857_v2 = vld [vmem:[#allocation6 + $0xac] ss:$12 sps:$4 sm:$0xff]  }
 0x1a3   :  { %1338 = vmatprep.subr.bf16.mxu0 %v5776_v3  ;;  %1424 = vmatprep.subr.bf16.mxu1 %v5779_v4  ;;  %v5855_v3 = vld [vmem:[#allocation6 + $0xa8] ss:$12 sps:$4 sm:$0xff]   ;;  %v5860_v4 = vld [vmem:[#allocation6 + $0xc4] ss:$12 sps:$4 sm:$0xff]  }
 0x1a6   :  { %1339 = vmatpush1.bf16.msra.mxu0 %v5774_v5  ;;  %1425 = vmatpush1.bf16.msra.mxu1 %v5777_v6  ;;  %v5858_v5 = vld [vmem:[#allocation6 + $0xc0] ss:$12 sps:$4 sm:$0xff]   ;;  %v5865_v6 = vld [vmem:[#allocation6 + $0xdc] ss:$12 sps:$4 sm:$0xff]  }
 0x1a7   :  { %1340 = vmatprep.subr.bf16.mxu0 %v5782_v7  ;;  %1426 = vmatprep.subr.bf16.mxu1 %v5785_v8  ;;  %v5863_v7 = vld [vmem:[#allocation6 + $0xd8] ss:$12 sps:$4 sm:$0xff]   ;;  %v5867_v8 = vld [vmem:[#allocation6 + $0x20] ss:$12 sps:$4 sm:$0xff]  }
 0x1aa   :  { %1341 = vmatpush1.bf16.msra.mxu0 %v5780_v9  ;;  %1427 = vmatpush1.bf16.msra.mxu1 %v5783_v10  ;;  %v5870_v9 = vld [vmem:[#allocation6 + $0xf4] ss:$12 sps:$4 sm:$0xff]   ;;  %v5871_v10 = vld [vmem:[#allocation6 + $0xf8] ss:$12 sps:$4 sm:$0xff]  }
 0x1ab   :  { %1342 = vmatprep.subr.bf16.mxu0 %v5788_v11  ;;  %1428 = vmatprep.subr.bf16.mxu1 %v5791_v12  ;;  %v5868_v11 = vld [vmem:[#allocation6 + $0xf0] ss:$12 sps:$4 sm:$0xff]   ;;  %v5872_v12 = vld [vmem:[#allocation6 + $0x38] ss:$12 sps:$4 sm:$0xff]  }
 0x1ae   :  { %1343 = vmatpush1.bf16.msra.mxu0 %v5786_v13  ;;  %1429 = vmatpush1.bf16.msra.mxu1 %v5789_v14  ;;  %v5875_v13 = vld [vmem:[#allocation6 + $0x10c] ss:$12 sps:$4 sm:$0xff]   ;;  %v5876_v14 = vld [vmem:[#allocation6 + $0x110] ss:$12 sps:$4 sm:$0xff]  }
 0x1af   :  { %1344 = vmatprep.subr.bf16.mxu0 %v5794_v15  ;;  %1430 = vmatprep.subr.bf16.mxu1 %v5797_v16  ;;  %v5873_v15 = vld [vmem:[#allocation6 + $0x108] ss:$12 sps:$4 sm:$0xff]   ;;  %v5877_v16 = vld [vmem:[#allocation6 + $0x50] ss:$12 sps:$4 sm:$0xff]  }
 0x1b2   :  { %1345 = vmatpush1.bf16.msra.mxu0 %v5792_v17  ;;  %1431 = vmatpush1.bf16.msra.mxu1 %v5795_v18  ;;  %v5880_v17 = vld [vmem:[#allocation6 + $0x124] ss:$12 sps:$4 sm:$0xff]   ;;  %v5881_v18 = vld [vmem:[#allocation6 + $0x128] ss:$12 sps:$4 sm:$0xff]  }
 0x1b3   :  { %1346 = vmatprep.subr.bf16.mxu0 %v5800_v19  ;;  %1432 = vmatprep.subr.bf16.mxu1 %v5803_v20  ;;  %v5878_v19 = vld [vmem:[#allocation6 + $0x120] ss:$12 sps:$4 sm:$0xff]   ;;  %v5882_v20 = vld [vmem:[#allocation6 + $0x68] ss:$12 sps:$4 sm:$0xff]  }
 0x1b6   :  { %1347 = vmatpush1.bf16.msra.mxu0 %v5798_v21  ;;  %1433 = vmatpush1.bf16.msra.mxu1 %v5801_v22  ;;  %v5885_v21 = vld [vmem:[#allocation6 + $0x13c] ss:$12 sps:$4 sm:$0xff]   ;;  %v5886_v22 = vld [vmem:[#allocation6 + $0x140] ss:$12 sps:$4 sm:$0xff]  }
 0x1b7   :  { %1348 = vmatprep.subr.bf16.mxu0 %v5806_v23  ;;  %1434 = vmatprep.subr.bf16.mxu1 %v5809_v24  ;;  %v5883_v23 = vld [vmem:[#allocation6 + $0x138] ss:$12 sps:$4 sm:$0xff]   ;;  %v5887_v24 = vld [vmem:[#allocation6 + $0x80] ss:$12 sps:$4 sm:$0xff]  }
 0x1ba   :  { %1349 = vmatpush1.bf16.msra.mxu0 %v5804_v25  ;;  %1435 = vmatpush1.bf16.msra.mxu1 %v5807_v26  ;;  %v5890_v25 = vld [vmem:[#allocation6 + $0x154] ss:$12 sps:$4 sm:$0xff]   ;;  %v5891_v26 = vld [vmem:[#allocation6 + $0x158] ss:$12 sps:$4 sm:$0xff]  }
 0x1bb   :  { %1350 = vmatprep.subr.bf16.mxu0 %v5812_v27  ;;  %1436 = vmatprep.subr.bf16.mxu1 %v5815_v28  ;;  %v5888_v27 = vld [vmem:[#allocation6 + $0x150] ss:$12 sps:$4 sm:$0xff]   ;;  %v5892_v28 = vld [vmem:[#allocation6 + $0x98] ss:$12 sps:$4 sm:$0xff]  }
 0x1be   :  { %1351 = vmatpush1.bf16.msra.mxu0 %v5810_v29  ;;  %1437 = vmatpush1.bf16.msra.mxu1 %v5813_v30  ;;  %v5895_v29 = vld [vmem:[#allocation6 + $0x16c] ss:$12 sps:$4 sm:$0xff]   ;;  %v5896_v30 = vld [vmem:[#allocation6 + $0x170] ss:$12 sps:$4 sm:$0xff]  }
 0x1bf   :  { %1352 = vmatprep.subr.bf16.mxu0 %v5818_v31  ;;  %1438 = vmatprep.subr.bf16.mxu1 %v5821_v32  ;;  %v5893_v31 = vld [vmem:[#allocation6 + $0x168] ss:$12 sps:$4 sm:$0xff]   ;;  %v5897_v32 = vld [vmem:[#allocation6 + $0xb0] ss:$12 sps:$4 sm:$0xff]  }
 0x1c2   :  { %1353 = vmatpush1.bf16.msra.mxu0 %v5816_v33  ;;  %1439 = vmatpush1.bf16.msra.mxu1 %v5819_v34  ;;  %v5900_v33 = vld [vmem:[#allocation6 + $0x184] ss:$12 sps:$4 sm:$0xff]   ;;  %v5901_v34 = vld [vmem:[#allocation6 + $0x248] ss:$12 sps:$4 sm:$0xff]  }
 0x1c3   :  { %1354 = vmatprep.subr.bf16.mxu0 %v5824_v35  ;;  %1440 = vmatprep.subr.bf16.mxu1 %v5827_v36  ;;  %v621_v35 = vld [vmem:[%s6873_s4] sm:$0xf] }
 0x1c4   :  { %v626_v36 = vrot.slane %v621_v35, %v6725_v41 }
 0x1c6   :  { %1355 = vmatpush1.bf16.msra.mxu0 %v5822_v37  ;;  %1441 = vmatpush1.bf16.msra.mxu1 %v5825_v38  ;;  %v634_v37 = vrot.slane %v621_v35, %v6736_v57  ;;  %v630_v38 = vrot.slane %v621_v35, %v6731_v43 }
 0x1c7   :  { %1356 = vmatprep.subr.bf16.mxu0 %v5830_v39  ;;  %1442 = vmatprep.subr.bf16.mxu1 %v5833_v42  ;;  %v638_v39 = vrot.slane %v621_v35, %v197_v59 }
 0x1ca   :  { %1357 = vmatpush1.bf16.msra.mxu0 %v5828_v44  ;;  %1443 = vmatpush1.bf16.msra.mxu1 %v5831_v45 }
 0x1cb   :  { %2156 = vmatprep.subr.bf16.mxu0 %v5836_v46  ;;  %5282 = vmatprep.subr.bf16.mxu1 %v5861_v47 }
 0x1cd   :  { %1359 = vmatmul.mubr.bf16.vlgmr.msra.gmra.mrb[4].mxu0 %v6767_v51  ;;  %1445 = vmatmul.mubr.bf16.vlgmr.msra.gmra.mrb[4].mxu1 %v6767_v51  ;;  %v5849_v51 = vld [vmem:[#allocation6 + $0x78] ss:$12 sps:$4 sm:$0xff]  }
 0x1ce   :  { %2157 = vmatpush1.bf16.msra.mxu0 %v5834_v48  ;;  %5283 = vmatpush3.bf16.msra.mxu1 %v5862_v49 }
 0x1cf   :  { %2158 = vmatprep.subr.bf16.mxu0 %v5839_v50  ;;  %5284 = vmatprep.subr.bf16.mxu1 %v5866_v52 }
 0x1d2   :  { %2159 = vmatpush1.bf16.msra.mxu0 %v5837_v53  ;;  %5285 = vmatpush3.bf16.msra.mxu1 %v5867_v8 }
 0x1d3   :  { %2160 = vmatprep.subr.bf16.mxu0 %v5842_v54  ;;  %5286 = vmatprep.subr.bf16.mxu1 %v5871_v10 }
 0x1d6   :  { %2161 = vmatpush1.bf16.msra.mxu0 %v5840_v55  ;;  %5287 = vmatpush3.bf16.msra.mxu1 %v5872_v12 }
 0x1d7   :  { %2162 = vmatprep.subr.bf16.mxu0 %v5845_v56  ;;  %5288 = vmatprep.subr.bf16.mxu1 %v5876_v14 }
 0x1da   :  { %2163 = vmatpush1.bf16.msra.mxu0 %v5843_v58  ;;  %5289 = vmatpush3.bf16.msra.mxu1 %v5877_v16 }
 0x1db   :  { %2164 = vmatprep.subr.bf16.mxu0 %v5848_v60  ;;  %5290 = vmatprep.subr.bf16.mxu1 %v5881_v18 }
 0x1de   :  { %2165 = vmatpush1.bf16.msra.mxu0 %v5846_v61  ;;  %5291 = vmatpush3.bf16.msra.mxu1 %v5882_v20 }
 0x1df   :  { %2166 = vmatprep.subr.bf16.mxu0 %v5851_v62  ;;  %5292 = vmatprep.subr.bf16.mxu1 %v5886_v22 }
 0x1e2   :  { %2167 = vmatpush1.bf16.msra.mxu0 %v5849_v51  ;;  %5293 = vmatpush3.bf16.msra.mxu1 %v5887_v24 }
 0x1e3   :  { %2168 = vmatprep.subr.bf16.mxu0 %v5854_v63  ;;  %5294 = vmatprep.subr.bf16.mxu1 %v5891_v26 }
 0x1e6   :  { %2169 = vmatpush1.bf16.msra.mxu0 %v5852_v1  ;;  %5295 = vmatpush3.bf16.msra.mxu1 %v5892_v28 }
 0x1e7   :  { %2170 = vmatprep.subr.bf16.mxu0 %v5857_v2  ;;  %5296 = vmatprep.subr.bf16.mxu1 %v5896_v30 }
 0x1ea   :  { %2171 = vmatpush1.bf16.msra.mxu0 %v5855_v3  ;;  %5297 = vmatpush3.bf16.msra.mxu1 %v5897_v32 }
 0x1eb   :  { %2172 = vmatprep.subr.bf16.mxu0 %v5860_v4  ;;  %5304 = vmatprep.subr.bf16.mxu1 %v5901_v34 }
 0x1ee   :  { %2173 = vmatpush1.bf16.msra.mxu0 %v5858_v5 }
 0x1ef   :  { %2174 = vmatprep.subr.bf16.mxu0 %v5865_v6 }
 0x1f2   :  { %2175 = vmatpush1.bf16.msra.mxu0 %v5863_v7 }
 0x1f3   :  { %2176 = vmatprep.subr.bf16.mxu0 %v5870_v9 }
 0x1f6   :  { %2177 = vmatpush1.bf16.msra.mxu0 %v5868_v11 }
 0x1f7   :  { %2178 = vmatprep.subr.bf16.mxu0 %v5875_v13 }
 0x1fa   :  { %2179 = vmatpush1.bf16.msra.mxu0 %v5873_v15 }
 0x1fb   :  { %2180 = vmatprep.subr.bf16.mxu0 %v5880_v17 }
 0x1fe   :  { %2181 = vmatpush1.bf16.msra.mxu0 %v5878_v19 }
 0x1ff   :  { %2182 = vmatprep.subr.bf16.mxu0 %v5885_v21 }
 0x202   :  { %2183 = vmatpush1.bf16.msra.mxu0 %v5883_v23 }
 0x203   :  { %2184 = vmatprep.subr.bf16.mxu0 %v5890_v25 }
 0x206   :  { %2185 = vmatpush1.bf16.msra.mxu0 %v5888_v27 }
 0x207   :  { %2186 = vmatprep.subr.bf16.mxu0 %v5895_v29 }
 0x20a   :  { %2187 = vmatpush1.bf16.msra.mxu0 %v5893_v31 }
 0x20b   :  { %2199 = vmatprep.subr.bf16.mxu0 %v5900_v33 }
 0x2a0   :  { %v1360_v42 = vpop.f32.mrb[4].mxu0  ;;  %v1446_v44 = vpop.f32.mrb[4].mxu1 }
 0x2a1   :  { %v5530_v45 = vadd.f32 %v1360_v42, %v626_v36  ;;  %v5534_v46 = vadd.f32 %v1446_v44, %v634_v37  ;;  %v1362_v47 = vpop.f32.mrb[5].mxu0  ;;  %v1448_v48 = vpop.f32.mrb[5].mxu1  ;;  %v5902_v42 = vld [vmem:[#allocation6 + $0x188] ss:$12 sps:$4 sm:$0xff]  }
 0x2a2   :  { %v5531_v49 = vadd.f32 %v1362_v47, %v630_v38  ;;  %v5535_v50 = vadd.f32 %v1448_v48, %v638_v39  ;;  %v1364_v52 = vpop.f32.mrb[6].mxu0  ;;  %v1450_v53 = vpop.f32.mrb[6].mxu1  ;;  %v5905_v47 = vld [vmem:[#allocation6 + $0x19c] ss:$12 sps:$4 sm:$0xff]   ;;  %v5907_v48 = vld [vmem:[#allocation6 + $0x1a0] ss:$12 sps:$4 sm:$0xff]  }
 0x2a3   :  { %v1455_v54 = vmul.f32 0.5, %v5530_v45  ;;  %v1457_v55 = vmul.f32 0.5, %v5534_v46  ;;  %v5532_v56 = vadd.f32 %v1364_v52, %v626_v36  ;;  %v5536_v58 = vadd.f32 %v1450_v53, %v634_v37  ;;  %v1366_v60 = vpop.f32.mrb[7].mxu0  ;;  %v1452_v61 = vpop.f32.mrb[7].mxu1  ;;  %v5908_v52 = vld [vmem:[#allocation6 + $0x1b0] ss:$12 sps:$4 sm:$0xff]  }
 0x2a4   :  { %v1456_v62 = vmul.f32 0.5, %v5531_v49  ;;  %v1458_v51 = vmul.f32 0.5, %v5535_v50  ;;  %v5533_v40 = vadd.f32 %v1366_v60, %v630_v38  ;;  %v5537_v59 = vadd.f32 %v1452_v61, %v638_v39  ;;  %v5898_v39 = vld [vmem:[#allocation6 + $0x180] ss:$12 sps:$4 sm:$0xff]   ;;  %v5912_v53 = vld [vmem:[#allocation6 + $0x1b8] ss:$12 sps:$4 sm:$0xff]  }
 0x2a5   :  { %6290 = vtanh.f32 %v1455_v54  ;;  %v1459_v63 = vmul.f32 0.5, %v5532_v56  ;;  %v1461_v1 = vmul.f32 0.5, %v5536_v58  ;;  %v5915_v54 = vld [vmem:[#allocation6 + $0x1cc] ss:$12 sps:$4 sm:$0xff]   ;;  %v5920_v60 = vld [vmem:[#allocation6 + $0x1e4] ss:$12 sps:$4 sm:$0xff]  }
 0x2a6   :  { %6292 = vtanh.f32 %v1457_v55  ;;  %v1460_v2 = vmul.f32 0.5, %v5533_v40  ;;  %v1462_v3 = vmul.f32 0.5, %v5537_v59  ;;  %v5916_v55 = vld [vmem:[#allocation6 + $0x290] ss:$12 sps:$4 sm:$0xff]   ;;  %v5921_v61 = vld [vmem:[#allocation6 + $0x2a8] ss:$12 sps:$4 sm:$0xff]  }
 0x2a7   :  { %6294 = vtanh.f32 %v1456_v62  ;;  %v5918_v62 = vld [vmem:[#allocation6 + $0x1e0] ss:$12 sps:$4 sm:$0xff]  }
 0x2a8   :  { %6296 = vtanh.f32 %v1458_v51  ;;  %v5922_v51 = vld [vmem:[#allocation6 + $0x1e8] ss:$12 sps:$4 sm:$0xff]  }
 0x2a9   :  { %6298 = vtanh.f32 %v1459_v63  ;;  %v5923_v63 = vld [vmem:[#allocation6 + $0x1f8] ss:$12 sps:$4 sm:$0xff]  }
 0x2aa   :  { %6300 = vtanh.f32 %v1461_v1  ;;  %v5927_v1 = vld [vmem:[#allocation6 + $0x200] ss:$12 sps:$4 sm:$0xff]  }
 0x2ab   :  { %6302 = vtanh.f32 %v1460_v2  ;;  %v5930_v2 = vld [vmem:[#allocation6 + $0x214] ss:$12 sps:$4 sm:$0xff]  }
 0x2ac   :  { %6304 = vtanh.f32 %v1462_v3  ;;  %v5931_v3 = vld [vmem:[#allocation6 + $0x2d8] ss:$12 sps:$4 sm:$0xff]  }
 0x2af   :  { %v6291_v4 = vpop.eup %6290 }
 0x2b0   :  { %v6293_v5 = vpop.eup %6292  ;;  %v1471_v6 = vadd.f32 1.0, %v6291_v4  ;;  %v5928_v4 = vld [vmem:[#allocation6 + $0x210] ss:$12 sps:$4 sm:$0xff]  }
 0x2b1   :  { %v6295_v7 = vpop.eup %6294  ;;  %v1473_v8 = vadd.f32 1.0, %v6293_v5  ;;  %v5932_v5 = vld [vmem:[#allocation6 + $0x218] ss:$12 sps:$4 sm:$0xff]  }
 0x2b2   :  { %v6297_v9 = vpop.eup %6296  ;;  %v1472_v10 = vadd.f32 1.0, %v6295_v7  ;;  %v1479_v14 = vmul.f32 0.5, %v1471_v6  ;;  %v5935_v6 = vld [vmem:[#allocation6 + $0x22c] ss:$12 sps:$4 sm:$0xff]   ;;  %v5936_v7 = vld [vmem:[#allocation6 + $0x2f0] ss:$12 sps:$4 sm:$0xff]  }
 0x2b3   :  { %v6299_v11 = vpop.eup %6298  ;;  %v1474_v12 = vadd.f32 1.0, %v6297_v9  ;;  %v1481_v17 = vmul.f32 0.5, %v1473_v8  ;;  %v5933_v8 = vld [vmem:[#allocation6 + $0x228] ss:$12 sps:$4 sm:$0xff]   ;;  %v5937_v9 = vld [vmem:[#allocation6 + $0x230] ss:$12 sps:$4 sm:$0xff]  }
 0x2b4   :  { %v6301_v13 = vpop.eup %6300  ;;  %v1475_v15 = vadd.f32 1.0, %v6299_v11  ;;  %v1480_v20 = vmul.f32 0.5, %v1472_v10  ;;  %v1487_v26 = vmul.f32 %v5530_v45, %v1479_v14  ;;  %v5906_v45 = vld [vmem:[#allocation6 + $0x260] ss:$12 sps:$4 sm:$0xff]   ;;  %v5940_v10 = vld [vmem:[#allocation6 + $0x244] ss:$12 sps:$4 sm:$0xff]  }
 0x2b5   :  { %v6303_v16 = vpop.eup %6302  ;;  %v1477_v18 = vadd.f32 1.0, %v6301_v13  ;;  %v1482_v23 = vmul.f32 0.5, %v1474_v12  ;;  %v1489_v29 = vmul.f32 %v5534_v46, %v1481_v17  ;;  %v5903_v46 = vld [vmem:[#allocation6 + $0x198] ss:$12 sps:$4 sm:$0xff]   ;;  %v5938_v11 = vld [vmem:[#allocation6 + $0x240] ss:$12 sps:$4 sm:$0xff]  }
 0x2b6   :  { %v6305_v19 = vpop.eup %6304  ;;  %v1483_v21 = vmul.f32 0.5, %v1475_v15  ;;  %v1476_v22 = vadd.f32 1.0, %v6303_v16  ;;  %v1488_v32 = vmul.f32 %v5531_v49, %v1480_v20  ;;  %v5910_v49 = vld [vmem:[#allocation6 + $0x1b4] ss:$12 sps:$4 sm:$0xff]   ;;  %v5943_v12 = vld [vmem:[#allocation6 + $0x25c] ss:$12 sps:$4 sm:$0xff]  }
 0x2b7   :  { %v1485_v24 = vmul.f32 0.5, %v1477_v18  ;;  %v1478_v25 = vadd.f32 1.0, %v6305_v19  ;;  %v1490_v35 = vmul.f32 %v5535_v50, %v1482_v23  ;;  %v5911_v50 = vld [vmem:[#allocation6 + $0x278] ss:$12 sps:$4 sm:$0xff]   ;;  %v5946_v14 = vld [vmem:[#allocation6 + $0x274] ss:$12 sps:$4 sm:$0xff]  }
 0x2b8   :  { %v1491_v27 = vmul.f32 %v5532_v56, %v1483_v21  ;;  %v1484_v28 = vmul.f32 0.5, %v1476_v22  ;;  %v5913_v56 = vld [vmem:[#allocation6 + $0x1c8] ss:$12 sps:$4 sm:$0xff]   ;;  %v5941_v13 = vld [vmem:[#allocation6 + $0x258] ss:$12 sps:$4 sm:$0xff]  }
 0x2b9   :  { %v1493_v30 = vmul.f32 %v5536_v58, %v1485_v24  ;;  %v1486_v31 = vmul.f32 0.5, %v1478_v25  ;;  %v5917_v58 = vld [vmem:[#allocation6 + $0x1d0] ss:$12 sps:$4 sm:$0xff]   ;;  %v5949_v16 = vld [vmem:[#allocation6 + $0x28c] ss:$12 sps:$4 sm:$0xff]  }
 0x2ba   :  { %v1495_v33 = vpack.c.bf16 %v1491_v27, %v1487_v26  ;;  %v1492_v34 = vmul.f32 %v5533_v40, %v1484_v28  ;;  %v5925_v40 = vld [vmem:[#allocation6 + $0x1fc] ss:$12 sps:$4 sm:$0xff]   ;;  %v5952_v18 = vld [vmem:[#allocation6 + $0x2a4] ss:$12 sps:$4 sm:$0xff]   ;;  %v5950_v19 = vld [vmem:[#allocation6 + $0x2a0] ss:$12 sps:$4 sm:$0xff]  }
 0x2bb   :  { %v6780_v36 = vpack.c.bf16 %v1493_v30, %v1489_v29  ;;  %v1494_v37 = vmul.f32 %v5537_v59, %v1486_v31  ;;  %v5926_v59 = vld [vmem:[#allocation6 + $0x2c0] ss:$12 sps:$4 sm:$0xff]   ;;  %v5944_v15 = vld [vmem:[#allocation6 + $0x270] ss:$12 sps:$4 sm:$0xff]   ;;  %v5947_v17 = vld [vmem:[#allocation6 + $0x288] ss:$12 sps:$4 sm:$0xff]  }
 0x2bc   :  { %v1496_v38 = vpack.c.bf16 %v1492_v34, %v1488_v32  ;;  %v5955_v20 = vld [vmem:[#allocation6 + $0x2bc] ss:$12 sps:$4 sm:$0xff]   ;;  %v5953_v21 = vld [vmem:[#allocation6 + $0x2b8] ss:$12 sps:$4 sm:$0xff]   ;;  %v5958_v22 = vld [vmem:[#allocation6 + $0x2d4] ss:$12 sps:$4 sm:$0xff]  }
 0x2bd   :  { %v1498_v44 = vpack.c.bf16 %v1494_v37, %v1490_v35  ;;  %v5956_v23 = vld [vmem:[#allocation6 + $0x2d0] ss:$12 sps:$4 sm:$0xff]   ;;  %v5961_v24 = vld [vmem:[#allocation6 + $0x2ec] ss:$12 sps:$4 sm:$0xff]   ;;  %v5959_v25 = vld [vmem:[#allocation6 + $0x2e8] ss:$12 sps:$4 sm:$0xff]  }
 0x2be   :  { %2188 = vmatprep.mubr.bf16.mxu0 %v1496_v38  ;;  %2274 = vmatprep.mubr.bf16.mxu1 %v1496_v38  ;;  %v5962_v26 = vld [vmem:[#allocation7] ss:$12 sps:$4 sm:$0xff]   ;;  %v5964_v27 = vld [vmem:[#allocation7 + $0x4] ss:$12 sps:$4 sm:$0xff]   ;;  %v5967_v28 = vld [vmem:[#allocation7 + $0x1c] ss:$12 sps:$4 sm:$0xff]  }
 0x2bf   :  { %2189 = vmatmul.mubr.bf16.vlgmr.msra.gmra.mrb[8].mxu0 %v1495_v33  ;;  %2275 = vmatmul.mubr.bf16.vlgmr.msra.gmra.mrb[8].mxu1 %v1495_v33  ;;  %v5965_v29 = vld [vmem:[#allocation7 + $0x18] ss:$12 sps:$4 sm:$0xff]   ;;  %v5970_v30 = vld [vmem:[#allocation7 + $0x34] ss:$12 sps:$4 sm:$0xff]   ;;  %v5968_v31 = vld [vmem:[#allocation7 + $0x30] ss:$12 sps:$4 sm:$0xff]  }
 0x2c0   :  { %2200 = vmatpush1.bf16.msra.mxu0 %v5898_v39  ;;  %5305 = vmatpush3.bf16.msra.mxu1 %v5902_v42  ;;  %v5973_v32 = vld [vmem:[#allocation7 + $0x4c] ss:$12 sps:$4 sm:$0xff]   ;;  %v5971_v33 = vld [vmem:[#allocation7 + $0x48] ss:$12 sps:$4 sm:$0xff]   ;;  %v5976_v34 = vld [vmem:[#allocation7 + $0x64] ss:$12 sps:$4 sm:$0xff]  }
 0x2c1   :  { %2231 = vmatprep.mubr.bf16.mxu0 %v1498_v44  ;;  %2315 = vmatprep.mubr.bf16.mxu1 %v1498_v44  ;;  %v5974_v35 = vld [vmem:[#allocation7 + $0x60] ss:$12 sps:$4 sm:$0xff]   ;;  %v5977_v37 = vld [vmem:[#allocation7 + $0x78] ss:$12 sps:$4 sm:$0xff]   ;;  %v5980_v39 = vld [vmem:[#allocation7 + $0x90] ss:$12 sps:$4 sm:$0xff]  }
 0x2c2   :  { %2201 = vmatprep.subr.bf16.mxu0 %v5905_v47  ;;  %5306 = vmatprep.subr.bf16.mxu1 %v5906_v45  ;;  %v5982_v38 = vld [vmem:[#allocation7 + $0x94] ss:$12 sps:$4 sm:$0xff]   ;;  %v5985_v42 = vld [vmem:[#allocation7 + $0xac] ss:$12 sps:$4 sm:$0xff]   ;;  %v5988_v47 = vld [vmem:[#allocation7 + $0xc4] ss:$12 sps:$4 sm:$0xff]  }
 0x2c3   :  { %v5983_v44 = vld [vmem:[#allocation7 + $0xa8] ss:$12 sps:$4 sm:$0xff]  }
 0x2c4   :  { %2202 = vmatpush1.bf16.msra.mxu0 %v5903_v46  ;;  %5307 = vmatpush3.bf16.msra.mxu1 %v5907_v48  ;;  %v5989_v45 = vld [vmem:[#allocation7 + $0xc8] ss:$12 sps:$4 sm:$0xff]   ;;  %v5986_v46 = vld [vmem:[#allocation7 + $0xc0] ss:$12 sps:$4 sm:$0xff]  }
 0x2c5   :  { %2203 = vmatprep.subr.bf16.mxu0 %v5910_v49  ;;  %5308 = vmatprep.subr.bf16.mxu1 %v5911_v50  ;;  %v5990_v48 = vld [vmem:[#allocation7 + $0x8] ss:$12 sps:$4 sm:$0xff]   ;;  %v5994_v50 = vld [vmem:[#allocation7 + $0xe0] ss:$12 sps:$4 sm:$0xff]  }
 0x2c6   :  { %v5993_v49 = vld [vmem:[#allocation7 + $0xdc] ss:$12 sps:$4 sm:$0xff]  }
 0x2c8   :  { %2204 = vmatpush1.bf16.msra.mxu0 %v5908_v52  ;;  %5309 = vmatpush3.bf16.msra.mxu1 %v5912_v53  ;;  %v5991_v52 = vld [vmem:[#allocation7 + $0xd8] ss:$12 sps:$4 sm:$0xff]   ;;  %v5995_v53 = vld [vmem:[#allocation7 + $0x20] ss:$12 sps:$4 sm:$0xff]  }
 0x2c9   :  { %2205 = vmatprep.subr.bf16.mxu0 %v5915_v54  ;;  %5310 = vmatprep.subr.bf16.mxu1 %v5916_v55  ;;  %v5998_v54 = vld [vmem:[#allocation7 + $0xf4] ss:$12 sps:$4 sm:$0xff]   ;;  %v5999_v55 = vld [vmem:[#allocation7 + $0xf8] ss:$12 sps:$4 sm:$0xff]  }
 0x2cc   :  { %2206 = vmatpush1.bf16.msra.mxu0 %v5913_v56  ;;  %5311 = vmatpush3.bf16.msra.mxu1 %v5917_v58  ;;  %v5996_v56 = vld [vmem:[#allocation7 + $0xf0] ss:$12 sps:$4 sm:$0xff]   ;;  %v6000_v58 = vld [vmem:[#allocation7 + $0x38] ss:$12 sps:$4 sm:$0xff]  }
 0x2cd   :  { %2207 = vmatprep.subr.bf16.mxu0 %v5920_v60  ;;  %5312 = vmatprep.subr.bf16.mxu1 %v5921_v61  ;;  %v6003_v60 = vld [vmem:[#allocation7 + $0x10c] ss:$12 sps:$4 sm:$0xff]   ;;  %v6004_v61 = vld [vmem:[#allocation7 + $0x110] ss:$12 sps:$4 sm:$0xff]  }
 0x2d0   :  { %2208 = vmatpush1.bf16.msra.mxu0 %v5918_v62  ;;  %5313 = vmatpush3.bf16.msra.mxu1 %v5922_v51  ;;  %v6001_v62 = vld [vmem:[#allocation7 + $0x108] ss:$12 sps:$4 sm:$0xff]   ;;  %v6005_v51 = vld [vmem:[#allocation7 + $0x50] ss:$12 sps:$4 sm:$0xff]  }
 0x2d1   :  { %2209 = vmatprep.subr.bf16.mxu0 %v5925_v40  ;;  %5314 = vmatprep.subr.bf16.mxu1 %v5926_v59  ;;  %v6008_v40 = vld [vmem:[#allocation7 + $0x124] ss:$12 sps:$4 sm:$0xff]   ;;  %v6009_v59 = vld [vmem:[#allocation7 + $0x128] ss:$12 sps:$4 sm:$0xff]  }
 0x2d4   :  { %2210 = vmatpush1.bf16.msra.mxu0 %v5923_v63  ;;  %5315 = vmatpush3.bf16.msra.mxu1 %v5927_v1  ;;  %v6006_v63 = vld [vmem:[#allocation7 + $0x120] ss:$12 sps:$4 sm:$0xff]   ;;  %v6010_v1 = vld [vmem:[#allocation7 + $0x68] ss:$12 sps:$4 sm:$0xff]  }
 0x2d5   :  { %2211 = vmatprep.subr.bf16.mxu0 %v5930_v2  ;;  %5316 = vmatprep.subr.bf16.mxu1 %v5931_v3  ;;  %v6013_v2 = vld [vmem:[#allocation7 + $0x13c] ss:$12 sps:$4 sm:$0xff]   ;;  %v6014_v3 = vld [vmem:[#allocation7 + $0x140] ss:$12 sps:$4 sm:$0xff]  }
 0x2d8   :  { %2212 = vmatpush1.bf16.msra.mxu0 %v5928_v4  ;;  %5317 = vmatpush3.bf16.msra.mxu1 %v5932_v5  ;;  %v6011_v4 = vld [vmem:[#allocation7 + $0x138] ss:$12 sps:$4 sm:$0xff]   ;;  %v6015_v5 = vld [vmem:[#allocation7 + $0x80] ss:$12 sps:$4 sm:$0xff]  }
 0x2d9   :  { %2213 = vmatprep.subr.bf16.mxu0 %v5935_v6  ;;  %5318 = vmatprep.subr.bf16.mxu1 %v5936_v7  ;;  %v6018_v6 = vld [vmem:[#allocation7 + $0x154] ss:$12 sps:$4 sm:$0xff]   ;;  %v6019_v7 = vld [vmem:[#allocation7 + $0x158] ss:$12 sps:$4 sm:$0xff]  }
 0x2dc   :  { %2214 = vmatpush1.bf16.msra.mxu0 %v5933_v8  ;;  %5319 = vmatpush3.bf16.msra.mxu1 %v5937_v9  ;;  %v6016_v8 = vld [vmem:[#allocation7 + $0x150] ss:$12 sps:$4 sm:$0xff]   ;;  %v6020_v9 = vld [vmem:[#allocation7 + $0x98] ss:$12 sps:$4 sm:$0xff]  }
 0x2dd   :  { %2215 = vmatprep.subr.bf16.mxu0 %v5940_v10  ;;  %2854 = vmatprep.subr.bf16.mxu1 %v5964_v27  ;;  %v6023_v10 = vld [vmem:[#allocation7 + $0x16c] ss:$12 sps:$4 sm:$0xff]  }
 0x2df   :  { %2316 = vmatmul.mubr.bf16.vlgmr.msra.gmra.mrb[12].mxu1 %v6780_v36 }
 0x2e0   :  { %2216 = vmatpush1.bf16.msra.mxu0 %v5938_v11  ;;  %2855 = vmatpush1.bf16.msra.mxu1 %v5962_v26  ;;  %v6024_v11 = vld [vmem:[#allocation7 + $0x170] ss:$12 sps:$4 sm:$0xff]  }
 0x2e1   :  { %2217 = vmatprep.subr.bf16.mxu0 %v5943_v12  ;;  %2856 = vmatprep.subr.bf16.mxu1 %v5967_v28  ;;  %v6021_v12 = vld [vmem:[#allocation7 + $0x168] ss:$12 sps:$4 sm:$0xff]  }
 0x2e4   :  { %2218 = vmatpush1.bf16.msra.mxu0 %v5941_v13  ;;  %2857 = vmatpush1.bf16.msra.mxu1 %v5965_v29  ;;  %v6025_v13 = vld [vmem:[#allocation7 + $0xb0] ss:$12 sps:$4 sm:$0xff]  }
 0x2e5   :  { %2219 = vmatprep.subr.bf16.mxu0 %v5946_v14  ;;  %2858 = vmatprep.subr.bf16.mxu1 %v5970_v30  ;;  %v6028_v14 = vld [vmem:[#allocation7 + $0x184] ss:$12 sps:$4 sm:$0xff]  }
 0x2e8   :  { %2220 = vmatpush1.bf16.msra.mxu0 %v5944_v15  ;;  %2859 = vmatpush1.bf16.msra.mxu1 %v5968_v31  ;;  %v6530_v15 = vmov 0.0  }
 0x2e9   :  { %2221 = vmatprep.subr.bf16.mxu0 %v5949_v16  ;;  %2860 = vmatprep.subr.bf16.mxu1 %v5973_v32 }
 0x2ec   :  { %2222 = vmatpush1.bf16.msra.mxu0 %v5947_v17  ;;  %2861 = vmatpush1.bf16.msra.mxu1 %v5971_v33 }
 0x2ed   :  { %2223 = vmatprep.subr.bf16.mxu0 %v5952_v18  ;;  %2862 = vmatprep.subr.bf16.mxu1 %v5976_v34 }
 0x2f0   :  { %2224 = vmatpush1.bf16.msra.mxu0 %v5950_v19  ;;  %2863 = vmatpush1.bf16.msra.mxu1 %v5974_v35 }
 0x2f1   :  { %2225 = vmatprep.subr.bf16.mxu0 %v5955_v20 }
 0x2f4   :  { %2226 = vmatpush1.bf16.msra.mxu0 %v5953_v21 }
 0x2f5   :  { %2227 = vmatprep.subr.bf16.mxu0 %v5958_v22  ;;  %v1627_v22 = vld [vmem:[%s6875_s6] sm:$0x7] }
 0x2f8   :  { %2228 = vmatpush1.bf16.msra.mxu0 %v5956_v23  ;;  %v1640_v23 = vrot.slane %v1627_v22, %v6736_v57 }
 0x2f9   :  { %2229 = vmatprep.subr.bf16.mxu0 %v5961_v24 }
 0x2fc   :  { %2230 = vmatpush1.bf16.msra.mxu0 %v5959_v25 }
 0x2fd   :  { %5326 = vmatprep.subr.bf16.mxu0 %v5989_v45  ;;  %v1632_v45 = vrot.slane %v1627_v22, %v6725_v41 }
 0x2ff   :  { %2232 = vmatmul.mubr.bf16.vlgmr.msra.gmra.mrb[8].mxu0 %v6780_v36  ;;  %v5979_v36 = vld [vmem:[#allocation7 + $0x7c] ss:$12 sps:$4 sm:$0xff]  }
 0x300   :  { %2864 = vmatprep.subr.bf16.mxu1 %v5979_v36  ;;  %5327 = vmatpush3.bf16.msra.mxu0 %v5990_v48 }
 0x301   :  { %2865 = vmatpush1.bf16.msra.mxu1 %v5977_v37  ;;  %5328 = vmatprep.subr.bf16.mxu0 %v5994_v50 }
 0x302   :  { %2866 = vmatprep.subr.bf16.mxu1 %v5982_v38 }
 0x304   :  { %5329 = vmatpush3.bf16.msra.mxu0 %v5995_v53 }
 0x305   :  { %2867 = vmatpush1.bf16.msra.mxu1 %v5980_v39  ;;  %5330 = vmatprep.subr.bf16.mxu0 %v5999_v55 }
 0x306   :  { %2868 = vmatprep.subr.bf16.mxu1 %v5985_v42 }
 0x308   :  { %5331 = vmatpush3.bf16.msra.mxu0 %v6000_v58 }
 0x309   :  { %2869 = vmatpush1.bf16.msra.mxu1 %v5983_v44  ;;  %5332 = vmatprep.subr.bf16.mxu0 %v6004_v61 }
 0x30a   :  { %2870 = vmatprep.subr.bf16.mxu1 %v5988_v47 }
 0x30c   :  { %5333 = vmatpush3.bf16.msra.mxu0 %v6005_v51 }
 0x30d   :  { %2871 = vmatpush1.bf16.msra.mxu1 %v5986_v46  ;;  %5334 = vmatprep.subr.bf16.mxu0 %v6009_v59  ;;  %v1636_v46 = vrot.slane %v1627_v22, %v6731_v43  ;;  %v6041_v22 = vld [vmem:[#allocation7 + $0x1d0] ss:$12 sps:$4 sm:$0xff]  }
 0x30e   :  { %2872 = vmatprep.subr.bf16.mxu1 %v5993_v49 }
 0x310   :  { %5335 = vmatpush3.bf16.msra.mxu0 %v6010_v1 }
 0x311   :  { %2873 = vmatpush1.bf16.msra.mxu1 %v5991_v52  ;;  %5336 = vmatprep.subr.bf16.mxu0 %v6014_v3 }
 0x312   :  { %2874 = vmatprep.subr.bf16.mxu1 %v5998_v54 }
 0x314   :  { %5337 = vmatpush3.bf16.msra.mxu0 %v6015_v5 }
 0x315   :  { %2875 = vmatpush1.bf16.msra.mxu1 %v5996_v56  ;;  %5338 = vmatprep.subr.bf16.mxu0 %v6019_v7 }
 0x316   :  { %2876 = vmatprep.subr.bf16.mxu1 %v6003_v60 }
 0x318   :  { %5339 = vmatpush3.bf16.msra.mxu0 %v6020_v9 }
 0x319   :  { %2877 = vmatpush1.bf16.msra.mxu1 %v6001_v62  ;;  %5340 = vmatprep.subr.bf16.mxu0 %v6024_v11  ;;  %v6026_v11 = vld [vmem:[#allocation7 + $0x180] ss:$12 sps:$4 sm:$0xff]  }
 0x31a   :  { %2878 = vmatprep.subr.bf16.mxu1 %v6008_v40 }
 0x31c   :  { %5341 = vmatpush3.bf16.msra.mxu0 %v6025_v13  ;;  %v6032_v13 = vld [vmem:[#allocation7 + $0x19c] ss:$12 sps:$4 sm:$0xff]  }
 0x31d   :  { %2879 = vmatpush1.bf16.msra.mxu1 %v6006_v63  ;;  %5450 = vmatprep.subr.bf16.mxu0 %v6530_v15 }
 0x31e   :  { %2880 = vmatprep.subr.bf16.mxu1 %v6013_v2 }
 0x321   :  { %2881 = vmatpush1.bf16.msra.mxu1 %v6011_v4 }
 0x322   :  { %2882 = vmatprep.subr.bf16.mxu1 %v6018_v6 }
 0x325   :  { %2883 = vmatpush1.bf16.msra.mxu1 %v6016_v8 }
 0x326   :  { %2884 = vmatprep.subr.bf16.mxu1 %v6023_v10 }
 0x329   :  { %2885 = vmatpush1.bf16.msra.mxu1 %v6021_v12  ;;  %v6029_v12 = vld [vmem:[#allocation7 + $0x188] ss:$12 sps:$4 sm:$0xff]  }
 0x32a   :  { %2897 = vmatprep.subr.bf16.mxu1 %v6028_v14  ;;  %v6030_v14 = vld [vmem:[#allocation7 + $0x198] ss:$12 sps:$4 sm:$0xff]  }
 0x392   :  { %v5298_v16 = vpop.f32.mrb[8].mxu1 }
 0x393   :  { %v5299_v17 = vpop.f32.mrb[9].mxu1 }
 0x394   :  { %v5300_v18 = vadd.f32 %v5299_v17, %v5298_v16  ;;  %v5301_v19 = vpop.f32.mrb[10].mxu1  ;;  %v6033_v16 = vld [vmem:[#allocation7 + $0x1a0] ss:$12 sps:$4 sm:$0xff]  }
 0x395   :  { %v5302_v20 = vpop.f32.mrb[11].mxu1  ;;  %v6036_v17 = vld [vmem:[#allocation7 + $0x1b4] ss:$12 sps:$4 sm:$0xff]  }
 0x396   :  { %v5303_v21 = vadd.f32 %v5302_v20, %v5301_v19  ;;  %v2277_v26 = vadd.f32 %v5300_v18, %v1640_v23  ;;  %v6034_v18 = vld [vmem:[#allocation7 + $0x1b0] ss:$12 sps:$4 sm:$0xff]   ;;  %v6037_v19 = vld [vmem:[#allocation7 + $0x1b8] ss:$12 sps:$4 sm:$0xff]  }
 0x397   :  { %v6040_v20 = vld [vmem:[#allocation7 + $0x1cc] ss:$12 sps:$4 sm:$0xff]  }
 0x398   :  { %v2280_v30 = vadd.f32 %v5303_v21, %v1640_v23  ;;  %v6038_v21 = vld [vmem:[#allocation7 + $0x1c8] ss:$12 sps:$4 sm:$0xff]   ;;  %v6044_v23 = vld [vmem:[#allocation7 + $0x1e4] ss:$12 sps:$4 sm:$0xff]  }
 0x3b2   :  { %v5320_v24 = vpop.f32.mrb[12].mxu1 }
 0x3b3   :  { %v5321_v25 = vpop.f32.mrb[13].mxu1 }
 0x3b4   :  { %v5322_v27 = vadd.f32 %v5321_v25, %v5320_v24  ;;  %v5323_v28 = vpop.f32.mrb[14].mxu1  ;;  %v6042_v24 = vld [vmem:[#allocation7 + $0x1e0] ss:$12 sps:$4 sm:$0xff]   ;;  %v6045_v25 = vld [vmem:[#allocation7 + $0x1e8] ss:$12 sps:$4 sm:$0xff]  }
 0x3b5   :  { %v5324_v29 = vpop.f32.mrb[15].mxu1 }
 0x3b6   :  { %v2318_v31 = vadd.f32 %v5322_v27, %v2277_v26  ;;  %v5325_v32 = vadd.f32 %v5324_v29, %v5323_v28  ;;  %v6048_v26 = vld [vmem:[#allocation7 + $0x1fc] ss:$12 sps:$4 sm:$0xff]   ;;  %v6046_v27 = vld [vmem:[#allocation7 + $0x1f8] ss:$12 sps:$4 sm:$0xff]   ;;  %v6049_v28 = vld [vmem:[#allocation7 + $0x200] ss:$12 sps:$4 sm:$0xff]  }
 0x3b7   :  { %v6052_v29 = vld [vmem:[#allocation7 + $0x214] ss:$12 sps:$4 sm:$0xff]  }
 0x3b8   :  { %v2334_v33 = vmul.f32 1.442695, %v2318_v31  ;;  %v2321_v34 = vadd.f32 %v5325_v32, %v2280_v30  ;;  %vm2326_vm8 = vcmp.gt.f32.partialorder %v2318_v31, 0.0  ;;  %v6050_v30 = vld [vmem:[#allocation7 + $0x210] ss:$12 sps:$4 sm:$0xff]  }
 0x3b9   :  { %v6056_v32 = vld [vmem:[#allocation7 + $0x22c] ss:$12 sps:$4 sm:$0xff]  }
 0x3ba   :  { %6306 = vpow2.f32 %v2334_v33  ;;  %v2340_v35 = vmul.f32 1.442695, %v2321_v34  ;;  %vm2329_vm9 = vcmp.gt.f32.partialorder %v2321_v34, 0.0  ;;  %v6054_v33 = vld [vmem:[#allocation7 + $0x228] ss:$12 sps:$4 sm:$0xff]  }
 0x3bc   :  { %6308 = vpow2.f32 %v2340_v35  ;;  %v6060_v35 = vld [vmem:[#allocation9 + $0x4] ss:$12 sps:$4 sm:$0xff]  }
 0x3c4   :  { %v6307_v36 = vpop.eup %6306 }
 0x3c5   :  { %v5016_v37 = vadd.f32 -1.0, %v6307_v36  ;;  %v6058_v36 = vld [vmem:[#allocation9] ss:$12 sps:$4 sm:$0xff]  }
 0x3c6   :  { %v6309_v38 = vpop.eup %6308 }
 0x3c7   :  { %v5019_v39 = vadd.f32 -1.0, %v6309_v38  ;;  %v2350_v42 = vsel %vm2326_vm8, %v2318_v31, %v5016_v37  ;;  %v6053_v31 = vld [vmem:[#allocation7 + $0x218] ss:$12 sps:$4 sm:$0xff]   ;;  %v6063_v37 = vld [vmem:[#allocation9 + $0x1c] ss:$12 sps:$4 sm:$0xff]  }
 0x3c8   :  { %v6061_v38 = vld [vmem:[#allocation9 + $0x18] ss:$12 sps:$4 sm:$0xff]  }
 0x3c9   :  { %v2353_v44 = vsel %vm2329_vm9, %v2321_v34, %v5019_v39  ;;  %v6057_v34 = vld [vmem:[#allocation7 + $0x230] ss:$12 sps:$4 sm:$0xff]   ;;  %v6066_v39 = vld [vmem:[#allocation9 + $0x34] ss:$12 sps:$4 sm:$0xff]  }
 0x3ca   :  { %v6789_v47 = vpack.c.bf16 %v2353_v44, %v2350_v42  ;;  %v6064_v42 = vld [vmem:[#allocation9 + $0x30] ss:$12 sps:$4 sm:$0xff]   ;;  %v6067_v44 = vld [vmem:[#allocation9 + $0x48] ss:$12 sps:$4 sm:$0xff]  }
 0x3d2   :  { %v2233_v48 = vpop.f32.mrb[8].mxu0 }
 0x3d3   :  { %v5538_v49 = vadd.f32 %v2233_v48, %v1632_v45  ;;  %v2235_v50 = vpop.f32.mrb[9].mxu0  ;;  %v6070_v48 = vld [vmem:[#allocation9 + $0x60] ss:$12 sps:$4 sm:$0xff]  }
 0x3d4   :  { %v5539_v52 = vadd.f32 %v2235_v50, %v1636_v46  ;;  %v2237_v53 = vpop.f32.mrb[10].mxu0  ;;  %v6086_v50 = vld [vmem:[#allocation9 + $0x8] ss:$12 sps:$4 sm:$0xff]  }
 0x3d5   :  { %v2330_v54 = vmul.f32 1.442695, %v5538_v49  ;;  %v5540_v55 = vadd.f32 %v2237_v53, %v1632_v45  ;;  %v2239_v56 = vpop.f32.mrb[11].mxu0  ;;  %vm2324_vm10 = vcmp.gt.f32.partialorder %v5538_v49, 0.0  ;;  %v6069_v45 = vld [vmem:[#allocation9 + $0x4c] ss:$12 sps:$4 sm:$0xff]  }
 0x3d6   :  { %v2332_v58 = vmul.f32 1.442695, %v5539_v52  ;;  %v5541_v60 = vadd.f32 %v2239_v56, %v1636_v46  ;;  %vm2325_vm12 = vcmp.gt.f32.partialorder %v5539_v52, 0.0  ;;  %v6072_v46 = vld [vmem:[#allocation9 + $0x64] ss:$12 sps:$4 sm:$0xff]  }
 0x3d7   :  { %6310 = vpow2.f32 %v2330_v54  ;;  %v2336_v61 = vmul.f32 1.442695, %v5540_v55  ;;  %vm2327_vm11 = vcmp.gt.f32.partialorder %v5540_v55, 0.0  ;;  %v6090_v53 = vld [vmem:[#allocation9 + $0xe0] ss:$12 sps:$4 sm:$0xff]  }
 0x3d8   :  { %6312 = vpow2.f32 %v2332_v58  ;;  %v2338_v62 = vmul.f32 1.442695, %v5541_v60  ;;  %vm2328_vm13 = vcmp.gt.f32.partialorder %v5541_v60, 0.0  ;;  %v6078_v54 = vld [vmem:[#allocation9 + $0x94] ss:$12 sps:$4 sm:$0xff]  }
 0x3d9   :  { %6314 = vpow2.f32 %v2336_v61  ;;  %v6081_v56 = vld [vmem:[#allocation9 + $0xac] ss:$12 sps:$4 sm:$0xff]   ;;  %v6079_v58 = vld [vmem:[#allocation9 + $0xa8] ss:$12 sps:$4 sm:$0xff]  }
 0x3da   :  { %6316 = vpow2.f32 %v2338_v62  ;;  %v6082_v61 = vld [vmem:[#allocation9 + $0xc0] ss:$12 sps:$4 sm:$0xff]   ;;  %v6089_v62 = vld [vmem:[#allocation9 + $0xdc] ss:$12 sps:$4 sm:$0xff]  }
 0x3e1   :  { %v6311_v51 = vpop.eup %6310 }
 0x3e2   :  { %v6313_v40 = vpop.eup %6312  ;;  %v5014_v59 = vadd.f32 -1.0, %v6311_v51  ;;  %v6087_v51 = vld [vmem:[#allocation9 + $0xd8] ss:$12 sps:$4 sm:$0xff]  }
 0x3e3   :  { %v6315_v63 = vpop.eup %6314  ;;  %v5015_v1 = vadd.f32 -1.0, %v6313_v40  ;;  %v6091_v40 = vld [vmem:[#allocation9 + $0x20] ss:$12 sps:$4 sm:$0xff]  }
 0x3e4   :  { %v6317_v2 = vpop.eup %6316  ;;  %v5017_v3 = vadd.f32 -1.0, %v6315_v63  ;;  %v2348_v5 = vsel %vm2324_vm10, %v5538_v49, %v5014_v59  ;;  %v6085_v49 = vld [vmem:[#allocation9 + $0xc8] ss:$12 sps:$4 sm:$0xff]   ;;  %v6095_v63 = vld [vmem:[#allocation9 + $0xf8] ss:$12 sps:$4 sm:$0xff]  }
 0x3e5   :  { %v5018_v4 = vadd.f32 -1.0, %v6317_v2  ;;  %v2349_v8 = vsel %vm2325_vm12, %v5539_v52, %v5015_v1  ;;  %v6075_v52 = vld [vmem:[#allocation9 + $0x7c] ss:$12 sps:$4 sm:$0xff]   ;;  %v6094_v59 = vld [vmem:[#allocation9 + $0xf4] ss:$12 sps:$4 sm:$0xff]  }
 0x3e6   :  { %v2351_v6 = vsel %vm2327_vm11, %v5540_v55, %v5017_v3  ;;  %v6076_v55 = vld [vmem:[#allocation9 + $0x90] ss:$12 sps:$4 sm:$0xff]   ;;  %v6096_v2 = vld [vmem:[#allocation9 + $0x38] ss:$12 sps:$4 sm:$0xff]  }
 0x3e7   :  { %v2354_v7 = vpack.c.bf16 %v2351_v6, %v2348_v5  ;;  %v2352_v9 = vsel %vm2328_vm13, %v5541_v60, %v5018_v4  ;;  %v6084_v60 = vld [vmem:[#allocation9 + $0xc4] ss:$12 sps:$4 sm:$0xff]   ;;  %v6099_v3 = vld [vmem:[#allocation9 + $0x10c] ss:$12 sps:$4 sm:$0xff]   ;;  %v6097_v5 = vld [vmem:[#allocation9 + $0x108] ss:$12 sps:$4 sm:$0xff]  }
 0x3e8   :  { %v2355_v10 = vpack.c.bf16 %v2352_v9, %v2349_v8  ;;  %v6092_v1 = vld [vmem:[#allocation9 + $0xf0] ss:$12 sps:$4 sm:$0xff]   ;;  %v6105_v8 = vld [vmem:[#allocation9 + $0x128] ss:$12 sps:$4 sm:$0xff]   ;;  %v6102_v9 = vld [vmem:[#allocation9 + $0x120] ss:$12 sps:$4 sm:$0xff]  }
 0x3e9   :  { %v6100_v4 = vld [vmem:[#allocation9 + $0x110] ss:$12 sps:$4 sm:$0xff]  }
 0x3ea   :  { %2886 = vmatprep.mubr.bf16.mxu1 %v2355_v10  ;;  %2972 = vmatprep.mubr.bf16.mxu0 %v2355_v10  ;;  %v6101_v6 = vld [vmem:[#allocation9 + $0x50] ss:$12 sps:$4 sm:$0xff]   ;;  %v6106_v10 = vld [vmem:[#allocation9 + $0x68] ss:$12 sps:$4 sm:$0xff]  }
 0x3eb   :  { %2887 = vmatmul.mubr.bf16.vlgmr.msra.gmra.mrb[16].mxu1 %v2354_v7  ;;  %2973 = vmatmul.mubr.bf16.vlgmr.msra.gmra.mrb[12].mxu0 %v2354_v7  ;;  %v6104_v7 = vld [vmem:[#allocation9 + $0x124] ss:$12 sps:$4 sm:$0xff]  }
 0x3ec   :  { %2898 = vmatpush1.bf16.msra.mxu1 %v6026_v11  ;;  %5451 = vmatpush3.bf16.msra.mxu0 %v6029_v12  ;;  %v6109_v11 = vld [vmem:[#allocation9 + $0x13c] ss:$12 sps:$4 sm:$0xff]   ;;  %v6110_v12 = vld [vmem:[#allocation9 + $0x140] ss:$12 sps:$4 sm:$0xff]  }
 0x3ed   :  { %2899 = vmatprep.subr.bf16.mxu1 %v6032_v13  ;;  %5452 = vmatprep.subr.bf16.mxu0 %v6530_v15  ;;  %v6107_v13 = vld [vmem:[#allocation9 + $0x138] ss:$12 sps:$4 sm:$0xff]  }
 0x3ee   :  { %2929 = vmatprep.mubr.bf16.mxu1 %v6529_v0  ;;  %5466 = vmatprep.mubr.msk.bf16.mxu0 %vm6531_vm14, %v6530_v15 }
 0x3f0   :  { %2900 = vmatpush1.bf16.msra.mxu1 %v6030_v14  ;;  %5453 = vmatpush3.bf16.msra.mxu0 %v6033_v16  ;;  %v6111_v14 = vld [vmem:[#allocation9 + $0x80] ss:$12 sps:$4 sm:$0xff]  }
 0x3f1   :  { %2901 = vmatprep.subr.bf16.mxu1 %v6036_v17  ;;  %5454 = vmatprep.subr.bf16.mxu0 %v6530_v15  ;;  %v6114_v16 = vld [vmem:[#allocation9 + $0x154] ss:$12 sps:$4 sm:$0xff]   ;;  %v6115_v17 = vld [vmem:[#allocation9 + $0x158] ss:$12 sps:$4 sm:$0xff]  }
 0x3f4   :  { %2902 = vmatpush1.bf16.msra.mxu1 %v6034_v18  ;;  %5455 = vmatpush3.bf16.msra.mxu0 %v6037_v19  ;;  %v6112_v18 = vld [vmem:[#allocation9 + $0x150] ss:$12 sps:$4 sm:$0xff]   ;;  %v6116_v19 = vld [vmem:[#allocation9 + $0x98] ss:$12 sps:$4 sm:$0xff]  }
 0x3f5   :  { %2903 = vmatprep.subr.bf16.mxu1 %v6040_v20  ;;  %5456 = vmatprep.subr.bf16.mxu0 %v6530_v15  ;;  %v6119_v20 = vld [vmem:[#allocation9 + $0x16c] ss:$12 sps:$4 sm:$0xff]  }
 0x3f8   :  { %2904 = vmatpush1.bf16.msra.mxu1 %v6038_v21  ;;  %5457 = vmatpush3.bf16.msra.mxu0 %v6041_v22  ;;  %v6120_v21 = vld [vmem:[#allocation9 + $0x170] ss:$12 sps:$4 sm:$0xff]   ;;  %v6117_v22 = vld [vmem:[#allocation9 + $0x168] ss:$12 sps:$4 sm:$0xff]  }
 0x3f9   :  { %2905 = vmatprep.subr.bf16.mxu1 %v6044_v23  ;;  %5458 = vmatprep.subr.bf16.mxu0 %v6530_v15  ;;  %v6121_v23 = vld [vmem:[#allocation9 + $0xb0] ss:$12 sps:$4 sm:$0xff]  }
 0x3fc   :  { %2906 = vmatpush1.bf16.msra.mxu1 %v6042_v24  ;;  %5459 = vmatpush3.bf16.msra.mxu0 %v6045_v25  ;;  %v6124_v24 = vld [vmem:[#allocation9 + $0x184] ss:$12 sps:$4 sm:$0xff]  }
 0x3fd   :  { %2907 = vmatprep.subr.bf16.mxu1 %v6048_v26  ;;  %5460 = vmatprep.subr.bf16.mxu0 %v6530_v15 }
 0x400   :  { %2908 = vmatpush1.bf16.msra.mxu1 %v6046_v27  ;;  %5461 = vmatpush3.bf16.msra.mxu0 %v6049_v28 }
 0x401   :  { %2909 = vmatprep.subr.bf16.mxu1 %v6052_v29  ;;  %5462 = vmatprep.subr.bf16.mxu0 %v6530_v15 }
 0x404   :  { %2910 = vmatpush1.bf16.msra.mxu1 %v6050_v30  ;;  %5463 = vmatpush3.bf16.msra.mxu0 %v6053_v31  ;;  %v2453_v31 = vld [vmem:[%s6877_s8] sm:$0x7] }
 0x405   :  { %2911 = vmatprep.subr.bf16.mxu1 %v6056_v32  ;;  %5464 = vmatprep.subr.bf16.mxu0 %v6530_v15  ;;  %v2466_v32 = vrot.slane %v2453_v31, %v6736_v57 }
 0x408   :  { %2912 = vmatpush1.bf16.msra.mxu1 %v6054_v33  ;;  %5465 = vmatpush3.bf16.msra.mxu0 %v6057_v34  ;;  %v2458_v33 = vrot.slane %v2453_v31, %v6725_v41  ;;  %v2462_v34 = vrot.slane %v2453_v31, %v6731_v43  ;;  %v6130_v31 = vld [vmem:[#allocation9 + $0x1b0] ss:$12 sps:$4 sm:$0xff]  }
 0x409   :  { %3552 = vmatprep.subr.bf16.mxu1 %v6060_v35  ;;  %5357 = vmatprep.subr.bf16.mxu0 %v6085_v49 }
 0x40b   :  { %2930 = vmatmul.mubr.bf16.vlgmr.msra.gmra.mrb[16].mxu1 %v6789_v47  ;;  %5467 = vmatmul.mubr.bf16.vlgmr.msra.gmra.mrb[16].mxu0 %v6789_v47  ;;  %v6073_v47 = vld [vmem:[#allocation9 + $0x78] ss:$12 sps:$4 sm:$0xff]  }
 0x40c   :  { %3553 = vmatpush1.bf16.msra.mxu1 %v6058_v36  ;;  %5358 = vmatpush3.bf16.msra.mxu0 %v6086_v50 }
 0x40d   :  { %3554 = vmatprep.subr.bf16.mxu1 %v6063_v37  ;;  %5359 = vmatprep.subr.bf16.mxu0 %v6090_v53 }
 0x410   :  { %3555 = vmatpush1.bf16.msra.mxu1 %v6061_v38  ;;  %5360 = vmatpush3.bf16.msra.mxu0 %v6091_v40 }
 0x411   :  { %3556 = vmatprep.subr.bf16.mxu1 %v6066_v39  ;;  %5361 = vmatprep.subr.bf16.mxu0 %v6095_v63 }
 0x414   :  { %3557 = vmatpush1.bf16.msra.mxu1 %v6064_v42  ;;  %5362 = vmatpush3.bf16.msra.mxu0 %v6096_v2 }
 0x415   :  { %3558 = vmatprep.subr.bf16.mxu1 %v6069_v45  ;;  %5363 = vmatprep.subr.bf16.mxu0 %v6100_v4 }
 0x418   :  { %3559 = vmatpush1.bf16.msra.mxu1 %v6067_v44  ;;  %5364 = vmatpush3.bf16.msra.mxu0 %v6101_v6 }
 0x419   :  { %3560 = vmatprep.subr.bf16.mxu1 %v6072_v46  ;;  %5365 = vmatprep.subr.bf16.mxu0 %v6105_v8 }
 0x41c   :  { %3561 = vmatpush1.bf16.msra.mxu1 %v6070_v48  ;;  %5366 = vmatpush3.bf16.msra.mxu0 %v6106_v10 }
 0x41d   :  { %3562 = vmatprep.subr.bf16.mxu1 %v6075_v52  ;;  %5367 = vmatprep.subr.bf16.mxu0 %v6110_v12 }
 0x420   :  { %3563 = vmatpush1.bf16.msra.mxu1 %v6073_v47  ;;  %5368 = vmatpush3.bf16.msra.mxu0 %v6111_v14 }
 0x421   :  { %3564 = vmatprep.subr.bf16.mxu1 %v6078_v54  ;;  %5369 = vmatprep.subr.bf16.mxu0 %v6115_v17 }
 0x424   :  { %3565 = vmatpush1.bf16.msra.mxu1 %v6076_v55  ;;  %5370 = vmatpush3.bf16.msra.mxu0 %v6116_v19 }
 0x425   :  { %3566 = vmatprep.subr.bf16.mxu1 %v6081_v56  ;;  %5371 = vmatprep.subr.bf16.mxu0 %v6120_v21 }
 0x428   :  { %3567 = vmatpush1.bf16.msra.mxu1 %v6079_v58  ;;  %5372 = vmatpush3.bf16.msra.mxu0 %v6121_v23 }
 0x429   :  { %3568 = vmatprep.subr.bf16.mxu1 %v6084_v60  ;;  %5470 = vmatprep.subr.bf16.mxu0 %v6530_v15 }
 0x42c   :  { %3569 = vmatpush1.bf16.msra.mxu1 %v6082_v61 }
 0x42d   :  { %3570 = vmatprep.subr.bf16.mxu1 %v6089_v62 }
 0x430   :  { %3571 = vmatpush1.bf16.msra.mxu1 %v6087_v51 }
 0x431   :  { %3572 = vmatprep.subr.bf16.mxu1 %v6094_v59 }
 0x434   :  { %3573 = vmatpush1.bf16.msra.mxu1 %v6092_v1 }
 0x435   :  { %3574 = vmatprep.subr.bf16.mxu1 %v6099_v3 }
 0x438   :  { %3575 = vmatpush1.bf16.msra.mxu1 %v6097_v5 }
 0x439   :  { %3576 = vmatprep.subr.bf16.mxu1 %v6104_v7 }
 0x43c   :  { %3577 = vmatpush1.bf16.msra.mxu1 %v6102_v9 }
 0x43d   :  { %3578 = vmatprep.subr.bf16.mxu1 %v6109_v11 }
 0x440   :  { %3579 = vmatpush1.bf16.msra.mxu1 %v6107_v13 }
 0x441   :  { %3580 = vmatprep.subr.bf16.mxu1 %v6114_v16 }
 0x444   :  { %3581 = vmatpush1.bf16.msra.mxu1 %v6112_v18 }
 0x445   :  { %3582 = vmatprep.subr.bf16.mxu1 %v6119_v20 }
 0x448   :  { %3583 = vmatpush1.bf16.msra.mxu1 %v6117_v22 }
 0x449   :  { %3595 = vmatprep.subr.bf16.mxu1 %v6124_v24 }
 0x4be   :  { %v5342_v25 = vpop.f32.mrb[12].mxu0 }
 0x4bf   :  { %v5343_v26 = vpop.f32.mrb[13].mxu0 }
 0x4c0   :  { %v5344_v27 = vadd.f32 %v5343_v26, %v5342_v25  ;;  %v5345_v28 = vpop.f32.mrb[14].mxu0  ;;  %v6122_v25 = vld [vmem:[#allocation9 + $0x180] ss:$12 sps:$4 sm:$0xff]   ;;  %v6125_v26 = vld [vmem:[#allocation9 + $0x188] ss:$12 sps:$4 sm:$0xff]  }
 0x4c1   :  { %v5346_v29 = vpop.f32.mrb[15].mxu0 }
 0x4c2   :  { %v5347_v30 = vadd.f32 %v5346_v29, %v5345_v28  ;;  %v2975_v35 = vadd.f32 %v5344_v27, %v2466_v32  ;;  %v6128_v27 = vld [vmem:[#allocation9 + $0x19c] ss:$12 sps:$4 sm:$0xff]   ;;  %v6126_v28 = vld [vmem:[#allocation9 + $0x198] ss:$12 sps:$4 sm:$0xff]   ;;  %v6129_v29 = vld [vmem:[#allocation9 + $0x1a0] ss:$12 sps:$4 sm:$0xff]  }
 0x4c4   :  { %v2978_v45 = vadd.f32 %v5347_v30, %v2466_v32  ;;  %v6132_v30 = vld [vmem:[#allocation9 + $0x1b4] ss:$12 sps:$4 sm:$0xff]   ;;  %v6133_v32 = vld [vmem:[#allocation9 + $0x1b8] ss:$12 sps:$4 sm:$0xff]  }
 0x4de   :  { %v2931_v36 = vpop.f32.mrb[16].mxu1  ;;  %v3015_v37 = vpop.f32.mrb[16].mxu0 }
 0x4df   :  { %v5542_v38 = vadd.f32 %v2931_v36, %v2458_v33  ;;  %v3016_v39 = vadd.f32 %v3015_v37, %v2975_v35  ;;  %v2933_v42 = vpop.f32.mrb[17].mxu1  ;;  %v5468_v44 = vpop.f32.mrb[17].mxu0  ;;  %v6137_v35 = vld [vmem:[#allocation9 + $0x1d0] ss:$12 sps:$4 sm:$0xff]   ;;  %v6138_v37 = vld [vmem:[#allocation9 + $0x1e0] ss:$12 sps:$4 sm:$0xff]  }
 0x4e0   :  { %v5543_v46 = vadd.f32 %v2933_v42, %v2462_v34  ;;  %v2935_v48 = vpop.f32.mrb[18].mxu1  ;;  %v3018_v49 = vpop.f32.mrb[18].mxu0  ;;  %v6140_v36 = vld [vmem:[#allocation9 + $0x1e4] ss:$12 sps:$4 sm:$0xff]   ;;  %v6145_v44 = vld [vmem:[#allocation9 + $0x200] ss:$12 sps:$4 sm:$0xff]  }
 0x4e1   :  { %v3022_v50 = vmul.f32 0.5, %v5542_v38  ;;  %v3024_v52 = vmul.f32 0.5, %v3016_v39  ;;  %v5544_v53 = vadd.f32 %v2935_v48, %v2458_v33  ;;  %v3019_v47 = vadd.f32 %v3018_v49, %v2978_v45  ;;  %v2937_v54 = vpop.f32.mrb[19].mxu1  ;;  %v5469_v55 = vpop.f32.mrb[19].mxu0  ;;  %v6136_v33 = vld [vmem:[#allocation9 + $0x1cc] ss:$12 sps:$4 sm:$0xff]  }
 0x4e2   :  { %v3023_v56 = vmul.f32 0.5, %v5543_v46  ;;  %v5545_v58 = vadd.f32 %v2937_v54, %v2462_v34  ;;  %v6134_v34 = vld [vmem:[#allocation9 + $0x1c8] ss:$12 sps:$4 sm:$0xff]   ;;  %v6142_v42 = vld [vmem:[#allocation9 + $0x1f8] ss:$12 sps:$4 sm:$0xff]  }
 0x4e3   :  { %6318 = vtanh.f32 %v3022_v50  ;;  %v3025_v60 = vmul.f32 0.5, %v5544_v53  ;;  %v3027_v61 = vmul.f32 0.5, %v3019_v47  ;;  %v6148_v45 = vld [vmem:[#allocation9 + $0x214] ss:$12 sps:$4 sm:$0xff]   ;;  %v6149_v48 = vld [vmem:[#allocation9 + $0x218] ss:$12 sps:$4 sm:$0xff]  }
 0x4e4   :  { %6320 = vtanh.f32 %v3024_v52  ;;  %v3026_v62 = vmul.f32 0.5, %v5545_v58  ;;  %v6152_v49 = vld [vmem:[#allocation9 + $0x22c] ss:$12 sps:$4 sm:$0xff]   ;;  %v6150_v50 = vld [vmem:[#allocation9 + $0x228] ss:$12 sps:$4 sm:$0xff]  }
 0x4e5   :  { %6322 = vtanh.f32 %v3023_v56  ;;  %v6153_v52 = vld [vmem:[#allocation9 + $0x230] ss:$12 sps:$4 sm:$0xff]   ;;  %v6157_v55 = vld [vmem:[#allocation10 + $0x18] ss:$12 sps:$4 sm:$0xff]   ;;  %v6162_v56 = vld [vmem:[#allocation10 + $0x34] ss:$12 sps:$4 sm:$0xff]  }
 0x4e6   :  { %6324 = vtanh.f32 %v3025_v60  ;;  %v6159_v54 = vld [vmem:[#allocation10 + $0x1c] ss:$12 sps:$4 sm:$0xff]   ;;  %v6165_v60 = vld [vmem:[#allocation10 + $0x4c] ss:$12 sps:$4 sm:$0xff]  }
 0x4e7   :  { %6326 = vtanh.f32 %v3027_v61  ;;  %v6163_v61 = vld [vmem:[#allocation10 + $0x48] ss:$12 sps:$4 sm:$0xff]  }
 0x4e8   :  { %6328 = vtanh.f32 %v3026_v62  ;;  %v6168_v62 = vld [vmem:[#allocation10 + $0x64] ss:$12 sps:$4 sm:$0xff]  }
 0x4ed   :  { %v6319_v51 = vpop.eup %6318 }
 0x4ee   :  { %v6321_v40 = vpop.eup %6320  ;;  %v3034_v59 = vadd.f32 1.0, %v6319_v51  ;;  %v6166_v51 = vld [vmem:[#allocation10 + $0x60] ss:$12 sps:$4 sm:$0xff]  }
 0x4ef   :  { %v6323_v63 = vpop.eup %6322  ;;  %v3036_v1 = vadd.f32 1.0, %v6321_v40  ;;  %v6171_v40 = vld [vmem:[#allocation10 + $0x7c] ss:$12 sps:$4 sm:$0xff]  }
 0x4f0   :  { %v6325_v2 = vpop.eup %6324  ;;  %v3035_v3 = vadd.f32 1.0, %v6323_v63  ;;  %v3040_v5 = vmul.f32 0.5, %v3034_v59  ;;  %v6181_v59 = vld [vmem:[#allocation10 + $0xc8] ss:$12 sps:$4 sm:$0xff]  }
 0x4f1   :  { %v6327_v4 = vpop.eup %6326  ;;  %v3037_v6 = vadd.f32 1.0, %v6325_v2  ;;  %v3042_v8 = vmul.f32 0.5, %v3036_v1  ;;  %v6182_v63 = vld [vmem:[#allocation10 + $0x8] ss:$12 sps:$4 sm:$0xff]   ;;  %v6186_v1 = vld [vmem:[#allocation10 + $0xe0] ss:$12 sps:$4 sm:$0xff]  }
 0x4f2   :  { %v6329_v7 = vpop.eup %6328  ;;  %v3039_v9 = vadd.f32 1.0, %v6327_v4  ;;  %v3041_v10 = vmul.f32 0.5, %v3035_v3  ;;  %v3046_v14 = vmul.f32 %v5542_v38, %v3040_v5  ;;  %v6141_v38 = vld [vmem:[#allocation9 + $0x1e8] ss:$12 sps:$4 sm:$0xff]   ;;  %v6169_v2 = vld [vmem:[#allocation10 + $0x78] ss:$12 sps:$4 sm:$0xff]  }
 0x4f3   :  { %v3043_v11 = vmul.f32 0.5, %v3037_v6  ;;  %v3038_v12 = vadd.f32 1.0, %v6329_v7  ;;  %v3048_v18 = vmul.f32 %v3042_v8, %v3016_v39  ;;  %v6144_v39 = vld [vmem:[#allocation9 + $0x1fc] ss:$12 sps:$4 sm:$0xff]   ;;  %v6174_v3 = vld [vmem:[#allocation10 + $0x94] ss:$12 sps:$4 sm:$0xff]  }
 0x4f4   :  { %v3045_v13 = vmul.f32 0.5, %v3039_v9  ;;  %v3047_v20 = vmul.f32 %v5543_v46, %v3041_v10  ;;  %v6146_v46 = vld [vmem:[#allocation9 + $0x210] ss:$12 sps:$4 sm:$0xff]   ;;  %v6187_v4 = vld [vmem:[#allocation10 + $0x20] ss:$12 sps:$4 sm:$0xff]  }
 0x4f5   :  { %v3049_v16 = vmul.f32 %v5544_v53, %v3043_v11  ;;  %v3044_v17 = vmul.f32 0.5, %v3038_v12  ;;  %v6156_v53 = vld [vmem:[#allocation10 + $0x4] ss:$12 sps:$4 sm:$0xff]   ;;  %v6177_v6 = vld [vmem:[#allocation10 + $0xac] ss:$12 sps:$4 sm:$0xff]  }
 0x4f6   :  { %v3051_v19 = vmul.f32 %v3045_v13, %v3019_v47  ;;  %v6154_v47 = vld [vmem:[#allocation10] ss:$12 sps:$4 sm:$0xff]   ;;  %v6172_v5 = vld [vmem:[#allocation10 + $0x90] ss:$12 sps:$4 sm:$0xff]   ;;  %v6175_v7 = vld [vmem:[#allocation10 + $0xa8] ss:$12 sps:$4 sm:$0xff]  }
 0x4f7   :  { %v3052_v21 = vpack.c.bf16 %v3049_v16, %v3046_v14  ;;  %v3050_v22 = vmul.f32 %v5545_v58, %v3044_v17  ;;  %v6160_v58 = vld [vmem:[#allocation10 + $0x30] ss:$12 sps:$4 sm:$0xff]   ;;  %v6178_v9 = vld [vmem:[#allocation10 + $0xc0] ss:$12 sps:$4 sm:$0xff]   ;;  %v6183_v11 = vld [vmem:[#allocation10 + $0xd8] ss:$12 sps:$4 sm:$0xff]  }
 0x4f8   :  { %v6812_v23 = vpack.c.bf16 %v3051_v19, %v3048_v18  ;;  %v6180_v8 = vld [vmem:[#allocation10 + $0xc4] ss:$12 sps:$4 sm:$0xff]   ;;  %v6185_v10 = vld [vmem:[#allocation10 + $0xdc] ss:$12 sps:$4 sm:$0xff]   ;;  %v6190_v12 = vld [vmem:[#allocation10 + $0xf4] ss:$12 sps:$4 sm:$0xff]  }
 0x4f9   :  { %v3053_v24 = vpack.c.bf16 %v3050_v22, %v3047_v20  ;;  %v6191_v13 = vld [vmem:[#allocation10 + $0xf8] ss:$12 sps:$4 sm:$0xff]   ;;  %v6188_v14 = vld [vmem:[#allocation10 + $0xf0] ss:$12 sps:$4 sm:$0xff]   ;;  %v6193_v19 = vld [vmem:[#allocation10 + $0x108] ss:$12 sps:$4 sm:$0xff]  }
 0x4fa   :  { %v6192_v16 = vld [vmem:[#allocation10 + $0x38] ss:$12 sps:$4 sm:$0xff]   ;;  %v6196_v18 = vld [vmem:[#allocation10 + $0x110] ss:$12 sps:$4 sm:$0xff]   ;;  %v6201_v22 = vld [vmem:[#allocation10 + $0x128] ss:$12 sps:$4 sm:$0xff]  }
 0x4fb   :  { %3584 = vmatprep.mubr.bf16.mxu1 %v3053_v24  ;;  %3670 = vmatprep.mubr.bf16.mxu0 %v3053_v24  ;;  %v6195_v17 = vld [vmem:[#allocation10 + $0x10c] ss:$12 sps:$4 sm:$0xff]   ;;  %v6197_v20 = vld [vmem:[#allocation10 + $0x50] ss:$12 sps:$4 sm:$0xff]   ;;  %v6202_v24 = vld [vmem:[#allocation10 + $0x68] ss:$12 sps:$4 sm:$0xff]  }
 0x4fc   :  { %3585 = vmatmul.mubr.bf16.vlgmr.msra.gmra.mrb[20].mxu1 %v3052_v21  ;;  %3671 = vmatmul.mubr.bf16.vlgmr.msra.gmra.mrb[20].mxu0 %v3052_v21  ;;  %v6200_v21 = vld [vmem:[#allocation10 + $0x124] ss:$12 sps:$4 sm:$0xff]  }
 0x4fd   :  { %3596 = vmatpush1.bf16.msra.mxu1 %v6122_v25  ;;  %5471 = vmatpush3.bf16.msra.mxu0 %v6125_v26  ;;  %v6205_v25 = vld [vmem:[#allocation10 + $0x13c] ss:$12 sps:$4 sm:$0xff]   ;;  %v6206_v26 = vld [vmem:[#allocation10 + $0x140] ss:$12 sps:$4 sm:$0xff]  }
 0x4fe   :  { %3597 = vmatprep.subr.bf16.mxu1 %v6128_v27  ;;  %5472 = vmatprep.subr.bf16.mxu0 %v6530_v15  ;;  %v6203_v27 = vld [vmem:[#allocation10 + $0x138] ss:$12 sps:$4 sm:$0xff]  }
 0x4ff   :  { %3627 = vmatprep.mubr.bf16.mxu1 %v6529_v0  ;;  %5486 = vmatprep.mubr.msk.bf16.mxu0 %vm6531_vm14, %v6530_v15 }
 0x501   :  { %3598 = vmatpush1.bf16.msra.mxu1 %v6126_v28  ;;  %5473 = vmatpush3.bf16.msra.mxu0 %v6129_v29  ;;  %v6207_v28 = vld [vmem:[#allocation10 + $0x80] ss:$12 sps:$4 sm:$0xff]  }
 0x502   :  { %3599 = vmatprep.subr.bf16.mxu1 %v6132_v30  ;;  %5474 = vmatprep.subr.bf16.mxu0 %v6530_v15  ;;  %v6210_v29 = vld [vmem:[#allocation10 + $0x154] ss:$12 sps:$4 sm:$0xff]   ;;  %v6211_v30 = vld [vmem:[#allocation10 + $0x158] ss:$12 sps:$4 sm:$0xff]  }
 0x505   :  { %3600 = vmatpush1.bf16.msra.mxu1 %v6130_v31  ;;  %5475 = vmatpush3.bf16.msra.mxu0 %v6133_v32  ;;  %v6208_v31 = vld [vmem:[#allocation10 + $0x150] ss:$12 sps:$4 sm:$0xff]   ;;  %v6212_v32 = vld [vmem:[#allocation10 + $0x98] ss:$12 sps:$4 sm:$0xff]  }
 0x506   :  { %3601 = vmatprep.subr.bf16.mxu1 %v6136_v33  ;;  %5476 = vmatprep.subr.bf16.mxu0 %v6530_v15  ;;  %v6215_v33 = vld [vmem:[#allocation10 + $0x16c] ss:$12 sps:$4 sm:$0xff]  }
 0x509   :  { %3602 = vmatpush1.bf16.msra.mxu1 %v6134_v34  ;;  %5477 = vmatpush3.bf16.msra.mxu0 %v6137_v35  ;;  %v6216_v34 = vld [vmem:[#allocation10 + $0x170] ss:$12 sps:$4 sm:$0xff]   ;;  %v6213_v35 = vld [vmem:[#allocation10 + $0x168] ss:$12 sps:$4 sm:$0xff]  }
 0x50a   :  { %3603 = vmatprep.subr.bf16.mxu1 %v6140_v36  ;;  %5478 = vmatprep.subr.bf16.mxu0 %v6530_v15  ;;  %v6217_v36 = vld [vmem:[#allocation10 + $0xb0] ss:$12 sps:$4 sm:$0xff]  }
 0x50d   :  { %3604 = vmatpush1.bf16.msra.mxu1 %v6138_v37  ;;  %5479 = vmatpush3.bf16.msra.mxu0 %v6141_v38  ;;  %v6220_v37 = vld [vmem:[#allocation10 + $0x184] ss:$12 sps:$4 sm:$0xff]  }
 0x50e   :  { %3605 = vmatprep.subr.bf16.mxu1 %v6144_v39  ;;  %5480 = vmatprep.subr.bf16.mxu0 %v6530_v15 }
 0x511   :  { %3606 = vmatpush1.bf16.msra.mxu1 %v6142_v42  ;;  %5481 = vmatpush3.bf16.msra.mxu0 %v6145_v44 }
 0x512   :  { %3607 = vmatprep.subr.bf16.mxu1 %v6148_v45  ;;  %5482 = vmatprep.subr.bf16.mxu0 %v6530_v15 }
 0x515   :  { %3608 = vmatpush1.bf16.msra.mxu1 %v6146_v46  ;;  %5483 = vmatpush3.bf16.msra.mxu0 %v6149_v48  ;;  %v3151_v48 = vld [vmem:[%s6879_s10] sm:$0x7] }
 0x516   :  { %3609 = vmatprep.subr.bf16.mxu1 %v6152_v49  ;;  %5484 = vmatprep.subr.bf16.mxu0 %v6530_v15  ;;  %v3164_v49 = vrot.slane %v3151_v48, %v6736_v57 }
 0x519   :  { %3610 = vmatpush1.bf16.msra.mxu1 %v6150_v50  ;;  %5485 = vmatpush3.bf16.msra.mxu0 %v6153_v52  ;;  %v3156_v50 = vrot.slane %v3151_v48, %v6725_v41  ;;  %v3160_v52 = vrot.slane %v3151_v48, %v6731_v43  ;;  %v6237_v48 = vld [vmem:[#allocation10 + $0x1e8] ss:$12 sps:$4 sm:$0xff]  }
 0x51a   :  { %4250 = vmatprep.subr.bf16.mxu0 %v6156_v53  ;;  %5388 = vmatprep.subr.bf16.mxu1 %v6181_v59 }
 0x51c   :  { %3628 = vmatmul.mubr.bf16.vlgmr.msra.gmra.mrb[20].mxu1 %v6812_v23  ;;  %5487 = vmatmul.mubr.bf16.vlgmr.msra.gmra.mrb[24].mxu0 %v6812_v23  ;;  %v6198_v23 = vld [vmem:[#allocation10 + $0x120] ss:$12 sps:$4 sm:$0xff]  }
 0x51d   :  { %4251 = vmatpush1.bf16.msra.mxu0 %v6154_v47  ;;  %5389 = vmatpush3.bf16.msra.mxu1 %v6182_v63 }
 0x51e   :  { %4252 = vmatprep.subr.bf16.mxu0 %v6159_v54  ;;  %5390 = vmatprep.subr.bf16.mxu1 %v6186_v1 }
 0x521   :  { %4253 = vmatpush1.bf16.msra.mxu0 %v6157_v55  ;;  %5391 = vmatpush3.bf16.msra.mxu1 %v6187_v4 }
 0x522   :  { %4254 = vmatprep.subr.bf16.mxu0 %v6162_v56  ;;  %5392 = vmatprep.subr.bf16.mxu1 %v6191_v13 }
 0x525   :  { %4255 = vmatpush1.bf16.msra.mxu0 %v6160_v58  ;;  %5393 = vmatpush3.bf16.msra.mxu1 %v6192_v16 }
 0x526   :  { %4256 = vmatprep.subr.bf16.mxu0 %v6165_v60  ;;  %5394 = vmatprep.subr.bf16.mxu1 %v6196_v18 }
 0x529   :  { %4257 = vmatpush1.bf16.msra.mxu0 %v6163_v61  ;;  %5395 = vmatpush3.bf16.msra.mxu1 %v6197_v20 }
 0x52a   :  { %4258 = vmatprep.subr.bf16.mxu0 %v6168_v62  ;;  %5396 = vmatprep.subr.bf16.mxu1 %v6201_v22 }
 0x52d   :  { %4259 = vmatpush1.bf16.msra.mxu0 %v6166_v51  ;;  %5397 = vmatpush3.bf16.msra.mxu1 %v6202_v24 }
 0x52e   :  { %4260 = vmatprep.subr.bf16.mxu0 %v6171_v40  ;;  %5398 = vmatprep.subr.bf16.mxu1 %v6206_v26 }
 0x531   :  { %4261 = vmatpush1.bf16.msra.mxu0 %v6169_v2  ;;  %5399 = vmatpush3.bf16.msra.mxu1 %v6207_v28 }
 0x532   :  { %4262 = vmatprep.subr.bf16.mxu0 %v6174_v3  ;;  %5400 = vmatprep.subr.bf16.mxu1 %v6211_v30 }
 0x535   :  { %4263 = vmatpush1.bf16.msra.mxu0 %v6172_v5  ;;  %5401 = vmatpush3.bf16.msra.mxu1 %v6212_v32  ;;  %v6218_v32 = vld [vmem:[#allocation10 + $0x180] ss:$12 sps:$4 sm:$0xff]  }
 0x536   :  { %4264 = vmatprep.subr.bf16.mxu0 %v6177_v6  ;;  %5402 = vmatprep.subr.bf16.mxu1 %v6216_v34  ;;  %v6224_v34 = vld [vmem:[#allocation10 + $0x19c] ss:$12 sps:$4 sm:$0xff]  }
 0x539   :  { %4265 = vmatpush1.bf16.msra.mxu0 %v6175_v7  ;;  %5403 = vmatpush3.bf16.msra.mxu1 %v6217_v36  ;;  %v6225_v36 = vld [vmem:[#allocation10 + $0x1a0] ss:$12 sps:$4 sm:$0xff]  }
 0x53a   :  { %4266 = vmatprep.subr.bf16.mxu0 %v6180_v8  ;;  %5490 = vmatprep.subr.bf16.mxu1 %v6530_v15 }
 0x53d   :  { %4267 = vmatpush1.bf16.msra.mxu0 %v6178_v9 }
 0x53e   :  { %4268 = vmatprep.subr.bf16.mxu0 %v6185_v10 }
 0x541   :  { %4269 = vmatpush1.bf16.msra.mxu0 %v6183_v11 }
 0x542   :  { %4270 = vmatprep.subr.bf16.mxu0 %v6190_v12 }
 0x545   :  { %4271 = vmatpush1.bf16.msra.mxu0 %v6188_v14 }
 0x546   :  { %4272 = vmatprep.subr.bf16.mxu0 %v6195_v17 }
 0x549   :  { %4273 = vmatpush1.bf16.msra.mxu0 %v6193_v19 }
 0x54a   :  { %4274 = vmatprep.subr.bf16.mxu0 %v6200_v21 }
 0x54d   :  { %4275 = vmatpush1.bf16.msra.mxu0 %v6198_v23 }
 0x54e   :  { %4276 = vmatprep.subr.bf16.mxu0 %v6205_v25 }
 0x551   :  { %4277 = vmatpush1.bf16.msra.mxu0 %v6203_v27 }
 0x552   :  { %4278 = vmatprep.subr.bf16.mxu0 %v6210_v29 }
 0x555   :  { %4279 = vmatpush1.bf16.msra.mxu0 %v6208_v31 }
 0x556   :  { %4280 = vmatprep.subr.bf16.mxu0 %v6215_v33  ;;  %v6221_v33 = vld [vmem:[#allocation10 + $0x188] ss:$12 sps:$4 sm:$0xff]  }
 0x559   :  { %4281 = vmatpush1.bf16.msra.mxu0 %v6213_v35  ;;  %v6222_v35 = vld [vmem:[#allocation10 + $0x198] ss:$12 sps:$4 sm:$0xff]  }
 0x55a   :  { %4293 = vmatprep.subr.bf16.mxu0 %v6220_v37  ;;  %v6228_v37 = vld [vmem:[#allocation10 + $0x1b4] ss:$12 sps:$4 sm:$0xff]  }
 0x5cf   :  { %v5373_v38 = vpop.f32.mrb[20].mxu0 }
 0x5d0   :  { %v5374_v39 = vpop.f32.mrb[21].mxu0 }
 0x5d1   :  { %v5375_v42 = vadd.f32 %v5374_v39, %v5373_v38  ;;  %v5376_v44 = vpop.f32.mrb[22].mxu0  ;;  %v6226_v38 = vld [vmem:[#allocation10 + $0x1b0] ss:$12 sps:$4 sm:$0xff]   ;;  %v6229_v39 = vld [vmem:[#allocation10 + $0x1b8] ss:$12 sps:$4 sm:$0xff]  }
 0x5d2   :  { %v5377_v45 = vpop.f32.mrb[23].mxu0 }
 0x5d3   :  { %v5378_v46 = vadd.f32 %v5377_v45, %v5376_v44  ;;  %v3673_v53 = vadd.f32 %v5375_v42, %v3164_v49  ;;  %v6232_v42 = vld [vmem:[#allocation10 + $0x1cc] ss:$12 sps:$4 sm:$0xff]   ;;  %v6230_v44 = vld [vmem:[#allocation10 + $0x1c8] ss:$12 sps:$4 sm:$0xff]   ;;  %v6233_v45 = vld [vmem:[#allocation10 + $0x1d0] ss:$12 sps:$4 sm:$0xff]  }
 0x5d5   :  { %v3676_v51 = vadd.f32 %v5378_v46, %v3164_v49  ;;  %v6236_v46 = vld [vmem:[#allocation10 + $0x1e4] ss:$12 sps:$4 sm:$0xff]   ;;  %v6240_v49 = vld [vmem:[#allocation10 + $0x1fc] ss:$12 sps:$4 sm:$0xff]  }
 0x5ef   :  { %v3629_v47 = vpop.f32.mrb[20].mxu1  ;;  %v3713_v54 = vpop.f32.mrb[24].mxu0 }
 0x5f0   :  { %v5546_v55 = vadd.f32 %v3629_v47, %v3156_v50  ;;  %v3714_v56 = vadd.f32 %v3713_v54, %v3673_v53  ;;  %v3631_v58 = vpop.f32.mrb[21].mxu1  ;;  %v5488_v60 = vpop.f32.mrb[25].mxu0  ;;  %v6244_v53 = vld [vmem:[#allocation10 + $0x214] ss:$12 sps:$4 sm:$0xff]   ;;  %v6242_v47 = vld [vmem:[#allocation10 + $0x210] ss:$12 sps:$4 sm:$0xff]  }
 0x5f1   :  { %v5547_v61 = vadd.f32 %v3631_v58, %v3160_v52  ;;  %v3633_v62 = vpop.f32.mrb[22].mxu1  ;;  %v3716_v40 = vpop.f32.mrb[26].mxu0  ;;  %v6245_v54 = vld [vmem:[#allocation10 + $0x218] ss:$12 sps:$4 sm:$0xff]   ;;  %v6249_v58 = vld [vmem:[#allocation10 + $0x230] ss:$12 sps:$4 sm:$0xff]  }
 0x5f2   :  { %v3726_v59 = vmul.f32 1.442695, %v5546_v55  ;;  %v3730_v63 = vmul.f32 1.442695, %v3714_v56  ;;  %v5548_v2 = vadd.f32 %v3633_v62, %v3156_v50  ;;  %v3717_v3 = vadd.f32 %v3716_v40, %v3676_v51  ;;  %v3635_v4 = vpop.f32.mrb[23].mxu1  ;;  %v5489_v5 = vpop.f32.mrb[27].mxu0 }
 0x5f3   :  { %v3728_v1 = vmul.f32 1.442695, %v5547_v61  ;;  %v5549_v6 = vadd.f32 %v3635_v4, %v3160_v52  ;;  %vm3720_vm15 = vcmp.gt.f32.partialorder %v5546_v55, 0.0  ;;  %vm3722_vm0 = vcmp.gt.f32.partialorder %v3714_v56, 0.0  ;;  %v6238_v50 = vld [vmem:[#allocation10 + $0x1f8] ss:$12 sps:$4 sm:$0xff]  }
 0x5f4   :  { %6330 = vpow2.f32 %v3726_v59  ;;  %v3732_v7 = vmul.f32 1.442695, %v5548_v2  ;;  %v3736_v8 = vmul.f32 1.442695, %v3717_v3  ;;  %vm3721_vm1 = vcmp.gt.f32.partialorder %v5547_v61, 0.0  ;;  %v6250_v60 = vld [vmem:[#allocation12 + $0x80] sm:$0xff]  }
 0x5f5   :  { %6332 = vpow2.f32 %v3730_v63  ;;  %v3734_v9 = vmul.f32 1.442695, %v5549_v6  ;;  %vm3723_vm2 = vcmp.gt.f32.partialorder %v5548_v2, 0.0  ;;  %vm3725_vm3 = vcmp.gt.f32.partialorder %v3717_v3, 0.0  ;;  %v6241_v52 = vld [vmem:[#allocation10 + $0x200] ss:$12 sps:$4 sm:$0xff]  }
 0x5f6   :  { %6334 = vpow2.f32 %v3728_v1  ;;  %vm3724_vm4 = vcmp.gt.f32.partialorder %v5549_v6, 0.0  ;;  %v6252_v62 = vld [vmem:[#allocation12] sm:$0xff]   ;;  %v6254_v51 = vld [vmem:[#allocation12 + $0x48] sm:$0xff]   ;;  %v6256_v63 = vld [vmem:[#allocation12 + $0x90] sm:$0xff]  }
 0x5f7   :  { %6336 = vpow2.f32 %v3732_v7  ;;  %v6253_v40 = vld [vmem:[#allocation12 + $0x88] sm:$0xff]   ;;  %v6257_v1 = vld [vmem:[#allocation12 + $0x50] sm:$0xff]   ;;  %v6260_v4 = vld [vmem:[#allocation12 + $0x58] sm:$0xff]  }
 0x5f8   :  { %6338 = vpow2.f32 %v3736_v8  ;;  %v6255_v59 = vld [vmem:[#allocation12 + $0x8] sm:$0xff]   ;;  %v6261_v5 = vld [vmem:[#allocation12 + $0x18] sm:$0xff]   ;;  %v6263_v7 = vld [vmem:[#allocation12 + $0x60] sm:$0xff]  }
 0x5f9   :  { %6340 = vpow2.f32 %v3734_v9  ;;  %v6264_v8 = vld [vmem:[#allocation12 + $0x20] sm:$0xff]   ;;  %v6265_v9 = vld [vmem:[#allocation12 + $0xa8] sm:$0xff]  }
 0x5fe   :  { %v6331_v10 = vpop.eup %6330 }
 0x5ff   :  { %v6333_v11 = vpop.eup %6332  ;;  %v5164_v13 = vadd.f32 -1.0, %v6331_v10  ;;  %v6266_v10 = vld [vmem:[#allocation12 + $0x68] sm:$0xff]  }
 0x600   :  { %v6335_v12 = vpop.eup %6334  ;;  %v5166_v16 = vadd.f32 -1.0, %v6333_v11  ;;  %v6267_v11 = vld [vmem:[#allocation12 + $0x28] sm:$0xff]  }
 0x601   :  { %v6337_v14 = vpop.eup %6336  ;;  %v5165_v18 = vadd.f32 -1.0, %v6335_v12  ;;  %v3744_v22 = vsel %vm3720_vm15, %v5546_v55, %v5164_v13  ;;  %v6248_v55 = vld [vmem:[#allocation10 + $0x22c] ss:$12 sps:$4 sm:$0xff]   ;;  %v6268_v12 = vld [vmem:[#allocation12 + $0xb0] sm:$0xff]  }
 0x602   :  { %v6339_v17 = vpop.eup %6338  ;;  %v5167_v19 = vadd.f32 -1.0, %v6337_v14  ;;  %v3746_v25 = vsel %vm3722_vm0, %v3714_v56, %v5166_v16  ;;  %v6246_v56 = vld [vmem:[#allocation10 + $0x228] ss:$12 sps:$4 sm:$0xff]   ;;  %v6271_v16 = vld [vmem:[#allocation12 + $0xb8] sm:$0xff]  }
 0x603   :  { %v6341_v20 = vpop.eup %6340  ;;  %v5169_v21 = vadd.f32 -1.0, %v6339_v17  ;;  %v3745_v29 = vsel %vm3721_vm1, %v5547_v61, %v5165_v18  ;;  %v6251_v61 = vld [vmem:[#allocation12 + $0x40] sm:$0xff]   ;;  %v6269_v13 = vld [vmem:[#allocation12 + $0x70] sm:$0xff]   ;;  %v6272_v17 = vld [vmem:[#allocation12 + $0x78] sm:$0xff]  }
 0x604   :  { %v3747_v23 = vsel %vm3723_vm2, %v5548_v2, %v5167_v19  ;;  %v5168_v24 = vadd.f32 -1.0, %v6341_v20  ;;  %v6258_v2 = vld [vmem:[#allocation12 + $0x10] sm:$0xff]   ;;  %v6273_v18 = vld [vmem:[#allocation12 + $0x38] sm:$0xff]  }
 0x605   :  { %v3750_v26 = vpack.c.bf16 %v3747_v23, %v3744_v22  ;;  %v3749_v27 = vsel %vm3725_vm3, %v3717_v3, %v5169_v21  ;;  %v6259_v3 = vld [vmem:[#allocation12 + $0x98] sm:$0xff]   ;;  %v6270_v14 = vld [vmem:[#allocation12 + $0x30] sm:$0xff]  }
 0x606   :  { %v6833_v28 = vpack.c.bf16 %v3749_v27, %v3746_v25  ;;  %v3748_v30 = vsel %vm3724_vm4, %v5549_v6, %v5168_v24  ;;  %v6262_v6 = vld [vmem:[#allocation12 + $0xa0] sm:$0xff]  }
 0x607   :  { %v3751_v31 = vpack.c.bf16 %v3748_v30, %v3745_v29  ;;  %v3849_v25 = vld [vmem:[%s6881_s12] sm:$0x7] }
 0x608   :  { %v3858_v27 = vrot.slane %v3849_v25, %v6731_v43 }
 0x609   :  { %4282 = vmatprep.mubr.bf16.mxu0 %v3751_v31  ;;  %4368 = vmatprep.mubr.bf16.mxu1 %v3751_v31 }
 0x60a   :  { %4283 = vmatmul.mubr.bf16.vlgmr.msra.gmra.mrb[28].mxu0 %v3750_v26  ;;  %4369 = vmatmul.mubr.bf16.vlgmr.msra.gmra.mrb[24].mxu1 %v3750_v26  ;;  %v3862_v26 = vrot.slane %v3849_v25, %v6736_v57 }
 0x60b   :  { %4294 = vmatpush1.bf16.msra.mxu0 %v6218_v32  ;;  %5491 = vmatpush3.bf16.msra.mxu1 %v6221_v33 }
 0x60c   :  { %4295 = vmatprep.subr.bf16.mxu0 %v6224_v34  ;;  %5492 = vmatprep.subr.bf16.mxu1 %v6530_v15 }
 0x60d   :  { %4325 = vmatprep.mubr.bf16.mxu0 %v6529_v0  ;;  %5506 = vmatprep.mubr.msk.bf16.mxu1 %vm6531_vm14, %v6530_v15  ;;  %v6234_v0 = vld [vmem:[#allocation10 + $0x1e0] ss:$12 sps:$4 sm:$0xff]  }
 0x60f   :  { %4296 = vmatpush1.bf16.msra.mxu0 %v6222_v35  ;;  %5493 = vmatpush3.bf16.msra.mxu1 %v6225_v36 }
 0x610   :  { %4297 = vmatprep.subr.bf16.mxu0 %v6228_v37  ;;  %5494 = vmatprep.subr.bf16.mxu1 %v6530_v15 }
 0x613   :  { %4298 = vmatpush1.bf16.msra.mxu0 %v6226_v38  ;;  %5495 = vmatpush3.bf16.msra.mxu1 %v6229_v39 }
 0x614   :  { %4299 = vmatprep.subr.bf16.mxu0 %v6232_v42  ;;  %5496 = vmatprep.subr.bf16.mxu1 %v6530_v15 }
 0x617   :  { %4300 = vmatpush1.bf16.msra.mxu0 %v6230_v44  ;;  %5497 = vmatpush3.bf16.msra.mxu1 %v6233_v45 }
 0x618   :  { %4301 = vmatprep.subr.bf16.mxu0 %v6236_v46  ;;  %5498 = vmatprep.subr.bf16.mxu1 %v6530_v15 }
 0x61b   :  { %4302 = vmatpush1.bf16.msra.mxu0 %v6234_v0  ;;  %5499 = vmatpush3.bf16.msra.mxu1 %v6237_v48 }
 0x61c   :  { %4303 = vmatprep.subr.bf16.mxu0 %v6240_v49  ;;  %5500 = vmatprep.subr.bf16.mxu1 %v6530_v15 }
 0x61f   :  { %4304 = vmatpush1.bf16.msra.mxu0 %v6238_v50  ;;  %5501 = vmatpush3.bf16.msra.mxu1 %v6241_v52 }
 0x620   :  { %4305 = vmatprep.subr.bf16.mxu0 %v6244_v53  ;;  %5502 = vmatprep.subr.bf16.mxu1 %v6530_v15 }
 0x623   :  { %4306 = vmatpush1.bf16.msra.mxu0 %v6242_v47  ;;  %5503 = vmatpush3.bf16.msra.mxu1 %v6245_v54 }
 0x624   :  { %4307 = vmatprep.subr.bf16.mxu0 %v6248_v55  ;;  %5504 = vmatprep.subr.bf16.mxu1 %v6530_v15 }
 0x627   :  { %4308 = vmatpush1.bf16.msra.mxu0 %v6246_v56  ;;  %5505 = vmatpush3.bf16.msra.mxu1 %v6249_v58 }
 0x628   :  { %5510 = vmatprep.subr.bf16.mxu0 %v6530_v15  ;;  %5419 = vmatprep.subr.bf16.mxu1 %v6251_v61 }
 0x62a   :  { %4326 = vmatmul.mubr.bf16.vlgmr.msra.gmra.mrb[28].mxu0 %v6833_v28  ;;  %5507 = vmatmul.mubr.bf16.vlgmr.msra.gmra.mrb[28].mxu1 %v6833_v28 }
 0x62b   :  { %5526 = vmatprep.mubr.msk.bf16.mxu0 %vm6531_vm14, %v6530_v15  ;;  %5511 = vmatpush3.bf16.msra.mxu0 %v6250_v60 }
 0x62c   :  { %5420 = vmatpush3.bf16.msra.mxu1 %v6252_v62  ;;  %5512 = vmatprep.subr.bf16.mxu0 %v6530_v15 }
 0x62d   :  { %5421 = vmatprep.subr.bf16.mxu1 %v6254_v51 }
 0x62f   :  { %5513 = vmatpush3.bf16.msra.mxu0 %v6253_v40 }
 0x630   :  { %5422 = vmatpush3.bf16.msra.mxu1 %v6255_v59  ;;  %5514 = vmatprep.subr.bf16.mxu0 %v6530_v15 }
 0x631   :  { %5423 = vmatprep.subr.bf16.mxu1 %v6257_v1 }
 0x633   :  { %5515 = vmatpush3.bf16.msra.mxu0 %v6256_v63 }
 0x634   :  { %5516 = vmatprep.subr.bf16.mxu0 %v6530_v15  ;;  %5424 = vmatpush3.bf16.msra.mxu1 %v6258_v2 }
 0x635   :  { %5425 = vmatprep.subr.bf16.mxu1 %v6260_v4 }
 0x637   :  { %5517 = vmatpush3.bf16.msra.mxu0 %v6259_v3 }
 0x638   :  { %5518 = vmatprep.subr.bf16.mxu0 %v6530_v15  ;;  %5426 = vmatpush3.bf16.msra.mxu1 %v6261_v5 }
 0x639   :  { %5427 = vmatprep.subr.bf16.mxu1 %v6263_v7 }
 0x63b   :  { %5519 = vmatpush3.bf16.msra.mxu0 %v6262_v6 }
 0x63c   :  { %5520 = vmatprep.subr.bf16.mxu0 %v6530_v15  ;;  %5428 = vmatpush3.bf16.msra.mxu1 %v6264_v8 }
 0x63d   :  { %5429 = vmatprep.subr.bf16.mxu1 %v6266_v10 }
 0x63f   :  { %5521 = vmatpush3.bf16.msra.mxu0 %v6265_v9 }
 0x640   :  { %5522 = vmatprep.subr.bf16.mxu0 %v6530_v15  ;;  %5430 = vmatpush3.bf16.msra.mxu1 %v6267_v11  ;;  %v5248_v11 = vld [vmem:[%s6883_s14] ss:$0 sm:$0xff] }
 0x641   :  { %5431 = vmatprep.subr.bf16.mxu1 %v6269_v13 }
 0x643   :  { %5523 = vmatpush3.bf16.msra.mxu0 %v6268_v12 }
 0x644   :  { %5524 = vmatprep.subr.bf16.mxu0 %v6530_v15  ;;  %5432 = vmatpush3.bf16.msra.mxu1 %v6270_v14  ;;  %v3854_v15 = vrot.slane %v3849_v25, %v6725_v41 }
 0x645   :  { %5433 = vmatprep.subr.bf16.mxu1 %v6272_v17 }
 0x647   :  { %5525 = vmatpush3.bf16.msra.mxu0 %v6271_v16 }
 0x648   :  { %5434 = vmatpush3.bf16.msra.mxu1 %v6273_v18 }
 0x6dd   :  { %v5404_v19 = vpop.f32.mrb[24].mxu1 }
 0x6de   :  { %v5405_v20 = vpop.f32.mrb[25].mxu1 }
 0x6df   :  { %v5406_v21 = vadd.f32 %v5405_v20, %v5404_v19  ;;  %v5407_v22 = vpop.f32.mrb[26].mxu1 }
 0x6e0   :  { %v5408_v23 = vpop.f32.mrb[27].mxu1 }
 0x6e1   :  { %v5409_v24 = vadd.f32 %v5408_v23, %v5407_v22  ;;  %v4371_v28 = vadd.f32 %v5406_v21, %v3862_v26 }
 0x6e3   :  { %v4374_v37 = vadd.f32 %v5409_v24, %v3862_v26 }
 0x6fd   :  { %v4327_v29 = vpop.f32.mrb[28].mxu0  ;;  %v4411_v30 = vpop.f32.mrb[28].mxu1 }
 0x6fe   :  { %v5550_v31 = vadd.f32 %v4327_v29, %v3854_v15  ;;  %v4412_v32 = vadd.f32 %v4411_v30, %v4371_v28  ;;  %v4329_v33 = vpop.f32.mrb[29].mxu0  ;;  %v5508_v34 = vpop.f32.mrb[29].mxu1 }
 0x6ff   :  { %v5551_v35 = vadd.f32 %v4329_v33, %v3858_v27  ;;  %v4331_v36 = vpop.f32.mrb[30].mxu0  ;;  %v4414_v38 = vpop.f32.mrb[30].mxu1 }
 0x700   :  { %v4424_v39 = vmul.f32 1.442695, %v5550_v31  ;;  %v4428_v42 = vmul.f32 1.442695, %v4412_v32  ;;  %v5552_v45 = vadd.f32 %v4331_v36, %v3854_v15  ;;  %v4415_v57 = vadd.f32 %v4414_v38, %v4374_v37  ;;  %v4333_v46 = vpop.f32.mrb[31].mxu0  ;;  %v5509_v41 = vpop.f32.mrb[31].mxu1 }
 0x701   :  { %v4426_v44 = vmul.f32 1.442695, %v5551_v35  ;;  %v5553_v43 = vadd.f32 %v4333_v46, %v3858_v27  ;;  %vm4418_vm5 = vcmp.gt.f32.partialorder %v5550_v31, 0.0  ;;  %vm4420_vm6 = vcmp.gt.f32.partialorder %v4412_v32, 0.0 }
 0x702   :  { %6342 = vpow2.f32 %v4424_v39  ;;  %v4430_v0 = vmul.f32 1.442695, %v5552_v45  ;;  %v4434_v48 = vmul.f32 1.442695, %v4415_v57  ;;  %vm4419_vm7 = vcmp.gt.f32.partialorder %v5551_v35, 0.0 }
 0x703   :  { %6344 = vpow2.f32 %v4428_v42  ;;  %v4432_v49 = vmul.f32 1.442695, %v5553_v43  ;;  %vm4421_vm8 = vcmp.gt.f32.partialorder %v5552_v45, 0.0  ;;  %vm4423_vm9 = vcmp.gt.f32.partialorder %v4415_v57, 0.0 }
 0x704   :  { %6346 = vpow2.f32 %v4426_v44  ;;  %vm4422_vm10 = vcmp.gt.f32.partialorder %v5553_v43, 0.0 }
 0x705   :  { %6348 = vpow2.f32 %v4430_v0 }
 0x706   :  { %6350 = vpow2.f32 %v4434_v48 }
 0x707   :  { %6352 = vpow2.f32 %v4432_v49 }
 0x70c   :  { %v6343_v50 = vpop.eup %6342 }
 0x70d   :  { %v6345_v52 = vpop.eup %6344  ;;  %v5242_v47 = vadd.f32 -1.0, %v6343_v50 }
 0x70e   :  { %v6347_v53 = vpop.eup %6346  ;;  %v5244_v55 = vadd.f32 -1.0, %v6345_v52 }
 0x70f   :  { %v6349_v54 = vpop.eup %6348  ;;  %v5243_v58 = vadd.f32 -1.0, %v6347_v53  ;;  %v4442_v51 = vsel %vm4418_vm5, %v5550_v31, %v5242_v47 }
 0x710   :  { %v6351_v56 = vpop.eup %6350  ;;  %v5245_v60 = vadd.f32 -1.0, %v6349_v54  ;;  %v4444_v63 = vsel %vm4420_vm6, %v4412_v32, %v5244_v55 }
 0x711   :  { %v6353_v61 = vpop.eup %6352  ;;  %v5247_v62 = vadd.f32 -1.0, %v6351_v56  ;;  %v4443_v4 = vsel %vm4419_vm7, %v5551_v35, %v5243_v58 }
 0x712   :  { %v4445_v40 = vsel %vm4421_vm8, %v5552_v45, %v5245_v60  ;;  %v5246_v59 = vadd.f32 -1.0, %v6353_v61 }
 0x713   :  { %v4448_v1 = vpack.c.bf16 %v4445_v40, %v4442_v51  ;;  %v4447_v2 = vsel %vm4423_vm9, %v4415_v57, %v5247_v62 }
 0x714   :  { %v4450_v3 = vpack.c.bf16 %v4447_v2, %v4444_v63  ;;  %v4446_v5 = vsel %vm4422_vm10, %v5553_v43, %v5246_v59 }
 0x715   :  { %v4449_v6 = vpack.c.bf16 %v4446_v5, %v4443_v4 }
 0x716   :  { %5527 = vmatmul.mubr.bf16.vlgmr.msra.gmra.mrb[32].mxu0 %v4450_v3 }
 0x717   :  { %4682 = vmatprep.mubr.bf16.mxu1 %v4449_v6 }
 0x718   :  { %4683 = vmatmul.mubr.bf16.vlgmr.msra.gmra.mrb[32].mxu1 %v4448_v1 }
 0x7e9   :  { %v4725_v7 = vpop.f32.mrb[32].mxu0 }
 0x7ea   :  { %v5528_v8 = vpop.f32.mrb[33].mxu0 }
 0x7eb   :  { %v5435_v9 = vpop.f32.mrb[32].mxu1  ;;  %v4728_v10 = vpop.f32.mrb[34].mxu0 }
 0x7ec   :  { %v5436_v12 = vpop.f32.mrb[33].mxu1  ;;  %v5529_v13 = vpop.f32.mrb[35].mxu0 }
 0x7ed   :  { %v5437_v14 = vadd.f32 %v5436_v12, %v5435_v9  ;;  %v5438_v16 = vpop.f32.mrb[34].mxu1 }
 0x7ee   :  { %v5439_v17 = vpop.f32.mrb[35].mxu1 }
 0x7ef   :  { %v4685_v18 = vadd.f32 %v5437_v14, %v5248_v11  ;;  %v5440_v19 = vadd.f32 %v5439_v17, %v5438_v16 }
 0x7f1   :  { %v4726_v20 = vadd.f32 %v4725_v7, %v4685_v18  ;;  %v4688_v21 = vadd.f32 %v5440_v19, %v5248_v11 }
 0x7f3   :  { %v4729_v22 = vadd.f32 %v4728_v10, %v4688_v21 }
 0x7f5   :  { %v5280_v23 = vpack.c.bf16 %v4729_v22, %v4726_v20 }
 0x7f7   :  { %5281 = vst [vmem:[%s6886_s25] sm:$0xff] %v5280_v23  }
 0x7f8   :  { %4746 = vsyncpa [#allocation3], 1 }
 0x7f9   :  { %4747 = vsyncpa [#allocation5], 1 }
 0x7fa   :  { %4748 = vsyncpa [#allocation8], 1 }
 0x7fb   :  { %4749 = vsyncpa [#allocation11], 1 }

</bundles_post_ra>
